<compile_context>
chip_gen: v7x
topology: tpu7x:2x2x1
jax: 0.10.0
libtpu: 0.0.40
codegen_flags: <defaults>
</compile_context>

<pallas_src>
import functools

import jax
import jax.numpy as jnp
from jax.experimental import pallas as pl
from jax.experimental.pallas import tpu as pltpu

# ----------------------------- config (small) --------------------------------
B = 2            # batch
C_IN = 4         # latent channels
C_OUT = 8        # PixArt out_channels = 2 * in_channels
H = W = 16       # latent spatial
P = 2            # patch size
DIM = 32         # hidden size
HEADS = 2        # attention heads
HEAD_DIM = DIM // HEADS
LAYERS = 2       # transformer blocks
FF_DIM = 4 * DIM # feed-forward inner dim ("gelu-approximate")
TXT_SEQ = 8      # text tokens
CAP_DIM = 24     # caption_channels (text encoder width)
FREQ_DIM = 32    # sinusoidal timestep embedding width
LN_EPS = 1e-6

_PARALLEL_1D = pltpu.CompilerParams(dimension_semantics=("parallel",))


# ----------------------------- small helpers ---------------------------------
def _gelu_tanh_f32(x):
    c = 0.7978845608028654
    return 0.5 * x * (1.0 + jnp.tanh(c * (x + 0.044715 * x * x * x)))


def _layernorm_mod_f32(x, scale, shift):
    """LayerNorm (no affine) over last dim in f32, then y*(1+scale)+shift."""
    mu = jnp.mean(x, axis=-1, keepdims=True)
    var = jnp.mean((x - mu) * (x - mu), axis=-1, keepdims=True)
    xn = (x - mu) * jax.lax.rsqrt(var + LN_EPS)
    return xn * (1.0 + scale) + shift


def _softmax_attn_head(qh, kh, vh, scale, bias=None):
    """Single-head attention; qh/kh/vh bf16, stats f32, approx-recip norm."""
    s = jax.lax.dot_general(qh, kh, (((1,), (1,)), ((), ())),
                            preferred_element_type=jnp.float32) * scale
    if bias is not None:
        s = s + bias
    m = jnp.max(s, axis=-1, keepdims=True)
    p = jnp.exp(s - m)
    denom = jnp.sum(p, axis=-1, keepdims=True)
    p = p * pl.reciprocal(denom, approx=True)
    return jnp.dot(p.astype(jnp.bfloat16), vh, preferred_element_type=jnp.float32)


# ----------------------------- Pallas kernels --------------------------------
def _patch_embed_kernel(tok_ref, w_ref, b_ref, pos_ref, o_ref):
    t = tok_ref[0].astype(jnp.bfloat16)                      # (T, C*P*P)
    y = jnp.dot(t, w_ref[...], preferred_element_type=jnp.float32)
    o_ref[0] = (y + b_ref[...] + pos_ref[...]).astype(o_ref.dtype)


def _self_attn_block_kernel(x_ref, scale_ref, shift_ref, gate_ref,
                            wqkv_ref, bqkv_ref, wo_ref, bo_ref, o_ref):
    x = x_ref[0].astype(jnp.float32)                         # (T, D)
    nx = _layernorm_mod_f32(x, scale_ref[0], shift_ref[0])   # adaLN + mod
    # fused QKV projection (one MXU matmul, bf16 operands, f32 accumulate)
    qkv = jnp.dot(nx.astype(jnp.bfloat16), wqkv_ref[...],
                  preferred_element_type=jnp.float32) + bqkv_ref[...]
    q, k, v = qkv[:, 0:DIM], qkv[:, DIM:2 * DIM], qkv[:, 2 * DIM:3 * DIM]
    wo = wo_ref[...]                                         # (D, D) bf16
    scale = HEAD_DIM ** -0.5
    proj = None
    for hix in range(HEADS):                                 # in-kernel heads
        sl = slice(hix * HEAD_DIM, (hix + 1) * HEAD_DIM)
        oh = _softmax_attn_head(q[:, sl].astype(jnp.bfloat16),
                                k[:, sl].astype(jnp.bfloat16),
                                v[:, sl].astype(jnp.bfloat16), scale)
        # head merge folded into the output projection: concat(o_h) @ Wo
        # == sum_h o_h @ Wo[h*hd:(h+1)*hd, :]
        ph = jnp.dot(oh.astype(jnp.bfloat16), wo[sl, :],
                     preferred_element_type=jnp.float32)
        proj = ph if proj is None else proj + ph
    proj = proj + bo_ref[...]
    o_ref[0] = (x + gate_ref[0] * proj).astype(o_ref.dtype)  # fused gated residual


def _cross_attn_block_kernel(x_ref, enc_ref, bias_ref,
                             wq_ref, bq_ref, wkv_ref, bkv_ref,
                             wo_ref, bo_ref, o_ref):
    x = x_ref[0].astype(jnp.float32)                         # (T, D)
    enc = enc_ref[0]                                         # (Tk, D) bf16
    q = jnp.dot(x.astype(jnp.bfloat16), wq_ref[...],
                preferred_element_type=jnp.float32) + bq_ref[...]
    kv = jnp.dot(enc, wkv_ref[...],
                 preferred_element_type=jnp.float32) + bkv_ref[...]
    k, v = kv[:, 0:DIM], kv[:, DIM:2 * DIM]
    bias = bias_ref[0]                                       # (1, Tk) additive mask
    wo = wo_ref[...]
    scale = HEAD_DIM ** -0.5
    proj = None
    for hix in range(HEADS):
        sl = slice(hix * HEAD_DIM, (hix + 1) * HEAD_DIM)
        oh = _softmax_attn_head(q[:, sl].astype(jnp.bfloat16),
                                k[:, sl].astype(jnp.bfloat16),
                                v[:, sl].astype(jnp.bfloat16), scale, bias)
        ph = jnp.dot(oh.astype(jnp.bfloat16), wo[sl, :],
                     preferred_element_type=jnp.float32)
        proj = ph if proj is None else proj + ph
    proj = proj + bo_ref[...]
    o_ref[0] = (x + proj).astype(o_ref.dtype)                # fused residual


def _ff_block_kernel(x_ref, scale_ref, shift_ref, gate_ref,
                     w1_ref, b1_ref, w2_ref, b2_ref, o_ref):
    x = x_ref[0].astype(jnp.float32)                         # (T, D)
    nx = _layernorm_mod_f32(x, scale_ref[0], shift_ref[0])
    h1 = jnp.dot(nx.astype(jnp.bfloat16), w1_ref[...],
                 preferred_element_type=jnp.float32) + b1_ref[...]
    h1 = _gelu_tanh_f32(h1)                                  # f32 elementwise (v5e-safe)
    h2 = jnp.dot(h1.astype(jnp.bfloat16), w2_ref[...],
                 preferred_element_type=jnp.float32) + b2_ref[...]
    o_ref[0] = (x + gate_ref[0] * h2).astype(o_ref.dtype)    # fused gated residual


def _final_head_kernel(x_ref, scale_ref, shift_ref, w_ref, b_ref, o_ref):
    x = x_ref[0].astype(jnp.float32)
    nx = _layernorm_mod_f32(x, scale_ref[0], shift_ref[0])
    y = jnp.dot(nx.astype(jnp.bfloat16), w_ref[...],
                preferred_element_type=jnp.float32) + b_ref[...]
    o_ref[0] = y.astype(o_ref.dtype)


# ----------------------------- pallas_call wrappers ---------------------------
def patch_embed(tokens, w, b, pos):
    Bx, T, Cpp = tokens.shape
    D = w.shape[1]
    return pl.pallas_call(
        _patch_embed_kernel,
        out_shape=jax.ShapeDtypeStruct((Bx, T, D), jnp.float32),
        grid=(Bx,),
        in_specs=[
            pl.BlockSpec((1, T, Cpp), lambda i: (i, 0, 0)),
            pl.BlockSpec((Cpp, D), lambda i: (0, 0)),
            pl.BlockSpec((1, D), lambda i: (0, 0)),
            pl.BlockSpec((T, D), lambda i: (0, 0)),
        ],
        out_specs=pl.BlockSpec((1, T, D), lambda i: (i, 0, 0)),
        compiler_params=_PARALLEL_1D,
    )(tokens, w, b.reshape(1, D), pos)


def self_attn_block(x, scale, shift, gate, wqkv, bqkv, wo, bo):
    Bx, T, D = x.shape
    return pl.pallas_call(
        _self_attn_block_kernel,
        out_shape=jax.ShapeDtypeStruct((Bx, T, D), x.dtype),
        grid=(Bx,),
        in_specs=[
            pl.BlockSpec((1, T, D), lambda i: (i, 0, 0)),
            pl.BlockSpec((1, 1, D), lambda i: (i, 0, 0)),
            pl.BlockSpec((1, 1, D), lambda i: (i, 0, 0)),
            pl.BlockSpec((1, 1, D), lambda i: (i, 0, 0)),
            pl.BlockSpec((D, 3 * D), lambda i: (0, 0)),
            pl.BlockSpec((1, 3 * D), lambda i: (0, 0)),
            pl.BlockSpec((D, D), lambda i: (0, 0)),
            pl.BlockSpec((1, D), lambda i: (0, 0)),
        ],
        out_specs=pl.BlockSpec((1, T, D), lambda i: (i, 0, 0)),
        compiler_params=_PARALLEL_1D,
    )(x, scale, shift, gate, wqkv, bqkv.reshape(1, 3 * D), wo, bo.reshape(1, D))


def cross_attn_block(x, enc, bias, wq, bq, wkv, bkv, wo, bo):
    Bx, T, D = x.shape
    Tk = enc.shape[1]
    return pl.pallas_call(
        _cross_attn_block_kernel,
        out_shape=jax.ShapeDtypeStruct((Bx, T, D), x.dtype),
        grid=(Bx,),
        in_specs=[
            pl.BlockSpec((1, T, D), lambda i: (i, 0, 0)),
            pl.BlockSpec((1, Tk, D), lambda i: (i, 0, 0)),
            pl.BlockSpec((1, 1, Tk), lambda i: (i, 0, 0)),
            pl.BlockSpec((D, D), lambda i: (0, 0)),
            pl.BlockSpec((1, D), lambda i: (0, 0)),
            pl.BlockSpec((D, 2 * D), lambda i: (0, 0)),
            pl.BlockSpec((1, 2 * D), lambda i: (0, 0)),
            pl.BlockSpec((D, D), lambda i: (0, 0)),
            pl.BlockSpec((1, D), lambda i: (0, 0)),
        ],
        out_specs=pl.BlockSpec((1, T, D), lambda i: (i, 0, 0)),
        compiler_params=_PARALLEL_1D,
    )(x, enc, bias, wq, bq.reshape(1, D), wkv, bkv.reshape(1, 2 * D),
      wo, bo.reshape(1, D))


def ff_block(x, scale, shift, gate, w1, b1, w2, b2):
    Bx, T, D = x.shape
    F = w1.shape[1]
    return pl.pallas_call(
        _ff_block_kernel,
        out_shape=jax.ShapeDtypeStruct((Bx, T, D), x.dtype),
        grid=(Bx,),
        in_specs=[
            pl.BlockSpec((1, T, D), lambda i: (i, 0, 0)),
            pl.BlockSpec((1, 1, D), lambda i: (i, 0, 0)),
            pl.BlockSpec((1, 1, D), lambda i: (i, 0, 0)),
            pl.BlockSpec((1, 1, D), lambda i: (i, 0, 0)),
            pl.BlockSpec((D, F), lambda i: (0, 0)),
            pl.BlockSpec((1, F), lambda i: (0, 0)),
            pl.BlockSpec((F, D), lambda i: (0, 0)),
            pl.BlockSpec((1, D), lambda i: (0, 0)),
        ],
        out_specs=pl.BlockSpec((1, T, D), lambda i: (i, 0, 0)),
        compiler_params=_PARALLEL_1D,
    )(x, scale, shift, gate, w1, b1.reshape(1, F), w2, b2.reshape(1, D))


def final_head(x, scale, shift, w, b):
    Bx, T, D = x.shape
    N = w.shape[1]
    return pl.pallas_call(
        _final_head_kernel,
        out_shape=jax.ShapeDtypeStruct((Bx, T, N), jnp.float32),
        grid=(Bx,),
        in_specs=[
            pl.BlockSpec((1, T, D), lambda i: (i, 0, 0)),
            pl.BlockSpec((1, 1, D), lambda i: (i, 0, 0)),
            pl.BlockSpec((1, 1, D), lambda i: (i, 0, 0)),
            pl.BlockSpec((D, N), lambda i: (0, 0)),
            pl.BlockSpec((1, N), lambda i: (0, 0)),
        ],
        out_specs=pl.BlockSpec((1, T, N), lambda i: (i, 0, 0)),
        compiler_params=_PARALLEL_1D,
    )(x, scale, shift, w, b.reshape(1, N))


# ----------------------------- model pieces ----------------------------------
def sinusoidal_timestep_embedding(timesteps, dim, max_period=10000.0):
    # matches diffusers get_timestep_embedding(flip_sin_to_cos=True, shift=0)
    half = dim // 2
    freqs = jnp.exp(-jnp.log(max_period) *
                    jnp.arange(half, dtype=jnp.float32) / half)
    args = timesteps.astype(jnp.float32)[:, None] * freqs[None, :]
    return jnp.concatenate([jnp.cos(args), jnp.sin(args)], axis=-1)


def _sincos_1d(embed_dim, pos):
    omega = 1.0 / (10000.0 ** (jnp.arange(embed_dim // 2, dtype=jnp.float32)
                               / (embed_dim / 2.0)))
    out = pos[:, None] * omega[None, :]
    return jnp.concatenate([jnp.sin(out), jnp.cos(out)], axis=-1)


def sincos_2d_pos_embed(embed_dim, gh, gw):
    gy, gx = jnp.meshgrid(jnp.arange(gh, dtype=jnp.float32),
                          jnp.arange(gw, dtype=jnp.float32), indexing="ij")
    emb_h = _sincos_1d(embed_dim // 2, gy.reshape(-1))
    emb_w = _sincos_1d(embed_dim // 2, gx.reshape(-1))
    return jnp.concatenate([emb_h, emb_w], axis=-1)     # (gh*gw, embed_dim)


def patchify(x):
    # x: (B, C, H, W) NCHW -> (B, T, C*P*P) with (C, ph, pw) flatten order,
    # identical to Conv2d(kernel=P, stride=P) followed by flatten.
    b, c, hh, ww = x.shape
    h, w = hh // P, ww // P
    x = x.reshape(b, c, h, P, w, P)
    x = x.transpose(0, 2, 4, 1, 3, 5)
    return x.reshape(b, h * w, c * P * P)


# ----------------------------- parameters ------------------------------------
def _lin_w(key, din, dout, dtype):
    return (jax.random.normal(key, (din, dout), jnp.float32) * 0.02).astype(dtype)


def _lin(key, din, dout, dtype=jnp.float32):
    return {"w": _lin_w(key, din, dout, dtype),
            "b": jnp.zeros((dout,), jnp.float32)}


def init_params(key):
    keys = iter(jax.random.split(key, 64))
    params = {
        # PatchEmbed (Conv2d as matmul, bf16 MXU weight) + fixed sincos pos-embed
        "patch": _lin(next(keys), C_IN * P * P, DIM, jnp.bfloat16),
        "pos_embed": sincos_2d_pos_embed(DIM, H // P, W // P),
        # TimestepEmbedding / AdaLayerNormSingle / caption projection: tiny,
        # left in f32 for plain-XLA execution.
        "t1": _lin(next(keys), FREQ_DIM, DIM),
        "t2": _lin(next(keys), DIM, DIM),
        "adaln": _lin(next(keys), DIM, 6 * DIM),
        "cap1": _lin(next(keys), CAP_DIM, DIM),
        "cap2": _lin(next(keys), DIM, DIM),
        # final
        "final_sst": jax.random.normal(next(keys), (2, DIM), jnp.float32)
                     / DIM ** 0.5,
        "proj_out": _lin(next(keys), DIM, P * P * C_OUT, jnp.bfloat16),
        "blocks": [],
    }
    for _ in range(LAYERS):
        wq1 = _lin_w(next(keys), DIM, DIM, jnp.float32)
        wk1 = _lin_w(next(keys), DIM, DIM, jnp.float32)
        wv1 = _lin_w(next(keys), DIM, DIM, jnp.float32)
        wq2 = _lin_w(next(keys), DIM, DIM, jnp.float32)
        wk2 = _lin_w(next(keys), DIM, DIM, jnp.float32)
        wv2 = _lin_w(next(keys), DIM, DIM, jnp.float32)
        blk = {
            "sst": jax.random.normal(next(keys), (6, DIM), jnp.float32)
                   / DIM ** 0.5,
            # self-attention: fused QKV weight (D, 3D)
            "attn1_wqkv": jnp.concatenate([wq1, wk1, wv1], axis=1)
                          .astype(jnp.bfloat16),
            "attn1_bqkv": jnp.zeros((3 * DIM,), jnp.float32),
            "attn1_wo": _lin_w(next(keys), DIM, DIM, jnp.bfloat16),
            "attn1_bo": jnp.zeros((DIM,), jnp.float32),
            # cross-attention: separate Q, fused KV weight (D, 2D)
            "attn2_wq": wq2.astype(jnp.bfloat16),
            "attn2_bq": jnp.zeros((DIM,), jnp.float32),
            "attn2_wkv": jnp.concatenate([wk2, wv2], axis=1)
                         .astype(jnp.bfloat16),
            "attn2_bkv": jnp.zeros((2 * DIM,), jnp.float32),
            "attn2_wo": _lin_w(next(keys), DIM, DIM, jnp.bfloat16),
            "attn2_bo": jnp.zeros((DIM,), jnp.float32),
            # feed-forward
            "ff1_w": _lin_w(next(keys), DIM, FF_DIM, jnp.bfloat16),
            "ff1_b": jnp.zeros((FF_DIM,), jnp.float32),
            "ff2_w": _lin_w(next(keys), FF_DIM, DIM, jnp.bfloat16),
            "ff2_b": jnp.zeros((DIM,), jnp.float32),
        }
        params["blocks"].append(blk)
    return params


# ----------------------------- forward pass ----------------------------------
def pixart_transformer_forward(params, hidden_states, encoder_hidden_states,
                               timestep, encoder_attention_mask):
    b, c, hh, ww = hidden_states.shape
    h, w = hh // P, ww // P

    # --- patch embedding (Conv2d as matmul) + pos embed: 1 fused kernel ---
    tokens = patchify(hidden_states)
    x = patch_embed(tokens, params["patch"]["w"], params["patch"]["b"],
                    params["pos_embed"])

    # --- conditioning chain (tiny; left to plain XLA on purpose) ---
    t_sin = sinusoidal_timestep_embedding(timestep, FREQ_DIM)
    t_emb = jax.nn.silu(t_sin @ params["t1"]["w"] + params["t1"]["b"])
    embedded_t = t_emb @ params["t2"]["w"] + params["t2"]["b"]      # (B, DIM)
    t6 = jax.nn.silu(embedded_t) @ params["adaln"]["w"] + params["adaln"]["b"]

    enc = _gelu_tanh_f32(encoder_hidden_states @ params["cap1"]["w"]
                         + params["cap1"]["b"])
    enc = enc @ params["cap2"]["w"] + params["cap2"]["b"]
    enc = enc.astype(jnp.bfloat16)   # cast once; reused by every cross-attn layer

    # --- encoder attention mask -> additive bias (B, 1, Tk), kept f32 ---
    enc_bias = ((1.0 - encoder_attention_mask.astype(jnp.float32))
                * -10000.0)[:, None, :]

    # --- transformer blocks (ada_norm_single): 3 fused kernels per block ---
    for blk in params["blocks"]:
        mod = blk["sst"][None] + t6.reshape(b, 6, DIM)
        shift_msa, scale_msa, gate_msa = mod[:, 0:1], mod[:, 1:2], mod[:, 2:3]
        shift_mlp, scale_mlp, gate_mlp = mod[:, 3:4], mod[:, 4:5], mod[:, 5:6]

        # adaLN + QKV + MHA + Wo + gated residual, all in one kernel
        x = self_attn_block(x, scale_msa, shift_msa, gate_msa,
                            blk["attn1_wqkv"], blk["attn1_bqkv"],
                            blk["attn1_wo"], blk["attn1_bo"])

        # cross attention (no norm for ada_norm_single in PixArt) + residual
        x = cross_attn_block(x, enc, enc_bias,
                             blk["attn2_wq"], blk["attn2_bq"],
                             blk["attn2_wkv"], blk["attn2_bkv"],
                             blk["attn2_wo"], blk["attn2_bo"])

        # adaLN + FF (gelu-approximate) + gated residual
        x = ff_block(x, scale_mlp, shift_mlp, gate_mlp,
                     blk["ff1_w"], blk["ff1_b"], blk["ff2_w"], blk["ff2_b"])

    # --- output head: final adaLN + proj_out in one kernel ---
    fmod = params["final_sst"][None] + embedded_t[:, None]     # (B, 2, DIM)
    shift, scale = fmod[:, 0:1], fmod[:, 1:2]
    x = final_head(x, scale, shift,
                   params["proj_out"]["w"], params["proj_out"]["b"])

    # unpatchify -> NCHW
    x = x.reshape(b, h, w, P, P, C_OUT)
    x = jnp.einsum("nhwpqc->nchpwq", x)
    out = x.reshape(b, C_OUT, h * P, w * P)
    return (out,)


@functools.partial(jax.jit)
def tracing_transformer_wrapper_forward(params, hidden_states,
                                        encoder_hidden_states, timestep,
                                        encoder_attention_mask):
    # Mirrors TracingTransformerWrapper.forward:
    # added_cond_kwargs={'resolution': None, 'aspect_ratio': None} is a no-op
    # for PixArt-Sigma; return_dict=False -> tuple output.
    return pixart_transformer_forward(params, hidden_states,
                                      encoder_hidden_states, timestep,
                                      encoder_attention_mask)


# ----------------------------- main -------------------------------------------
if __name__ == "__main__":
    key = jax.random.PRNGKey(0)
    k_h, k_e, k_p = jax.random.split(key, 3)

    hidden_states = jax.random.normal(k_h, (B, C_IN, H, W), jnp.float32)
    encoder_hidden_states = jax.random.normal(k_e, (B, TXT_SEQ, CAP_DIM),
                                              jnp.float32)
    timestep = jnp.full((B,), 999.0, jnp.float32)
    encoder_attention_mask = jnp.array(
        [[1, 1, 1, 1, 1, 0, 0, 0],
         [1, 1, 1, 1, 1, 1, 1, 0]], dtype=jnp.float32)

    params = init_params(k_p)

    (out,) = tracing_transformer_wrapper_forward(
        params, hidden_states, encoder_hidden_states, timestep,
        encoder_attention_mask)
    out = jax.block_until_ready(out)

    assert out.shape == (B, C_OUT, H, W), out.shape
    assert jnp.all(jnp.isfinite(out))
    print("KERNEL_OK")
</pallas_src>

<mosaic_0001>
module attributes {stable_mosaic.version = 11 : i64} {
  func.func @_patch_embed_kernel(%arg0: i32, %arg1: memref<1x64x16xf32, #tpu.memory_space<vmem>>, %arg2: memref<16x32xbf16, #tpu.memory_space<vmem>>, %arg3: memref<1x32xf32, #tpu.memory_space<vmem>>, %arg4: memref<64x32xf32, #tpu.memory_space<vmem>>, %arg5: memref<1x64x32xf32, #tpu.memory_space<vmem>>) attributes {dimension_semantics = [#tpu.dimension_semantics<parallel>], iteration_bounds = array<i64: 2>, scalar_prefetch = 0 : i64, scratch_operands = 0 : i64, tpu.core_type = #tpu.core_type<tc>, window_params = [{transform_indices = @transform_0, window_bounds = array<i64: 1, 64, 16>}, {pipeline_mode = #tpu.pipeline_mode<synchronous>, transform_indices = @transform_1, window_bounds = array<i64: 16, 32>}, {pipeline_mode = #tpu.pipeline_mode<synchronous>, transform_indices = @transform_2, window_bounds = array<i64: 1, 32>}, {pipeline_mode = #tpu.pipeline_mode<synchronous>, transform_indices = @transform_3, window_bounds = array<i64: 64, 32>}, {transform_indices = @transform_4, window_bounds = array<i64: 1, 64, 32>}]} {
    %c0 = arith.constant 0 : index
    %c0_0 = arith.constant 0 : index
    %c0_1 = arith.constant 0 : index
    %0 = vector.load %arg1[%c0, %c0_0, %c0_1] : memref<1x64x16xf32, #tpu.memory_space<vmem>>, vector<1x64x16xf32>
    %1 = vector.shape_cast %0 : vector<1x64x16xf32> to vector<64x16xf32>
    %2 = arith.truncf %1 : vector<64x16xf32> to vector<64x16xbf16>
    %c0_2 = arith.constant 0 : index
    %c0_3 = arith.constant 0 : index
    %3 = vector.load %arg2[%c0_2, %c0_3] : memref<16x32xbf16, #tpu.memory_space<vmem>>, vector<16x32xbf16>
    %cst = arith.constant dense<0.000000e+00> : vector<64x32xf32>
    %4 = tpu.matmul %2, %3, %cst {dimension_numbers = #tpu.dot_dimension_numbers<[1], [0], [0], [1], [0, 0, 1, 1], [], []>} : vector<64x16xbf16>, vector<16x32xbf16>, vector<64x32xf32> -> vector<64x32xf32>
    %c0_4 = arith.constant 0 : index
    %c0_5 = arith.constant 0 : index
    %5 = vector.load %arg3[%c0_4, %c0_5] : memref<1x32xf32, #tpu.memory_space<vmem>>, vector<1x32xf32>
    %6 = vector.broadcast %5 : vector<1x32xf32> to vector<64x32xf32>
    %7 = arith.addf %4, %6 : vector<64x32xf32>
    %c0_6 = arith.constant 0 : index
    %c0_7 = arith.constant 0 : index
    %8 = vector.load %arg4[%c0_6, %c0_7] : memref<64x32xf32, #tpu.memory_space<vmem>>, vector<64x32xf32>
    %9 = arith.addf %7, %8 : vector<64x32xf32>
    %c0_8 = arith.constant 0 : index
    %c0_9 = arith.constant 0 : index
    %c0_10 = arith.constant 0 : index
    %10 = vector.load %arg5[%c0_8, %c0_9, %c0_10] : memref<1x64x32xf32, #tpu.memory_space<vmem>>, vector<1x64x32xf32>
    %11 = vector.shape_cast %10 : vector<1x64x32xf32> to vector<64x32xf32>
    %12 = vector.shape_cast %9 : vector<64x32xf32> to vector<1x64x32xf32>
    tpu.vector_store %arg5[%c0_8, %c0_9, %c0_10], %12 {strides = array<i32>} : memref<1x64x32xf32, #tpu.memory_space<vmem>>, vector<1x64x32xf32>,
    return
  }
  func.func @transform_0(%arg0: i32) -> (i32, i32, i32) {
    %c0_i32 = arith.constant 0 : i32
    %c0_i32_0 = arith.constant 0 : i32
    %c0_i32_1 = arith.constant 0 : i32
    return %arg0, %c0_i32, %c0_i32_0 : i32, i32, i32
  }
  func.func @transform_1(%arg0: i32) -> (i32, i32) {
    %c0_i32 = arith.constant 0 : i32
    %c0_i32_0 = arith.constant 0 : i32
    %c0_i32_1 = arith.constant 0 : i32
    return %c0_i32, %c0_i32_0 : i32, i32
  }
  func.func @transform_2(%arg0: i32) -> (i32, i32) {
    %c0_i32 = arith.constant 0 : i32
    %c0_i32_0 = arith.constant 0 : i32
    %c0_i32_1 = arith.constant 0 : i32
    return %c0_i32, %c0_i32_0 : i32, i32
  }
  func.func @transform_3(%arg0: i32) -> (i32, i32) {
    %c0_i32 = arith.constant 0 : i32
    %c0_i32_0 = arith.constant 0 : i32
    %c0_i32_1 = arith.constant 0 : i32
    return %c0_i32, %c0_i32_0 : i32, i32
  }
  func.func @transform_4(%arg0: i32) -> (i32, i32, i32) {
    %c0_i32 = arith.constant 0 : i32
    %c0_i32_0 = arith.constant 0 : i32
    %c0_i32_1 = arith.constant 0 : i32
    return %arg0, %c0_i32, %c0_i32_0 : i32, i32, i32
  }
}

module attributes {stable_mosaic.version = 11 : i64} {
  func.func @_self_attn_block_kernel(%arg0: i32, %arg1: memref<1x64x32xf32, #tpu.memory_space<vmem>>, %arg2: memref<1x1x32xf32, #tpu.memory_space<vmem>>, %arg3: memref<1x1x32xf32, #tpu.memory_space<vmem>>, %arg4: memref<1x1x32xf32, #tpu.memory_space<vmem>>, %arg5: memref<32x96xbf16, #tpu.memory_space<vmem>>, %arg6: memref<1x96xf32, #tpu.memory_space<vmem>>, %arg7: memref<32x32xbf16, #tpu.memory_space<vmem>>, %arg8: memref<1x32xf32, #tpu.memory_space<vmem>>, %arg9: memref<1x64x32xf32, #tpu.memory_space<vmem>>) attributes {dimension_semantics = [#tpu.dimension_semantics<parallel>], iteration_bounds = array<i64: 2>, scalar_prefetch = 0 : i64, scratch_operands = 0 : i64, tpu.core_type = #tpu.core_type<tc>, window_params = [{transform_indices = @transform_0, window_bounds = array<i64: 1, 64, 32>}, {transform_indices = @transform_1, window_bounds = array<i64: 1, 1, 32>}, {transform_indices = @transform_2, window_bounds = array<i64: 1, 1, 32>}, {transform_indices = @transform_3, window_bounds = array<i64: 1, 1, 32>}, {pipeline_mode = #tpu.pipeline_mode<synchronous>, transform_indices = @transform_4, window_bounds = array<i64: 32, 96>}, {pipeline_mode = #tpu.pipeline_mode<synchronous>, transform_indices = @transform_5, window_bounds = array<i64: 1, 96>}, {pipeline_mode = #tpu.pipeline_mode<synchronous>, transform_indices = @transform_6, window_bounds = array<i64: 32, 32>}, {pipeline_mode = #tpu.pipeline_mode<synchronous>, transform_indices = @transform_7, window_bounds = array<i64: 1, 32>}, {transform_indices = @transform_8, window_bounds = array<i64: 1, 64, 32>}]} {
    %c0 = arith.constant 0 : index
    %c0_0 = arith.constant 0 : index
    %c0_1 = arith.constant 0 : index
    %0 = vector.load %arg1[%c0, %c0_0, %c0_1] : memref<1x64x32xf32, #tpu.memory_space<vmem>>, vector<1x64x32xf32>
    %1 = vector.shape_cast %0 : vector<1x64x32xf32> to vector<64x32xf32>
    %c0_2 = arith.constant 0 : index
    %c0_3 = arith.constant 0 : index
    %c0_4 = arith.constant 0 : index
    %2 = vector.load %arg2[%c0_2, %c0_3, %c0_4] : memref<1x1x32xf32, #tpu.memory_space<vmem>>, vector<1x1x32xf32>
    %3 = vector.shape_cast %2 : vector<1x1x32xf32> to vector<1x32xf32>
    %c0_5 = arith.constant 0 : index
    %c0_6 = arith.constant 0 : index
    %c0_7 = arith.constant 0 : index
    %4 = vector.load %arg3[%c0_5, %c0_6, %c0_7] : memref<1x1x32xf32, #tpu.memory_space<vmem>>, vector<1x1x32xf32>
    %5 = vector.shape_cast %4 : vector<1x1x32xf32> to vector<1x32xf32>
    %cst = arith.constant dense<0.000000e+00> : vector<64xf32>
    %6 = vector.multi_reduction <add>, %1, %cst [1] : vector<64x32xf32> to vector<64xf32>
    %7 = vector.shape_cast %6 : vector<64xf32> to vector<64x1xf32>
    %cst_8 = arith.constant 3.200000e+01 : f32
    %8 = vector.broadcast %cst_8 : f32 to vector<64x1xf32>
    %9 = arith.divf %7, %8 : vector<64x1xf32>
    %10 = vector.broadcast %9 : vector<64x1xf32> to vector<64x32xf32>
    %11 = arith.subf %1, %10 : vector<64x32xf32>
    %12 = vector.broadcast %9 : vector<64x1xf32> to vector<64x32xf32>
    %13 = arith.subf %1, %12 : vector<64x32xf32>
    %14 = arith.mulf %11, %13 : vector<64x32xf32>
    %cst_9 = arith.constant dense<0.000000e+00> : vector<64xf32>
    %15 = vector.multi_reduction <add>, %14, %cst_9 [1] : vector<64x32xf32> to vector<64xf32>
    %16 = vector.shape_cast %15 : vector<64xf32> to vector<64x1xf32>
    %cst_10 = arith.constant 3.200000e+01 : f32
    %17 = vector.broadcast %cst_10 : f32 to vector<64x1xf32>
    %18 = arith.divf %16, %17 : vector<64x1xf32>
    %19 = vector.broadcast %9 : vector<64x1xf32> to vector<64x32xf32>
    %20 = arith.subf %1, %19 : vector<64x32xf32>
    %cst_11 = arith.constant 9.99999997E-7 : f32
    %21 = vector.broadcast %cst_11 : f32 to vector<64x1xf32>
    %22 = arith.addf %18, %21 : vector<64x1xf32>
    %23 = math.rsqrt %22 : vector<64x1xf32>
    %24 = vector.broadcast %23 : vector<64x1xf32> to vector<64x32xf32>
    %25 = arith.mulf %20, %24 : vector<64x32xf32>
    %cst_12 = arith.constant 1.000000e+00 : f32
    %26 = vector.broadcast %cst_12 : f32 to vector<1x32xf32>
    %27 = arith.addf %26, %3 : vector<1x32xf32>
    %28 = vector.broadcast %27 : vector<1x32xf32> to vector<64x32xf32>
    %29 = arith.mulf %25, %28 : vector<64x32xf32>
    %30 = vector.broadcast %5 : vector<1x32xf32> to vector<64x32xf32>
    %31 = arith.addf %29, %30 : vector<64x32xf32>
    %32 = arith.truncf %31 : vector<64x32xf32> to vector<64x32xbf16>
    %c0_13 = arith.constant 0 : index
    %c0_14 = arith.constant 0 : index
    %33 = vector.load %arg5[%c0_13, %c0_14] : memref<32x96xbf16, #tpu.memory_space<vmem>>, vector<32x96xbf16>
    %cst_15 = arith.constant dense<0.000000e+00> : vector<64x96xf32>
    %34 = tpu.matmul %32, %33, %cst_15 {dimension_numbers = #tpu.dot_dimension_numbers<[1], [0], [0], [1], [0, 0, 1, 1], [], []>} : vector<64x32xbf16>, vector<32x96xbf16>, vector<64x96xf32> -> vector<64x96xf32>
    %c0_16 = arith.constant 0 : index
    %c0_17 = arith.constant 0 : index
    %35 = vector.load %arg6[%c0_16, %c0_17] : memref<1x96xf32, #tpu.memory_space<vmem>>, vector<1x96xf32>
    %36 = vector.broadcast %35 : vector<1x96xf32> to vector<64x96xf32>
    %37 = arith.addf %34, %36 : vector<64x96xf32>
    %38 = vector.extract_strided_slice %37 {offsets = [0, 0], sizes = [64, 32], strides = [1, 1]} : vector<64x96xf32> to vector<64x32xf32>
    %39 = vector.extract_strided_slice %37 {offsets = [0, 32], sizes = [64, 32], strides = [1, 1]} : vector<64x96xf32> to vector<64x32xf32>
    %40 = vector.extract_strided_slice %37 {offsets = [0, 64], sizes = [64, 32], strides = [1, 1]} : vector<64x96xf32> to vector<64x32xf32>
    %c0_18 = arith.constant 0 : index
    %c0_19 = arith.constant 0 : index
    %41 = vector.load %arg7[%c0_18, %c0_19] : memref<32x32xbf16, #tpu.memory_space<vmem>>, vector<32x32xbf16>
    %42 = vector.extract_strided_slice %38 {offsets = [0, 0], sizes = [64, 16], strides = [1, 1]} : vector<64x32xf32> to vector<64x16xf32>
    %43 = arith.truncf %42 : vector<64x16xf32> to vector<64x16xbf16>
    %44 = vector.extract_strided_slice %39 {offsets = [0, 0], sizes = [64, 16], strides = [1, 1]} : vector<64x32xf32> to vector<64x16xf32>
    %45 = arith.truncf %44 : vector<64x16xf32> to vector<64x16xbf16>
    %46 = vector.extract_strided_slice %40 {offsets = [0, 0], sizes = [64, 16], strides = [1, 1]} : vector<64x32xf32> to vector<64x16xf32>
    %47 = arith.truncf %46 : vector<64x16xf32> to vector<64x16xbf16>
    %cst_20 = arith.constant dense<0.000000e+00> : vector<64x64xf32>
    %48 = tpu.matmul %43, %45, %cst_20 {dimension_numbers = #tpu.dot_dimension_numbers<[1], [1], [0], [0], [0, 0, 1, 0], [], []>} : vector<64x16xbf16>, vector<64x16xbf16>, vector<64x64xf32> -> vector<64x64xf32>
    %cst_21 = arith.constant 2.500000e-01 : f32
    %49 = vector.broadcast %cst_21 : f32 to vector<64x64xf32>
    %50 = arith.mulf %48, %49 : vector<64x64xf32>
    %cst_22 = arith.constant dense<0xFF800000> : vector<64xf32>
    %51 = vector.multi_reduction <maximumf>, %50, %cst_22 [1] : vector<64x64xf32> to vector<64xf32>
    %52 = vector.shape_cast %51 : vector<64xf32> to vector<64x1xf32>
    %53 = vector.broadcast %52 : vector<64x1xf32> to vector<64x64xf32>
    %54 = arith.subf %50, %53 : vector<64x64xf32>
    %55 = math.exp %54 : vector<64x64xf32>
    %cst_23 = arith.constant dense<0.000000e+00> : vector<64xf32>
    %56 = vector.multi_reduction <add>, %55, %cst_23 [1] : vector<64x64xf32> to vector<64xf32>
    %57 = vector.shape_cast %56 : vector<64xf32> to vector<64x1xf32>
    %58 = tpu.reciprocal %57 {approx = true} : vector<64x1xf32> -> vector<64x1xf32>
    %59 = vector.broadcast %58 : vector<64x1xf32> to vector<64x64xf32>
    %60 = arith.mulf %55, %59 : vector<64x64xf32>
    %61 = arith.truncf %60 : vector<64x64xf32> to vector<64x64xbf16>
    %cst_24 = arith.constant dense<0.000000e+00> : vector<64x16xf32>
    %62 = tpu.matmul %61, %47, %cst_24 {dimension_numbers = #tpu.dot_dimension_numbers<[1], [0], [0], [1], [0, 0, 1, 1], [], []>} : vector<64x64xbf16>, vector<64x16xbf16>, vector<64x16xf32> -> vector<64x16xf32>
    %63 = arith.truncf %62 : vector<64x16xf32> to vector<64x16xbf16>
    %64 = vector.extract_strided_slice %41 {offsets = [0, 0], sizes = [16, 32], strides = [1, 1]} : vector<32x32xbf16> to vector<16x32xbf16>
    %cst_25 = arith.constant dense<0.000000e+00> : vector<64x32xf32>
    %65 = tpu.matmul %63, %64, %cst_25 {dimension_numbers = #tpu.dot_dimension_numbers<[1], [0], [0], [1], [0, 0, 1, 1], [], []>} : vector<64x16xbf16>, vector<16x32xbf16>, vector<64x32xf32> -> vector<64x32xf32>
    %66 = vector.extract_strided_slice %38 {offsets = [0, 16], sizes = [64, 16], strides = [1, 1]} : vector<64x32xf32> to vector<64x16xf32>
    %67 = arith.truncf %66 : vector<64x16xf32> to vector<64x16xbf16>
    %68 = vector.extract_strided_slice %39 {offsets = [0, 16], sizes = [64, 16], strides = [1, 1]} : vector<64x32xf32> to vector<64x16xf32>
    %69 = arith.truncf %68 : vector<64x16xf32> to vector<64x16xbf16>
    %70 = vector.extract_strided_slice %40 {offsets = [0, 16], sizes = [64, 16], strides = [1, 1]} : vector<64x32xf32> to vector<64x16xf32>
    %71 = arith.truncf %70 : vector<64x16xf32> to vector<64x16xbf16>
    %cst_26 = arith.constant dense<0.000000e+00> : vector<64x64xf32>
    %72 = tpu.matmul %67, %69, %cst_26 {dimension_numbers = #tpu.dot_dimension_numbers<[1], [1], [0], [0], [0, 0, 1, 0], [], []>} : vector<64x16xbf16>, vector<64x16xbf16>, vector<64x64xf32> -> vector<64x64xf32>
    %cst_27 = arith.constant 2.500000e-01 : f32
    %73 = vector.broadcast %cst_27 : f32 to vector<64x64xf32>
    %74 = arith.mulf %72, %73 : vector<64x64xf32>
    %cst_28 = arith.constant dense<0xFF800000> : vector<64xf32>
    %75 = vector.multi_reduction <maximumf>, %74, %cst_28 [1] : vector<64x64xf32> to vector<64xf32>
    %76 = vector.shape_cast %75 : vector<64xf32> to vector<64x1xf32>
    %77 = vector.broadcast %76 : vector<64x1xf32> to vector<64x64xf32>
    %78 = arith.subf %74, %77 : vector<64x64xf32>
    %79 = math.exp %78 : vector<64x64xf32>
    %cst_29 = arith.constant dense<0.000000e+00> : vector<64xf32>
    %80 = vector.multi_reduction <add>, %79, %cst_29 [1] : vector<64x64xf32> to vector<64xf32>
    %81 = vector.shape_cast %80 : vector<64xf32> to vector<64x1xf32>
    %82 = tpu.reciprocal %81 {approx = true} : vector<64x1xf32> -> vector<64x1xf32>
    %83 = vector.broadcast %82 : vector<64x1xf32> to vector<64x64xf32>
    %84 = arith.mulf %79, %83 : vector<64x64xf32>
    %85 = arith.truncf %84 : vector<64x64xf32> to vector<64x64xbf16>
    %cst_30 = arith.constant dense<0.000000e+00> : vector<64x16xf32>
    %86 = tpu.matmul %85, %71, %cst_30 {dimension_numbers = #tpu.dot_dimension_numbers<[1], [0], [0], [1], [0, 0, 1, 1], [], []>} : vector<64x64xbf16>, vector<64x16xbf16>, vector<64x16xf32> -> vector<64x16xf32>
    %87 = arith.truncf %86 : vector<64x16xf32> to vector<64x16xbf16>
    %88 = vector.extract_strided_slice %41 {offsets = [16, 0], sizes = [16, 32], strides = [1, 1]} : vector<32x32xbf16> to vector<16x32xbf16>
    %cst_31 = arith.constant dense<0.000000e+00> : vector<64x32xf32>
    %89 = tpu.matmul %87, %88, %cst_31 {dimension_numbers = #tpu.dot_dimension_numbers<[1], [0], [0], [1], [0, 0, 1, 1], [], []>} : vector<64x16xbf16>, vector<16x32xbf16>, vector<64x32xf32> -> vector<64x32xf32>
    %90 = arith.addf %65, %89 : vector<64x32xf32>
    %c0_32 = arith.constant 0 : index
    %c0_33 = arith.constant 0 : index
    %91 = vector.load %arg8[%c0_32, %c0_33] : memref<1x32xf32, #tpu.memory_space<vmem>>, vector<1x32xf32>
    %92 = vector.broadcast %91 : vector<1x32xf32> to vector<64x32xf32>
    %93 = arith.addf %90, %92 : vector<64x32xf32>
    %c0_34 = arith.constant 0 : index
    %c0_35 = arith.constant 0 : index
    %c0_36 = arith.constant 0 : index
    %94 = vector.load %arg4[%c0_34, %c0_35, %c0_36] : memref<1x1x32xf32, #tpu.memory_space<vmem>>, vector<1x1x32xf32>
    %95 = vector.shape_cast %94 : vector<1x1x32xf32> to vector<1x32xf32>
    %96 = vector.broadcast %95 : vector<1x32xf32> to vector<64x32xf32>
    %97 = arith.mulf %96, %93 : vector<64x32xf32>
    %98 = arith.addf %1, %97 : vector<64x32xf32>
    %c0_37 = arith.constant 0 : index
    %c0_38 = arith.constant 0 : index
    %c0_39 = arith.constant 0 : index
    %99 = vector.load %arg9[%c0_37, %c0_38, %c0_39] : memref<1x64x32xf32, #tpu.memory_space<vmem>>, vector<1x64x32xf32>
    %100 = vector.shape_cast %99 : vector<1x64x32xf32> to vector<64x32xf32>
    %101 = vector.shape_cast %98 : vector<64x32xf32> to vector<1x64x32xf32>
    tpu.vector_store %arg9[%c0_37, %c0_38, %c0_39], %101 {strides = array<i32>} : memref<1x64x32xf32, #tpu.memory_space<vmem>>, vector<1x64x32xf32>,
    return
  }
  func.func @transform_0(%arg0: i32) -> (i32, i32, i32) {
    %c0_i32 = arith.constant 0 : i32
    %c0_i32_0 = arith.constant 0 : i32
    %c0_i32_1 = arith.constant 0 : i32
    return %arg0, %c0_i32, %c0_i32_0 : i32, i32, i32
  }
  func.func @transform_1(%arg0: i32) -> (i32, i32, i32) {
    %c0_i32 = arith.constant 0 : i32
    %c0_i32_0 = arith.constant 0 : i32
    %c0_i32_1 = arith.constant 0 : i32
    return %arg0, %c0_i32, %c0_i32_0 : i32, i32, i32
  }
  func.func @transform_2(%arg0: i32) -> (i32, i32, i32) {
    %c0_i32 = arith.constant 0 : i32
    %c0_i32_0 = arith.constant 0 : i32
    %c0_i32_1 = arith.constant 0 : i32
    return %arg0, %c0_i32, %c0_i32_0 : i32, i32, i32
  }
  func.func @transform_3(%arg0: i32) -> (i32, i32, i32) {
    %c0_i32 = arith.constant 0 : i32
    %c0_i32_0 = arith.constant 0 : i32
    %c0_i32_1 = arith.constant 0 : i32
    return %arg0, %c0_i32, %c0_i32_0 : i32, i32, i32
  }
  func.func @transform_4(%arg0: i32) -> (i32, i32) {
    %c0_i32 = arith.constant 0 : i32
    %c0_i32_0 = arith.constant 0 : i32
    %c0_i32_1 = arith.constant 0 : i32
    return %c0_i32, %c0_i32_0 : i32, i32
  }
  func.func @transform_5(%arg0: i32) -> (i32, i32) {
    %c0_i32 = arith.constant 0 : i32
    %c0_i32_0 = arith.constant 0 : i32
    %c0_i32_1 = arith.constant 0 : i32
    return %c0_i32, %c0_i32_0 : i32, i32
  }
  func.func @transform_6(%arg0: i32) -> (i32, i32) {
    %c0_i32 = arith.constant 0 : i32
    %c0_i32_0 = arith.constant 0 : i32
    %c0_i32_1 = arith.constant 0 : i32
    return %c0_i32, %c0_i32_0 : i32, i32
  }
  func.func @transform_7(%arg0: i32) -> (i32, i32) {
    %c0_i32 = arith.constant 0 : i32
    %c0_i32_0 = arith.constant 0 : i32
    %c0_i32_1 = arith.constant 0 : i32
    return %c0_i32, %c0_i32_0 : i32, i32
  }
  func.func @transform_8(%arg0: i32) -> (i32, i32, i32) {
    %c0_i32 = arith.constant 0 : i32
    %c0_i32_0 = arith.constant 0 : i32
    %c0_i32_1 = arith.constant 0 : i32
    return %arg0, %c0_i32, %c0_i32_0 : i32, i32, i32
  }
}

module attributes {stable_mosaic.version = 11 : i64} {
  func.func @_cross_attn_block_kernel(%arg0: i32, %arg1: memref<1x64x32xf32, #tpu.memory_space<vmem>>, %arg2: memref<1x8x32xbf16, #tpu.memory_space<vmem>>, %arg3: memref<1x1x8xf32, #tpu.memory_space<vmem>>, %arg4: memref<32x32xbf16, #tpu.memory_space<vmem>>, %arg5: memref<1x32xf32, #tpu.memory_space<vmem>>, %arg6: memref<32x64xbf16, #tpu.memory_space<vmem>>, %arg7: memref<1x64xf32, #tpu.memory_space<vmem>>, %arg8: memref<32x32xbf16, #tpu.memory_space<vmem>>, %arg9: memref<1x32xf32, #tpu.memory_space<vmem>>, %arg10: memref<1x64x32xf32, #tpu.memory_space<vmem>>) attributes {dimension_semantics = [#tpu.dimension_semantics<parallel>], iteration_bounds = array<i64: 2>, scalar_prefetch = 0 : i64, scratch_operands = 0 : i64, tpu.core_type = #tpu.core_type<tc>, window_params = [{transform_indices = @transform_0, window_bounds = array<i64: 1, 64, 32>}, {transform_indices = @transform_1, window_bounds = array<i64: 1, 8, 32>}, {transform_indices = @transform_2, window_bounds = array<i64: 1, 1, 8>}, {pipeline_mode = #tpu.pipeline_mode<synchronous>, transform_indices = @transform_3, window_bounds = array<i64: 32, 32>}, {pipeline_mode = #tpu.pipeline_mode<synchronous>, transform_indices = @transform_4, window_bounds = array<i64: 1, 32>}, {pipeline_mode = #tpu.pipeline_mode<synchronous>, transform_indices = @transform_5, window_bounds = array<i64: 32, 64>}, {pipeline_mode = #tpu.pipeline_mode<synchronous>, transform_indices = @transform_6, window_bounds = array<i64: 1, 64>}, {pipeline_mode = #tpu.pipeline_mode<synchronous>, transform_indices = @transform_7, window_bounds = array<i64: 32, 32>}, {pipeline_mode = #tpu.pipeline_mode<synchronous>, transform_indices = @transform_8, window_bounds = array<i64: 1, 32>}, {transform_indices = @transform_9, window_bounds = array<i64: 1, 64, 32>}]} {
    %c0 = arith.constant 0 : index
    %c0_0 = arith.constant 0 : index
    %c0_1 = arith.constant 0 : index
    %0 = vector.load %arg1[%c0, %c0_0, %c0_1] : memref<1x64x32xf32, #tpu.memory_space<vmem>>, vector<1x64x32xf32>
    %1 = vector.shape_cast %0 : vector<1x64x32xf32> to vector<64x32xf32>
    %c0_2 = arith.constant 0 : index
    %c0_3 = arith.constant 0 : index
    %c0_4 = arith.constant 0 : index
    %2 = vector.load %arg2[%c0_2, %c0_3, %c0_4] : memref<1x8x32xbf16, #tpu.memory_space<vmem>>, vector<1x8x32xbf16>
    %3 = vector.shape_cast %2 : vector<1x8x32xbf16> to vector<8x32xbf16>
    %4 = arith.truncf %1 : vector<64x32xf32> to vector<64x32xbf16>
    %c0_5 = arith.constant 0 : index
    %c0_6 = arith.constant 0 : index
    %5 = vector.load %arg4[%c0_5, %c0_6] : memref<32x32xbf16, #tpu.memory_space<vmem>>, vector<32x32xbf16>
    %cst = arith.constant dense<0.000000e+00> : vector<64x32xf32>
    %6 = tpu.matmul %4, %5, %cst {dimension_numbers = #tpu.dot_dimension_numbers<[1], [0], [0], [1], [0, 0, 1, 1], [], []>} : vector<64x32xbf16>, vector<32x32xbf16>, vector<64x32xf32> -> vector<64x32xf32>
    %c0_7 = arith.constant 0 : index
    %c0_8 = arith.constant 0 : index
    %7 = vector.load %arg5[%c0_7, %c0_8] : memref<1x32xf32, #tpu.memory_space<vmem>>, vector<1x32xf32>
    %8 = vector.broadcast %7 : vector<1x32xf32> to vector<64x32xf32>
    %9 = arith.addf %6, %8 : vector<64x32xf32>
    %c0_9 = arith.constant 0 : index
    %c0_10 = arith.constant 0 : index
    %10 = vector.load %arg6[%c0_9, %c0_10] : memref<32x64xbf16, #tpu.memory_space<vmem>>, vector<32x64xbf16>
    %cst_11 = arith.constant dense<0.000000e+00> : vector<8x64xf32>
    %11 = tpu.matmul %3, %10, %cst_11 {dimension_numbers = #tpu.dot_dimension_numbers<[1], [0], [0], [1], [0, 0, 1, 1], [], []>} : vector<8x32xbf16>, vector<32x64xbf16>, vector<8x64xf32> -> vector<8x64xf32>
    %c0_12 = arith.constant 0 : index
    %c0_13 = arith.constant 0 : index
    %12 = vector.load %arg7[%c0_12, %c0_13] : memref<1x64xf32, #tpu.memory_space<vmem>>, vector<1x64xf32>
    %13 = vector.broadcast %12 : vector<1x64xf32> to vector<8x64xf32>
    %14 = arith.addf %11, %13 : vector<8x64xf32>
    %15 = vector.extract_strided_slice %14 {offsets = [0, 0], sizes = [8, 32], strides = [1, 1]} : vector<8x64xf32> to vector<8x32xf32>
    %16 = vector.extract_strided_slice %14 {offsets = [0, 32], sizes = [8, 32], strides = [1, 1]} : vector<8x64xf32> to vector<8x32xf32>
    %c0_14 = arith.constant 0 : index
    %c0_15 = arith.constant 0 : index
    %c0_16 = arith.constant 0 : index
    %17 = vector.load %arg3[%c0_14, %c0_15, %c0_16] : memref<1x1x8xf32, #tpu.memory_space<vmem>>, vector<1x1x8xf32>
    %18 = vector.shape_cast %17 : vector<1x1x8xf32> to vector<1x8xf32>
    %c0_17 = arith.constant 0 : index
    %c0_18 = arith.constant 0 : index
    %19 = vector.load %arg8[%c0_17, %c0_18] : memref<32x32xbf16, #tpu.memory_space<vmem>>, vector<32x32xbf16>
    %20 = vector.extract_strided_slice %9 {offsets = [0, 0], sizes = [64, 16], strides = [1, 1]} : vector<64x32xf32> to vector<64x16xf32>
    %21 = arith.truncf %20 : vector<64x16xf32> to vector<64x16xbf16>
    %22 = vector.extract_strided_slice %15 {offsets = [0, 0], sizes = [8, 16], strides = [1, 1]} : vector<8x32xf32> to vector<8x16xf32>
    %23 = arith.truncf %22 : vector<8x16xf32> to vector<8x16xbf16>
    %24 = vector.extract_strided_slice %16 {offsets = [0, 0], sizes = [8, 16], strides = [1, 1]} : vector<8x32xf32> to vector<8x16xf32>
    %25 = arith.truncf %24 : vector<8x16xf32> to vector<8x16xbf16>
    %cst_19 = arith.constant dense<0.000000e+00> : vector<64x8xf32>
    %26 = tpu.matmul %21, %23, %cst_19 {dimension_numbers = #tpu.dot_dimension_numbers<[1], [1], [0], [0], [0, 0, 1, 0], [], []>} : vector<64x16xbf16>, vector<8x16xbf16>, vector<64x8xf32> -> vector<64x8xf32>
    %cst_20 = arith.constant 2.500000e-01 : f32
    %27 = vector.broadcast %cst_20 : f32 to vector<64x8xf32>
    %28 = arith.mulf %26, %27 : vector<64x8xf32>
    %29 = vector.broadcast %18 : vector<1x8xf32> to vector<64x8xf32>
    %30 = arith.addf %28, %29 : vector<64x8xf32>
    %cst_21 = arith.constant dense<0xFF800000> : vector<64xf32>
    %31 = vector.multi_reduction <maximumf>, %30, %cst_21 [1] : vector<64x8xf32> to vector<64xf32>
    %32 = vector.shape_cast %31 : vector<64xf32> to vector<64x1xf32>
    %33 = vector.broadcast %32 : vector<64x1xf32> to vector<64x8xf32>
    %34 = arith.subf %30, %33 : vector<64x8xf32>
    %35 = math.exp %34 : vector<64x8xf32>
    %cst_22 = arith.constant dense<0.000000e+00> : vector<64xf32>
    %36 = vector.multi_reduction <add>, %35, %cst_22 [1] : vector<64x8xf32> to vector<64xf32>
    %37 = vector.shape_cast %36 : vector<64xf32> to vector<64x1xf32>
    %38 = tpu.reciprocal %37 {approx = true} : vector<64x1xf32> -> vector<64x1xf32>
    %39 = vector.broadcast %38 : vector<64x1xf32> to vector<64x8xf32>
    %40 = arith.mulf %35, %39 : vector<64x8xf32>
    %41 = arith.truncf %40 : vector<64x8xf32> to vector<64x8xbf16>
    %cst_23 = arith.constant dense<0.000000e+00> : vector<64x16xf32>
    %42 = tpu.matmul %41, %25, %cst_23 {dimension_numbers = #tpu.dot_dimension_numbers<[1], [0], [0], [1], [0, 0, 1, 1], [], []>} : vector<64x8xbf16>, vector<8x16xbf16>, vector<64x16xf32> -> vector<64x16xf32>
    %43 = arith.truncf %42 : vector<64x16xf32> to vector<64x16xbf16>
    %44 = vector.extract_strided_slice %19 {offsets = [0, 0], sizes = [16, 32], strides = [1, 1]} : vector<32x32xbf16> to vector<16x32xbf16>
    %cst_24 = arith.constant dense<0.000000e+00> : vector<64x32xf32>
    %45 = tpu.matmul %43, %44, %cst_24 {dimension_numbers = #tpu.dot_dimension_numbers<[1], [0], [0], [1], [0, 0, 1, 1], [], []>} : vector<64x16xbf16>, vector<16x32xbf16>, vector<64x32xf32> -> vector<64x32xf32>
    %46 = vector.extract_strided_slice %9 {offsets = [0, 16], sizes = [64, 16], strides = [1, 1]} : vector<64x32xf32> to vector<64x16xf32>
    %47 = arith.truncf %46 : vector<64x16xf32> to vector<64x16xbf16>
    %48 = vector.extract_strided_slice %15 {offsets = [0, 16], sizes = [8, 16], strides = [1, 1]} : vector<8x32xf32> to vector<8x16xf32>
    %49 = arith.truncf %48 : vector<8x16xf32> to vector<8x16xbf16>
    %50 = vector.extract_strided_slice %16 {offsets = [0, 16], sizes = [8, 16], strides = [1, 1]} : vector<8x32xf32> to vector<8x16xf32>
    %51 = arith.truncf %50 : vector<8x16xf32> to vector<8x16xbf16>
    %cst_25 = arith.constant dense<0.000000e+00> : vector<64x8xf32>
    %52 = tpu.matmul %47, %49, %cst_25 {dimension_numbers = #tpu.dot_dimension_numbers<[1], [1], [0], [0], [0, 0, 1, 0], [], []>} : vector<64x16xbf16>, vector<8x16xbf16>, vector<64x8xf32> -> vector<64x8xf32>
    %cst_26 = arith.constant 2.500000e-01 : f32
    %53 = vector.broadcast %cst_26 : f32 to vector<64x8xf32>
    %54 = arith.mulf %52, %53 : vector<64x8xf32>
    %55 = vector.broadcast %18 : vector<1x8xf32> to vector<64x8xf32>
    %56 = arith.addf %54, %55 : vector<64x8xf32>
    %cst_27 = arith.constant dense<0xFF800000> : vector<64xf32>
    %57 = vector.multi_reduction <maximumf>, %56, %cst_27 [1] : vector<64x8xf32> to vector<64xf32>
    %58 = vector.shape_cast %57 : vector<64xf32> to vector<64x1xf32>
    %59 = vector.broadcast %58 : vector<64x1xf32> to vector<64x8xf32>
    %60 = arith.subf %56, %59 : vector<64x8xf32>
    %61 = math.exp %60 : vector<64x8xf32>
    %cst_28 = arith.constant dense<0.000000e+00> : vector<64xf32>
    %62 = vector.multi_reduction <add>, %61, %cst_28 [1] : vector<64x8xf32> to vector<64xf32>
    %63 = vector.shape_cast %62 : vector<64xf32> to vector<64x1xf32>
    %64 = tpu.reciprocal %63 {approx = true} : vector<64x1xf32> -> vector<64x1xf32>
    %65 = vector.broadcast %64 : vector<64x1xf32> to vector<64x8xf32>
    %66 = arith.mulf %61, %65 : vector<64x8xf32>
    %67 = arith.truncf %66 : vector<64x8xf32> to vector<64x8xbf16>
    %cst_29 = arith.constant dense<0.000000e+00> : vector<64x16xf32>
    %68 = tpu.matmul %67, %51, %cst_29 {dimension_numbers = #tpu.dot_dimension_numbers<[1], [0], [0], [1], [0, 0, 1, 1], [], []>} : vector<64x8xbf16>, vector<8x16xbf16>, vector<64x16xf32> -> vector<64x16xf32>
    %69 = arith.truncf %68 : vector<64x16xf32> to vector<64x16xbf16>
    %70 = vector.extract_strided_slice %19 {offsets = [16, 0], sizes = [16, 32], strides = [1, 1]} : vector<32x32xbf16> to vector<16x32xbf16>
    %cst_30 = arith.constant dense<0.000000e+00> : vector<64x32xf32>
    %71 = tpu.matmul %69, %70, %cst_30 {dimension_numbers = #tpu.dot_dimension_numbers<[1], [0], [0], [1], [0, 0, 1, 1], [], []>} : vector<64x16xbf16>, vector<16x32xbf16>, vector<64x32xf32> -> vector<64x32xf32>
    %72 = arith.addf %45, %71 : vector<64x32xf32>
    %c0_31 = arith.constant 0 : index
    %c0_32 = arith.constant 0 : index
    %73 = vector.load %arg9[%c0_31, %c0_32] : memref<1x32xf32, #tpu.memory_space<vmem>>, vector<1x32xf32>
    %74 = vector.broadcast %73 : vector<1x32xf32> to vector<64x32xf32>
    %75 = arith.addf %72, %74 : vector<64x32xf32>
    %76 = arith.addf %1, %75 : vector<64x32xf32>
    %c0_33 = arith.constant 0 : index
    %c0_34 = arith.constant 0 : index
    %c0_35 = arith.constant 0 : index
    %77 = vector.load %arg10[%c0_33, %c0_34, %c0_35] : memref<1x64x32xf32, #tpu.memory_space<vmem>>, vector<1x64x32xf32>
    %78 = vector.shape_cast %77 : vector<1x64x32xf32> to vector<64x32xf32>
    %79 = vector.shape_cast %76 : vector<64x32xf32> to vector<1x64x32xf32>
    tpu.vector_store %arg10[%c0_33, %c0_34, %c0_35], %79 {strides = array<i32>} : memref<1x64x32xf32, #tpu.memory_space<vmem>>, vector<1x64x32xf32>,
    return
  }
  func.func @transform_0(%arg0: i32) -> (i32, i32, i32) {
    %c0_i32 = arith.constant 0 : i32
    %c0_i32_0 = arith.constant 0 : i32
    %c0_i32_1 = arith.constant 0 : i32
    return %arg0, %c0_i32, %c0_i32_0 : i32, i32, i32
  }
  func.func @transform_1(%arg0: i32) -> (i32, i32, i32) {
    %c0_i32 = arith.constant 0 : i32
    %c0_i32_0 = arith.constant 0 : i32
    %c0_i32_1 = arith.constant 0 : i32
    return %arg0, %c0_i32, %c0_i32_0 : i32, i32, i32
  }
  func.func @transform_2(%arg0: i32) -> (i32, i32, i32) {
    %c0_i32 = arith.constant 0 : i32
    %c0_i32_0 = arith.constant 0 : i32
    %c0_i32_1 = arith.constant 0 : i32
    return %arg0, %c0_i32, %c0_i32_0 : i32, i32, i32
  }
  func.func @transform_3(%arg0: i32) -> (i32, i32) {
    %c0_i32 = arith.constant 0 : i32
    %c0_i32_0 = arith.constant 0 : i32
    %c0_i32_1 = arith.constant 0 : i32
    return %c0_i32, %c0_i32_0 : i32, i32
  }
  func.func @transform_4(%arg0: i32) -> (i32, i32) {
    %c0_i32 = arith.constant 0 : i32
    %c0_i32_0 = arith.constant 0 : i32
    %c0_i32_1 = arith.constant 0 : i32
    return %c0_i32, %c0_i32_0 : i32, i32
  }
  func.func @transform_5(%arg0: i32) -> (i32, i32) {
    %c0_i32 = arith.constant 0 : i32
    %c0_i32_0 = arith.constant 0 : i32
    %c0_i32_1 = arith.constant 0 : i32
    return %c0_i32, %c0_i32_0 : i32, i32
  }
  func.func @transform_6(%arg0: i32) -> (i32, i32) {
    %c0_i32 = arith.constant 0 : i32
    %c0_i32_0 = arith.constant 0 : i32
    %c0_i32_1 = arith.constant 0 : i32
    return %c0_i32, %c0_i32_0 : i32, i32
  }
  func.func @transform_7(%arg0: i32) -> (i32, i32) {
    %c0_i32 = arith.constant 0 : i32
    %c0_i32_0 = arith.constant 0 : i32
    %c0_i32_1 = arith.constant 0 : i32
    return %c0_i32, %c0_i32_0 : i32, i32
  }
  func.func @transform_8(%arg0: i32) -> (i32, i32) {
    %c0_i32 = arith.constant 0 : i32
    %c0_i32_0 = arith.constant 0 : i32
    %c0_i32_1 = arith.constant 0 : i32
    return %c0_i32, %c0_i32_0 : i32, i32
  }
  func.func @transform_9(%arg0: i32) -> (i32, i32, i32) {
    %c0_i32 = arith.constant 0 : i32
    %c0_i32_0 = arith.constant 0 : i32
    %c0_i32_1 = arith.constant 0 : i32
    return %arg0, %c0_i32, %c0_i32_0 : i32, i32, i32
  }
}

module attributes {stable_mosaic.version = 11 : i64} {
  func.func @_ff_block_kernel(%arg0: i32, %arg1: memref<1x64x32xf32, #tpu.memory_space<vmem>>, %arg2: memref<1x1x32xf32, #tpu.memory_space<vmem>>, %arg3: memref<1x1x32xf32, #tpu.memory_space<vmem>>, %arg4: memref<1x1x32xf32, #tpu.memory_space<vmem>>, %arg5: memref<32x128xbf16, #tpu.memory_space<vmem>>, %arg6: memref<1x128xf32, #tpu.memory_space<vmem>>, %arg7: memref<128x32xbf16, #tpu.memory_space<vmem>>, %arg8: memref<1x32xf32, #tpu.memory_space<vmem>>, %arg9: memref<1x64x32xf32, #tpu.memory_space<vmem>>) attributes {dimension_semantics = [#tpu.dimension_semantics<parallel>], iteration_bounds = array<i64: 2>, scalar_prefetch = 0 : i64, scratch_operands = 0 : i64, tpu.core_type = #tpu.core_type<tc>, window_params = [{transform_indices = @transform_0, window_bounds = array<i64: 1, 64, 32>}, {transform_indices = @transform_1, window_bounds = array<i64: 1, 1, 32>}, {transform_indices = @transform_2, window_bounds = array<i64: 1, 1, 32>}, {transform_indices = @transform_3, window_bounds = array<i64: 1, 1, 32>}, {pipeline_mode = #tpu.pipeline_mode<synchronous>, transform_indices = @transform_4, window_bounds = array<i64: 32, 128>}, {pipeline_mode = #tpu.pipeline_mode<synchronous>, transform_indices = @transform_5, window_bounds = array<i64: 1, 128>}, {pipeline_mode = #tpu.pipeline_mode<synchronous>, transform_indices = @transform_6, window_bounds = array<i64: 128, 32>}, {pipeline_mode = #tpu.pipeline_mode<synchronous>, transform_indices = @transform_7, window_bounds = array<i64: 1, 32>}, {transform_indices = @transform_8, window_bounds = array<i64: 1, 64, 32>}]} {
    %c0 = arith.constant 0 : index
    %c0_0 = arith.constant 0 : index
    %c0_1 = arith.constant 0 : index
    %0 = vector.load %arg1[%c0, %c0_0, %c0_1] : memref<1x64x32xf32, #tpu.memory_space<vmem>>, vector<1x64x32xf32>
    %1 = vector.shape_cast %0 : vector<1x64x32xf32> to vector<64x32xf32>
    %c0_2 = arith.constant 0 : index
    %c0_3 = arith.constant 0 : index
    %c0_4 = arith.constant 0 : index
    %2 = vector.load %arg2[%c0_2, %c0_3, %c0_4] : memref<1x1x32xf32, #tpu.memory_space<vmem>>, vector<1x1x32xf32>
    %3 = vector.shape_cast %2 : vector<1x1x32xf32> to vector<1x32xf32>
    %c0_5 = arith.constant 0 : index
    %c0_6 = arith.constant 0 : index
    %c0_7 = arith.constant 0 : index
    %4 = vector.load %arg3[%c0_5, %c0_6, %c0_7] : memref<1x1x32xf32, #tpu.memory_space<vmem>>, vector<1x1x32xf32>
    %5 = vector.shape_cast %4 : vector<1x1x32xf32> to vector<1x32xf32>
    %cst = arith.constant dense<0.000000e+00> : vector<64xf32>
    %6 = vector.multi_reduction <add>, %1, %cst [1] : vector<64x32xf32> to vector<64xf32>
    %7 = vector.shape_cast %6 : vector<64xf32> to vector<64x1xf32>
    %cst_8 = arith.constant 3.200000e+01 : f32
    %8 = vector.broadcast %cst_8 : f32 to vector<64x1xf32>
    %9 = arith.divf %7, %8 : vector<64x1xf32>
    %10 = vector.broadcast %9 : vector<64x1xf32> to vector<64x32xf32>
    %11 = arith.subf %1, %10 : vector<64x32xf32>
    %12 = vector.broadcast %9 : vector<64x1xf32> to vector<64x32xf32>
    %13 = arith.subf %1, %12 : vector<64x32xf32>
    %14 = arith.mulf %11, %13 : vector<64x32xf32>
    %cst_9 = arith.constant dense<0.000000e+00> : vector<64xf32>
    %15 = vector.multi_reduction <add>, %14, %cst_9 [1] : vector<64x32xf32> to vector<64xf32>
    %16 = vector.shape_cast %15 : vector<64xf32> to vector<64x1xf32>
    %cst_10 = arith.constant 3.200000e+01 : f32
    %17 = vector.broadcast %cst_10 : f32 to vector<64x1xf32>
    %18 = arith.divf %16, %17 : vector<64x1xf32>
    %19 = vector.broadcast %9 : vector<64x1xf32> to vector<64x32xf32>
    %20 = arith.subf %1, %19 : vector<64x32xf32>
    %cst_11 = arith.constant 9.99999997E-7 : f32
    %21 = vector.broadcast %cst_11 : f32 to vector<64x1xf32>
    %22 = arith.addf %18, %21 : vector<64x1xf32>
    %23 = math.rsqrt %22 : vector<64x1xf32>
    %24 = vector.broadcast %23 : vector<64x1xf32> to vector<64x32xf32>
    %25 = arith.mulf %20, %24 : vector<64x32xf32>
    %cst_12 = arith.constant 1.000000e+00 : f32
    %26 = vector.broadcast %cst_12 : f32 to vector<1x32xf32>
    %27 = arith.addf %26, %3 : vector<1x32xf32>
    %28 = vector.broadcast %27 : vector<1x32xf32> to vector<64x32xf32>
    %29 = arith.mulf %25, %28 : vector<64x32xf32>
    %30 = vector.broadcast %5 : vector<1x32xf32> to vector<64x32xf32>
    %31 = arith.addf %29, %30 : vector<64x32xf32>
    %32 = arith.truncf %31 : vector<64x32xf32> to vector<64x32xbf16>
    %c0_13 = arith.constant 0 : index
    %c0_14 = arith.constant 0 : index
    %33 = vector.load %arg5[%c0_13, %c0_14] : memref<32x128xbf16, #tpu.memory_space<vmem>>, vector<32x128xbf16>
    %cst_15 = arith.constant dense<0.000000e+00> : vector<64x128xf32>
    %34 = tpu.matmul %32, %33, %cst_15 {dimension_numbers = #tpu.dot_dimension_numbers<[1], [0], [0], [1], [0, 0, 1, 1], [], []>} : vector<64x32xbf16>, vector<32x128xbf16>, vector<64x128xf32> -> vector<64x128xf32>
    %c0_16 = arith.constant 0 : index
    %c0_17 = arith.constant 0 : index
    %35 = vector.load %arg6[%c0_16, %c0_17] : memref<1x128xf32, #tpu.memory_space<vmem>>, vector<1x128xf32>
    %36 = vector.broadcast %35 : vector<1x128xf32> to vector<64x128xf32>
    %37 = arith.addf %34, %36 : vector<64x128xf32>
    %cst_18 = arith.constant 5.000000e-01 : f32
    %38 = vector.broadcast %cst_18 : f32 to vector<64x128xf32>
    %39 = arith.mulf %38, %37 : vector<64x128xf32>
    %cst_19 = arith.constant 4.471500e-02 : f32
    %40 = vector.broadcast %cst_19 : f32 to vector<64x128xf32>
    %41 = arith.mulf %40, %37 : vector<64x128xf32>
    %42 = arith.mulf %41, %37 : vector<64x128xf32>
    %43 = arith.mulf %42, %37 : vector<64x128xf32>
    %44 = arith.addf %37, %43 : vector<64x128xf32>
    %cst_20 = arith.constant 0.797884583 : f32
    %45 = vector.broadcast %cst_20 : f32 to vector<64x128xf32>
    %46 = arith.mulf %45, %44 : vector<64x128xf32>
    %47 = math.tanh %46 : vector<64x128xf32>
    %cst_21 = arith.constant 1.000000e+00 : f32
    %48 = vector.broadcast %cst_21 : f32 to vector<64x128xf32>
    %49 = arith.addf %48, %47 : vector<64x128xf32>
    %50 = arith.mulf %39, %49 : vector<64x128xf32>
    %51 = arith.truncf %50 : vector<64x128xf32> to vector<64x128xbf16>
    %c0_22 = arith.constant 0 : index
    %c0_23 = arith.constant 0 : index
    %52 = vector.load %arg7[%c0_22, %c0_23] : memref<128x32xbf16, #tpu.memory_space<vmem>>, vector<128x32xbf16>
    %cst_24 = arith.constant dense<0.000000e+00> : vector<64x32xf32>
    %53 = tpu.matmul %51, %52, %cst_24 {dimension_numbers = #tpu.dot_dimension_numbers<[1], [0], [0], [1], [0, 0, 1, 1], [], []>} : vector<64x128xbf16>, vector<128x32xbf16>, vector<64x32xf32> -> vector<64x32xf32>
    %c0_25 = arith.constant 0 : index
    %c0_26 = arith.constant 0 : index
    %54 = vector.load %arg8[%c0_25, %c0_26] : memref<1x32xf32, #tpu.memory_space<vmem>>, vector<1x32xf32>
    %55 = vector.broadcast %54 : vector<1x32xf32> to vector<64x32xf32>
    %56 = arith.addf %53, %55 : vector<64x32xf32>
    %c0_27 = arith.constant 0 : index
    %c0_28 = arith.constant 0 : index
    %c0_29 = arith.constant 0 : index
    %57 = vector.load %arg4[%c0_27, %c0_28, %c0_29] : memref<1x1x32xf32, #tpu.memory_space<vmem>>, vector<1x1x32xf32>
    %58 = vector.shape_cast %57 : vector<1x1x32xf32> to vector<1x32xf32>
    %59 = vector.broadcast %58 : vector<1x32xf32> to vector<64x32xf32>
    %60 = arith.mulf %59, %56 : vector<64x32xf32>
    %61 = arith.addf %1, %60 : vector<64x32xf32>
    %c0_30 = arith.constant 0 : index
    %c0_31 = arith.constant 0 : index
    %c0_32 = arith.constant 0 : index
    %62 = vector.load %arg9[%c0_30, %c0_31, %c0_32] : memref<1x64x32xf32, #tpu.memory_space<vmem>>, vector<1x64x32xf32>
    %63 = vector.shape_cast %62 : vector<1x64x32xf32> to vector<64x32xf32>
    %64 = vector.shape_cast %61 : vector<64x32xf32> to vector<1x64x32xf32>
    tpu.vector_store %arg9[%c0_30, %c0_31, %c0_32], %64 {strides = array<i32>} : memref<1x64x32xf32, #tpu.memory_space<vmem>>, vector<1x64x32xf32>,
    return
  }
  func.func @transform_0(%arg0: i32) -> (i32, i32, i32) {
    %c0_i32 = arith.constant 0 : i32
    %c0_i32_0 = arith.constant 0 : i32
    %c0_i32_1 = arith.constant 0 : i32
    return %arg0, %c0_i32, %c0_i32_0 : i32, i32, i32
  }
  func.func @transform_1(%arg0: i32) -> (i32, i32, i32) {
    %c0_i32 = arith.constant 0 : i32
    %c0_i32_0 = arith.constant 0 : i32
    %c0_i32_1 = arith.constant 0 : i32
    return %arg0, %c0_i32, %c0_i32_0 : i32, i32, i32
  }
  func.func @transform_2(%arg0: i32) -> (i32, i32, i32) {
    %c0_i32 = arith.constant 0 : i32
    %c0_i32_0 = arith.constant 0 : i32
    %c0_i32_1 = arith.constant 0 : i32
    return %arg0, %c0_i32, %c0_i32_0 : i32, i32, i32
  }
  func.func @transform_3(%arg0: i32) -> (i32, i32, i32) {
    %c0_i32 = arith.constant 0 : i32
    %c0_i32_0 = arith.constant 0 : i32
    %c0_i32_1 = arith.constant 0 : i32
    return %arg0, %c0_i32, %c0_i32_0 : i32, i32, i32
  }
  func.func @transform_4(%arg0: i32) -> (i32, i32) {
    %c0_i32 = arith.constant 0 : i32
    %c0_i32_0 = arith.constant 0 : i32
    %c0_i32_1 = arith.constant 0 : i32
    return %c0_i32, %c0_i32_0 : i32, i32
  }
  func.func @transform_5(%arg0: i32) -> (i32, i32) {
    %c0_i32 = arith.constant 0 : i32
    %c0_i32_0 = arith.constant 0 : i32
    %c0_i32_1 = arith.constant 0 : i32
    return %c0_i32, %c0_i32_0 : i32, i32
  }
  func.func @transform_6(%arg0: i32) -> (i32, i32) {
    %c0_i32 = arith.constant 0 : i32
    %c0_i32_0 = arith.constant 0 : i32
    %c0_i32_1 = arith.constant 0 : i32
    return %c0_i32, %c0_i32_0 : i32, i32
  }
  func.func @transform_7(%arg0: i32) -> (i32, i32) {
    %c0_i32 = arith.constant 0 : i32
    %c0_i32_0 = arith.constant 0 : i32
    %c0_i32_1 = arith.constant 0 : i32
    return %c0_i32, %c0_i32_0 : i32, i32
  }
  func.func @transform_8(%arg0: i32) -> (i32, i32, i32) {
    %c0_i32 = arith.constant 0 : i32
    %c0_i32_0 = arith.constant 0 : i32
    %c0_i32_1 = arith.constant 0 : i32
    return %arg0, %c0_i32, %c0_i32_0 : i32, i32, i32
  }
}

module attributes {stable_mosaic.version = 11 : i64} {
  func.func @_final_head_kernel(%arg0: i32, %arg1: memref<1x64x32xf32, #tpu.memory_space<vmem>>, %arg2: memref<1x1x32xf32, #tpu.memory_space<vmem>>, %arg3: memref<1x1x32xf32, #tpu.memory_space<vmem>>, %arg4: memref<32x32xbf16, #tpu.memory_space<vmem>>, %arg5: memref<1x32xf32, #tpu.memory_space<vmem>>, %arg6: memref<1x64x32xf32, #tpu.memory_space<vmem>>) attributes {dimension_semantics = [#tpu.dimension_semantics<parallel>], iteration_bounds = array<i64: 2>, scalar_prefetch = 0 : i64, scratch_operands = 0 : i64, tpu.core_type = #tpu.core_type<tc>, window_params = [{transform_indices = @transform_0, window_bounds = array<i64: 1, 64, 32>}, {transform_indices = @transform_1, window_bounds = array<i64: 1, 1, 32>}, {transform_indices = @transform_2, window_bounds = array<i64: 1, 1, 32>}, {pipeline_mode = #tpu.pipeline_mode<synchronous>, transform_indices = @transform_3, window_bounds = array<i64: 32, 32>}, {pipeline_mode = #tpu.pipeline_mode<synchronous>, transform_indices = @transform_4, window_bounds = array<i64: 1, 32>}, {transform_indices = @transform_5, window_bounds = array<i64: 1, 64, 32>}]} {
    %c0 = arith.constant 0 : index
    %c0_0 = arith.constant 0 : index
    %c0_1 = arith.constant 0 : index
    %0 = vector.load %arg1[%c0, %c0_0, %c0_1] : memref<1x64x32xf32, #tpu.memory_space<vmem>>, vector<1x64x32xf32>
    %1 = vector.shape_cast %0 : vector<1x64x32xf32> to vector<64x32xf32>
    %c0_2 = arith.constant 0 : index
    %c0_3 = arith.constant 0 : index
    %c0_4 = arith.constant 0 : index
    %2 = vector.load %arg2[%c0_2, %c0_3, %c0_4] : memref<1x1x32xf32, #tpu.memory_space<vmem>>, vector<1x1x32xf32>
    %3 = vector.shape_cast %2 : vector<1x1x32xf32> to vector<1x32xf32>
    %c0_5 = arith.constant 0 : index
    %c0_6 = arith.constant 0 : index
    %c0_7 = arith.constant 0 : index
    %4 = vector.load %arg3[%c0_5, %c0_6, %c0_7] : memref<1x1x32xf32, #tpu.memory_space<vmem>>, vector<1x1x32xf32>
    %5 = vector.shape_cast %4 : vector<1x1x32xf32> to vector<1x32xf32>
    %cst = arith.constant dense<0.000000e+00> : vector<64xf32>
    %6 = vector.multi_reduction <add>, %1, %cst [1] : vector<64x32xf32> to vector<64xf32>
    %7 = vector.shape_cast %6 : vector<64xf32> to vector<64x1xf32>
    %cst_8 = arith.constant 3.200000e+01 : f32
    %8 = vector.broadcast %cst_8 : f32 to vector<64x1xf32>
    %9 = arith.divf %7, %8 : vector<64x1xf32>
    %10 = vector.broadcast %9 : vector<64x1xf32> to vector<64x32xf32>
    %11 = arith.subf %1, %10 : vector<64x32xf32>
    %12 = vector.broadcast %9 : vector<64x1xf32> to vector<64x32xf32>
    %13 = arith.subf %1, %12 : vector<64x32xf32>
    %14 = arith.mulf %11, %13 : vector<64x32xf32>
    %cst_9 = arith.constant dense<0.000000e+00> : vector<64xf32>
    %15 = vector.multi_reduction <add>, %14, %cst_9 [1] : vector<64x32xf32> to vector<64xf32>
    %16 = vector.shape_cast %15 : vector<64xf32> to vector<64x1xf32>
    %cst_10 = arith.constant 3.200000e+01 : f32
    %17 = vector.broadcast %cst_10 : f32 to vector<64x1xf32>
    %18 = arith.divf %16, %17 : vector<64x1xf32>
    %19 = vector.broadcast %9 : vector<64x1xf32> to vector<64x32xf32>
    %20 = arith.subf %1, %19 : vector<64x32xf32>
    %cst_11 = arith.constant 9.99999997E-7 : f32
    %21 = vector.broadcast %cst_11 : f32 to vector<64x1xf32>
    %22 = arith.addf %18, %21 : vector<64x1xf32>
    %23 = math.rsqrt %22 : vector<64x1xf32>
    %24 = vector.broadcast %23 : vector<64x1xf32> to vector<64x32xf32>
    %25 = arith.mulf %20, %24 : vector<64x32xf32>
    %cst_12 = arith.constant 1.000000e+00 : f32
    %26 = vector.broadcast %cst_12 : f32 to vector<1x32xf32>
    %27 = arith.addf %26, %3 : vector<1x32xf32>
    %28 = vector.broadcast %27 : vector<1x32xf32> to vector<64x32xf32>
    %29 = arith.mulf %25, %28 : vector<64x32xf32>
    %30 = vector.broadcast %5 : vector<1x32xf32> to vector<64x32xf32>
    %31 = arith.addf %29, %30 : vector<64x32xf32>
    %32 = arith.truncf %31 : vector<64x32xf32> to vector<64x32xbf16>
    %c0_13 = arith.constant 0 : index
    %c0_14 = arith.constant 0 : index
    %33 = vector.load %arg4[%c0_13, %c0_14] : memref<32x32xbf16, #tpu.memory_space<vmem>>, vector<32x32xbf16>
    %cst_15 = arith.constant dense<0.000000e+00> : vector<64x32xf32>
    %34 = tpu.matmul %32, %33, %cst_15 {dimension_numbers = #tpu.dot_dimension_numbers<[1], [0], [0], [1], [0, 0, 1, 1], [], []>} : vector<64x32xbf16>, vector<32x32xbf16>, vector<64x32xf32> -> vector<64x32xf32>
    %c0_16 = arith.constant 0 : index
    %c0_17 = arith.constant 0 : index
    %35 = vector.load %arg5[%c0_16, %c0_17] : memref<1x32xf32, #tpu.memory_space<vmem>>, vector<1x32xf32>
    %36 = vector.broadcast %35 : vector<1x32xf32> to vector<64x32xf32>
    %37 = arith.addf %34, %36 : vector<64x32xf32>
    %c0_18 = arith.constant 0 : index
    %c0_19 = arith.constant 0 : index
    %c0_20 = arith.constant 0 : index
    %38 = vector.load %arg6[%c0_18, %c0_19, %c0_20] : memref<1x64x32xf32, #tpu.memory_space<vmem>>, vector<1x64x32xf32>
    %39 = vector.shape_cast %38 : vector<1x64x32xf32> to vector<64x32xf32>
    %40 = vector.shape_cast %37 : vector<64x32xf32> to vector<1x64x32xf32>
    tpu.vector_store %arg6[%c0_18, %c0_19, %c0_20], %40 {strides = array<i32>} : memref<1x64x32xf32, #tpu.memory_space<vmem>>, vector<1x64x32xf32>,
    return
  }
  func.func @transform_0(%arg0: i32) -> (i32, i32, i32) {
    %c0_i32 = arith.constant 0 : i32
    %c0_i32_0 = arith.constant 0 : i32
    %c0_i32_1 = arith.constant 0 : i32
    return %arg0, %c0_i32, %c0_i32_0 : i32, i32, i32
  }
  func.func @transform_1(%arg0: i32) -> (i32, i32, i32) {
    %c0_i32 = arith.constant 0 : i32
    %c0_i32_0 = arith.constant 0 : i32
    %c0_i32_1 = arith.constant 0 : i32
    return %arg0, %c0_i32, %c0_i32_0 : i32, i32, i32
  }
  func.func @transform_2(%arg0: i32) -> (i32, i32, i32) {
    %c0_i32 = arith.constant 0 : i32
    %c0_i32_0 = arith.constant 0 : i32
    %c0_i32_1 = arith.constant 0 : i32
    return %arg0, %c0_i32, %c0_i32_0 : i32, i32, i32
  }
  func.func @transform_3(%arg0: i32) -> (i32, i32) {
    %c0_i32 = arith.constant 0 : i32
    %c0_i32_0 = arith.constant 0 : i32
    %c0_i32_1 = arith.constant 0 : i32
    return %c0_i32, %c0_i32_0 : i32, i32
  }
  func.func @transform_4(%arg0: i32) -> (i32, i32) {
    %c0_i32 = arith.constant 0 : i32
    %c0_i32_0 = arith.constant 0 : i32
    %c0_i32_1 = arith.constant 0 : i32
    return %c0_i32, %c0_i32_0 : i32, i32
  }
  func.func @transform_5(%arg0: i32) -> (i32, i32, i32) {
    %c0_i32 = arith.constant 0 : i32
    %c0_i32_0 = arith.constant 0 : i32
    %c0_i32_1 = arith.constant 0 : i32
    return %arg0, %c0_i32, %c0_i32_0 : i32, i32, i32
  }
}

</mosaic_0001>

<bundles_post_ra>
// kernel: tracing_transformer_wrapper_forward.8
= control target key start
LH: loop header
LB: loop body
LE: loop exit
PB: predicated region body
PF: predicated region fallthrough
CT: control target
= control target key end

     0   :  { %s462_s15 = smov 0   ;;  %s530_s0 = inlined_call_operand.vmem [shape: f32[2,64,16], index: 0, kind: input, shape index: {}]   ;;  %s531_s1 = inlined_call_operand.vmem [shape: bf16[16,32], index: 1, kind: input, shape index: {}]   ;;  %s532_s2 = inlined_call_operand.vmem [shape: f32[1,32], index: 2, kind: input, shape index: {}]   ;;  %s533_s3 = inlined_call_operand.vmem [shape: f32[64,32], index: 3, kind: input, shape index: {}]   ;;  %s534_s4 = inlined_call_operand.vmem [shape: f32[2,64,32], index: 4, kind: output, shape index: {}]  }
   0x1 LB: > { %s384_s16 = sadd.s32 4294967295, %s435_s15   ;;  %p388_p0 = scmp.ge.s32.totalorder %s435_s15, 1  ;;  %s435_s15 = sphi %s462_s15, %s14_s15  }
   0x2   : > { %p162_p1 = scmp.lt.s32.totalorder %s435_s15, 3 }
   0x4   : > { %p163_p2 = pnand %p388_p0, %p162_p1 }
   0x5   : > { %v428_v0 = vld [vmem:[%s531_s1] sm:$0xff] (!%p163_p2)   ;;  %p188_p3 = scmp.lt.s32.totalorder (!%p163_p2), %s384_s16, 1  ;;  %vm226_vm0 = vcmask (!%p163_p2), 130048   ;;  %v306_v15 = vld [vmem:[%s533_s3 + $0x10] sm:$0xff] (!%p163_p2)  ;;  %vm320_vm1 = vcmask (!%p163_p2), 261120   ;;  %v307_v26 = vld [vmem:[%s533_s3 + $0x18] sm:$0xff] (!%p163_p2) }
   0x6   : > { %166 = sbr.rel (%p163_p2) target bundleno = 241 (0xf1), region = 36  ;;  %408 = vmatprep.subr.bf16.mxu0 (!%p163_p2), %v428_v0  ;;  %418 = vmatprep.subr.bf16.mxu1 (!%p163_p2), %v428_v0  ;;  %v393_v13 = vld [vmem:[%s532_s2] ss:$0 sm:$0xff] (!%p163_p2)  ;;  %v310_v18 = vld [vmem:[%s533_s3 + $0x30] sm:$0xff] (!%p163_p2)  ;;  %v311_v31 = vld [vmem:[%s533_s3 + $0x38] sm:$0xff] (!%p163_p2) }
   0x7   : > { %409 = vmatpush3.bf16.msra.mxu0 (!%p163_p2), %v428_v0  ;;  %419 = vmatpush3.bf16.msra.mxu1 (!%p163_p2), %v428_v0  ;;  %v304_v20 = vld [vmem:[%s533_s3] sm:$0xff] (!%p163_p2)  ;;  %v305_v33 = vld [vmem:[%s533_s3 + $0x8] sm:$0xff] (!%p163_p2) }
   0x8   : > { %v308_v24 = vld [vmem:[%s533_s3 + $0x20] sm:$0xff] (!%p163_p2)  ;;  %v309_v39 = vld [vmem:[%s533_s3 + $0x28] sm:$0xff] (!%p163_p2) }
   0xd   : > { %s536_s16 = smov (!%p188_p3, %s384_s16), 1 }
   0xe   : > { %s401_s19 = sshll.u32 %s536_s16, 6 }
   0xf   : > { %s192_s22 = scalar_lea.vmem %s530_s0, %s401_s19  ;;  %s494_s7 = scalar_lea.vmem %s534_s4, %s401_s19 }
  0x10   : > { %v199_v1 = vld [vmem:[%s192_s22] sm:$0xff]  ;;  %v200_v2 = vld [vmem:[%s192_s22 + $0x8] sm:$0xff]  ;;  %v201_v6 = vld [vmem:[%s192_s22 + $0x10] sm:$0xff] }
  0x11   : > { %v203_v3 = vld [vmem:[%s192_s22 + $0x20] sm:$0xff]  ;;  %v207_v4 = vpack.c.bf16 %v200_v2, %v199_v1  ;;  %v204_v5 = vld [vmem:[%s192_s22 + $0x28] sm:$0xff]  ;;  %v202_v7 = vld [vmem:[%s192_s22 + $0x18] sm:$0xff] }
  0x12   : > { %v209_v8 = vpack.c.bf16 %v204_v5, %v203_v3  ;;  %v208_v9 = vpack.c.bf16 %v202_v7, %v201_v6  ;;  %v205_v10 = vld [vmem:[%s192_s22 + $0x30] sm:$0xff]  ;;  %v206_v11 = vld [vmem:[%s192_s22 + $0x38] sm:$0xff] }
  0x13   : > { %410 = vmatprep.mubr.msk.bf16.mxu0 %vm226_vm0, %v207_v4  ;;  %v210_v12 = vpack.c.bf16 %v206_v11, %v205_v10 }
  0x14   : > { %414 = vmatprep.mubr.msk.bf16.mxu1 %vm226_vm0, %v209_v8  ;;  %411 = vmatmul.mubr.msk.bf16.vlgmr.msra.gmra.mrb[0].mxu0 %vm226_vm0, %v208_v9 }
  0x15   : > { %415 = vmatmul.mubr.msk.bf16.vlgmr.msra.gmra.mrb[0].mxu1 %vm226_vm0, %v210_v12 }
  0xe7   : > { %v412_v14 = vpop.f32.mrb[0].mxu0 }
  0xe8   : > { %v282_v16 = vadd.f32 %v412_v14, %v393_v13  ;;  %v416_v17 = vpop.f32.mrb[0].mxu1  ;;  %v273_v19 = vpop.f32.mrb[1].mxu0 }
  0xe9   : > { %v298_v21 = vadd.f32 %v416_v17, %v393_v13  ;;  %v274_v22 = vadd.f32 %v393_v13, %v273_v19  ;;  %v289_v23 = vpop.f32.mrb[1].mxu1  ;;  %v413_v25 = vpop.f32.mrb[2].mxu0 }
  0xea   : > { %v314_v27 = vadd.f32 %v306_v15, %v282_v16  ;;  %v290_v28 = vadd.f32 %v393_v13, %v289_v23  ;;  %v285_v29 = vadd.f32 %v413_v25, %v393_v13  ;;  %v417_v30 = vpop.f32.mrb[2].mxu1  ;;  %v276_v32 = vpop.f32.mrb[3].mxu0 }
  0xeb   : > { %v318_v34 = vadd.f32 %v310_v18, %v298_v21  ;;  %v312_v35 = vadd.f32 %v304_v20, %v274_v22  ;;  %v301_v36 = vadd.f32 %v417_v30, %v393_v13  ;;  %v277_v37 = vadd.f32 %v393_v13, %v276_v32  ;;  %v292_v38 = vpop.f32.mrb[3].mxu1 }
  0xec   : > { %323 = vst.msk [vmem:[%s494_s7 + $0x10] sm:$0xff] %vm320_vm1, %v314_v27  ;;  %v316_v40 = vadd.f32 %v308_v24, %v290_v28  ;;  %v315_v41 = vadd.f32 %v307_v26, %v285_v29  ;;  %v293_v42 = vadd.f32 %v393_v13, %v292_v38 }
  0xed   : > { %327 = vst.msk [vmem:[%s494_s7 + $0x30] sm:$0xff] %vm320_vm1, %v318_v34  ;;  %321 = vst.msk [vmem:[%s494_s7] sm:$0xff] %vm320_vm1, %v312_v35  ;;  %v319_v43 = vadd.f32 %v311_v31, %v301_v36  ;;  %v313_v44 = vadd.f32 %v305_v33, %v277_v37 }
  0xee   : > { %325 = vst.msk [vmem:[%s494_s7 + $0x20] sm:$0xff] %vm320_vm1, %v316_v40  ;;  %324 = vst.msk [vmem:[%s494_s7 + $0x18] sm:$0xff] %vm320_vm1, %v315_v41  ;;  %v317_v45 = vadd.f32 %v309_v39, %v293_v42 }
  0xef   : > { %328 = vst.msk [vmem:[%s494_s7 + $0x38] sm:$0xff] %vm320_vm1, %v319_v43  ;;  %322 = vst.msk [vmem:[%s494_s7 + $0x8] sm:$0xff] %vm320_vm1, %v313_v44 }
  0xf0   : > { %326 = vst.msk [vmem:[%s494_s7 + $0x28] sm:$0xff] %vm320_vm1, %v317_v45 }
  0xf1 PF: > { %s14_s15 = sadd.s32 1, %s435_s15  }
  0xf2   : > { %p11_p4 = scmp.ge.s32.totalorder %s14_s15, 4  }
  0xf4   :  { %13 = sbr.rel (!%p11_p4) target bundleno = 1 (0x1), region = 66 }

// kernel: tracing_transformer_wrapper_forward.9
= control target key start
LH: loop header
LB: loop body
LE: loop exit
PB: predicated region body
PF: predicated region fallthrough
CT: control target
= control target key end

     0   :  { %s1866_s27 = smov 0   ;;  %s2200_s0 = inlined_call_operand.vmem [shape: f32[2,64,32], index: 0, kind: input, shape index: {}]   ;;  %s2201_s1 = inlined_call_operand.vmem [shape: f32[2,1,32], index: 1, kind: input, shape index: {}]   ;;  %s2202_s2 = inlined_call_operand.vmem [shape: f32[2,1,32], index: 2, kind: input, shape index: {}]   ;;  %s2203_s3 = inlined_call_operand.vmem [shape: f32[2,1,32], index: 3, kind: input, shape index: {}]   ;;  %s2204_s4 = inlined_call_operand.vmem [shape: bf16[32,96], index: 4, kind: input, shape index: {}]   ;;  %s2205_s5 = inlined_call_operand.vmem [shape: f32[1,96], index: 5, kind: input, shape index: {}]   ;;  %s2206_s6 = inlined_call_operand.vmem [shape: bf16[32,32], index: 6, kind: input, shape index: {}]   ;;  %s2207_s7 = inlined_call_operand.vmem [shape: f32[1,32], index: 7, kind: input, shape index: {}]   ;;  %s2208_s8 = inlined_call_operand.vmem [shape: f32[2,64,32], index: 8, kind: output, shape index: {}]  }
   0x1 LB: > { %s1494_s28 = sadd.s32 4294967295, %s1814_s27   ;;  %p1498_p0 = scmp.ge.s32.totalorder %s1814_s27, 1  ;;  %s1814_s27 = sphi %s1866_s27, %s18_s27  }
   0x2   : > { %p286_p1 = scmp.lt.s32.totalorder %s1814_s27, 3 }
   0x4   : > { %p287_p2 = pnand %p1498_p0, %p286_p1 }
   0x5   : > { %p329_p3 = scmp.lt.s32.totalorder (!%p287_p2), %s1494_s28, 1  ;;  %vm359_vm0 = vcmask (!%p287_p2), 261120   ;;  %v1716_v56 = vld [vmem:[%s2204_s4] sm:$0xff] (!%p287_p2)   ;;  %v1717_v57 = vld [vmem:[%s2204_s4 + $0x8] sm:$0xff] (!%p287_p2)   ;;  %v467_v63 = vlaneseq (!%p287_p2)  ;;  %vm618_vm1 = vcmask (!%p287_p2), 130048   ;;  %s1816_s23 = smov (!%p287_p2), 96  }
   0x6   : > { %290 = sbr.rel (%p287_p2) target bundleno = 2378 (0x94a), region = 52  ;;  %1591 = vmatprep.subr.bf16.mxu0 (!%p287_p2), %v1716_v56  ;;  %vm716_vm2 = vcmask (!%p287_p2), 523264   ;;  %s1817_s24 = smov (!%p287_p2), 64  }
   0x7   : > { %1592 = vmatpush3.bf16.msra.mxu0 (!%p287_p2), %v1716_v56  ;;  %s1818_s25 = smov (!%p287_p2), 80   ;;  %s1819_s26 = smov (!%p287_p2), 112  }
   0x8   : > { %1593 = vmatprep.subr.bf16.mxu0 (!%p287_p2), %v1717_v57  ;;  %s1820_s30 = smov (!%p287_p2), 48  }
   0xb   : > { %1594 = vmatpush3.bf16.msra.mxu0 (!%p287_p2), %v1717_v57 }
   0xd   : > { %s2210_s28 = smov (!%p329_p3, %s1494_s28), 1 }
   0xe   : > { %s1541_s29 = sshll.u32 %s2210_s28, 6  ;;  %s336_s17 = scalar_lea.vmem %s2201_s1, %s2210_s28 }
   0xf   : > { %s1882_s10 = scalar_lea.vmem %s2200_s0, %s1541_s29  ;;  %s339_s20 = scalar_lea.vmem %s2202_s2, %s2210_s28 }
  0x10   : > { %v349_v0 = vld [vmem:[%s1882_s10] sm:$0xff]  ;;  %v351_v1 = vld [vmem:[%s1882_s10 + $0x10] sm:$0xff]  ;;  %v350_v2 = vld [vmem:[%s1882_s10 + $0x8] sm:$0xff]  ;;  %s342_s16 = scalar_lea.vmem %s2203_s3, %s2210_s28  ;;  %s2171_s21 = scalar_lea.vmem %s2208_s8, %s1541_s29 }
  0x11   : > { %v360_v3 = vsel %vm359_vm0, %v349_v0, 0.0  ;;  %v366_v4 = vsel %vm359_vm0, %v351_v1, 0.0  ;;  %v352_v5 = vld [vmem:[%s1882_s10 + $0x18] sm:$0xff]  ;;  %v363_v6 = vsel %vm359_vm0, %v350_v2, 0.0  ;;  %v353_v8 = vld [vmem:[%s1882_s10 + $0x20] sm:$0xff]  ;;  %v354_v9 = vld [vmem:[%s1882_s10 + $0x28] sm:$0xff] }
  0x12   : > { %361 = vadd.xlane.f32.xlu0 %v360_v3  ;;  %367 = vadd.xlane.f32.xlu1 %v366_v4  ;;  %v369_v7 = vsel %vm359_vm0, %v352_v5, 0.0  ;;  %v372_v10 = vsel %vm359_vm0, %v353_v8, 0.0  ;;  %v375_v11 = vsel %vm359_vm0, %v354_v9, 0.0  ;;  %v355_v12 = vld [vmem:[%s1882_s10 + $0x30] sm:$0xff]  ;;  %v356_v13 = vld [vmem:[%s1882_s10 + $0x38] sm:$0xff] }
  0x13   : > { %v378_v14 = vsel %vm359_vm0, %v355_v12, 0.0  ;;  %v381_v15 = vsel %vm359_vm0, %v356_v13, 0.0 }
  0x16   : > { %364 = vadd.xlane.f32.xlu0 %v363_v6  ;;  %370 = vadd.xlane.f32.xlu1 %v369_v7  ;;  %v468_v6 = vshrl.u32 %v467_v63, 7  ;;  %v357_v7 = vld [vmem:[%s336_s17] sm:$0x1] }
  0x17   : > { %v1504_v63 = vld [vmem:[%s2205_s5] ss:$0 sm:$0xff] }
  0x1a   : > { %373 = vadd.xlane.f32.xlu0 %v372_v10  ;;  %376 = vadd.xlane.f32.xlu1 %v375_v11 }
  0x1e   : > { %379 = vadd.xlane.f32.xlu0 %v378_v14  ;;  %382 = vadd.xlane.f32.xlu1 %v381_v15  ;;  %v469_v15 = vsub.s32 0, %v468_v6 }
  0x9f   : > { %v362_v16 = vpop.xlane.xlu0 %361  ;;  %v368_v17 = vpop.xlane.xlu1 %367 }
  0xa0   : > { %v385_v18 = vmul.f32 0.03125, %v362_v16  ;;  %v387_v19 = vmul.f32 0.03125, %v368_v17 }
  0xa2   : > { %v1900_v20 = vsub.f32 %v349_v0, %v385_v18  ;;  %v1902_v21 = vsub.f32 %v351_v1, %v387_v19 }
  0xa3   : > { %v365_v22 = vpop.xlane.xlu0 %364  ;;  %v371_v23 = vpop.xlane.xlu1 %370 }
  0xa4   : > { %v386_v24 = vmul.f32 0.03125, %v365_v22  ;;  %v388_v25 = vmul.f32 0.03125, %v371_v23  ;;  %v401_v26 = vmul.f32 %v1900_v20, %v1900_v20  ;;  %v403_v27 = vmul.f32 %v1902_v21, %v1902_v21 }
  0xa6   : > { %v1908_v28 = vsub.f32 %v350_v2, %v386_v24  ;;  %v1910_v29 = vsub.f32 %v352_v5, %v388_v25  ;;  %v409_v30 = vsel %vm359_vm0, %v401_v26, 0.0  ;;  %v415_v33 = vsel %vm359_vm0, %v403_v27, 0.0 }
  0xa7   : > { %410 = vadd.xlane.f32.xlu0 %v409_v30  ;;  %v374_v31 = vpop.xlane.xlu0 %373  ;;  %v377_v32 = vpop.xlane.xlu1 %376 }
  0xa8   : > { %v389_v34 = vmul.f32 0.03125, %v374_v31  ;;  %v390_v35 = vmul.f32 0.03125, %v377_v32  ;;  %v402_v36 = vmul.f32 %v1908_v28, %v1908_v28  ;;  %v404_v37 = vmul.f32 %v1910_v29, %v1910_v29 }
  0xaa   : > { %v1918_v38 = vsub.f32 %v353_v8, %v389_v34  ;;  %v1920_v39 = vsub.f32 %v354_v9, %v390_v35  ;;  %v412_v40 = vsel %vm359_vm0, %v402_v36, 0.0  ;;  %v418_v43 = vsel %vm359_vm0, %v404_v37, 0.0  ;;  %v1503_v35 = vld [vmem:[%s339_s20] ss:$0 sm:$0xff] }
  0xab   : > { %416 = vadd.xlane.f32.xlu0 %v415_v33  ;;  %413 = vadd.xlane.f32.xlu1 %v412_v40  ;;  %v380_v41 = vpop.xlane.xlu0 %379  ;;  %v383_v42 = vpop.xlane.xlu1 %382 }
  0xac   : > { %v391_v44 = vmul.f32 0.03125, %v380_v41  ;;  %v392_v45 = vmul.f32 0.03125, %v383_v42  ;;  %v405_v46 = vmul.f32 %v1918_v38, %v1918_v38  ;;  %v406_v47 = vmul.f32 %v1920_v39, %v1920_v39 }
  0xae   : > { %v1928_v48 = vsub.f32 %v355_v12, %v391_v44  ;;  %v1930_v49 = vsub.f32 %v356_v13, %v392_v45  ;;  %v421_v50 = vsel %vm359_vm0, %v405_v46, 0.0  ;;  %v424_v51 = vsel %vm359_vm0, %v406_v47, 0.0 }
  0xaf   : > { %419 = vadd.xlane.f32.xlu1 %v418_v43  ;;  %422 = vadd.xlane.f32.xlu0 %v421_v50  ;;  %v465_v12 = vadd.f32 1.0, %v357_v7 }
  0xb0   : > { %v407_v52 = vmul.f32 %v1928_v48, %v1928_v48  ;;  %v408_v53 = vmul.f32 %v1930_v49, %v1930_v49 }
  0xb1   : > { %v470_v25 = vrot.slane %v465_v12, %v469_v15 }
  0xb2   : > { %v427_v54 = vsel %vm359_vm0, %v407_v52, 0.0  ;;  %v430_v55 = vsel %vm359_vm0, %v408_v53, 0.0 }
  0xb3   : > { %425 = vadd.xlane.f32.xlu1 %v424_v51  ;;  %428 = vadd.xlane.f32.xlu0 %v427_v54 }
  0xb7   : > { %431 = vadd.xlane.f32.xlu1 %v430_v55 }
 0x134   : > { %v411_v58 = vpop.xlane.xlu0 %410 }
 0x135   : > { %v433_v59 = vmul.f32 0.03125, %v411_v58 }
 0x137   : > { %v441_v60 = vadd.f32 1e-06, %v433_v59 }
 0x138   : > { %v414_v61 = vpop.xlane.xlu1 %413  ;;  %v417_v62 = vpop.xlane.xlu0 %416 }
 0x139   : > { %1720 = vrsqrt.f32 %v441_v60  ;;  %v434_v0 = vmul.f32 0.03125, %v414_v61  ;;  %v435_v1 = vmul.f32 0.03125, %v417_v62 }
 0x13b   : > { %v442_v2 = vadd.f32 1e-06, %v434_v0  ;;  %v443_v3 = vadd.f32 1e-06, %v435_v1 }
 0x13c   : > { %v420_v4 = vpop.xlane.xlu1 %419  ;;  %v423_v5 = vpop.xlane.xlu0 %422 }
 0x13d   : > { %1722 = vrsqrt.f32 %v442_v2  ;;  %v436_v8 = vmul.f32 0.03125, %v420_v4  ;;  %v437_v9 = vmul.f32 0.03125, %v423_v5 }
 0x13e   : > { %1724 = vrsqrt.f32 %v443_v3 }
 0x13f   : > { %v444_v10 = vadd.f32 1e-06, %v436_v8  ;;  %v445_v11 = vadd.f32 1e-06, %v437_v9 }
 0x140   : > { %v426_v13 = vpop.xlane.xlu1 %425  ;;  %v429_v14 = vpop.xlane.xlu0 %428 }
 0x141   : > { %1726 = vrsqrt.f32 %v444_v10  ;;  %v438_v16 = vmul.f32 0.03125, %v426_v13  ;;  %v439_v17 = vmul.f32 0.03125, %v429_v14 }
 0x142   : > { %1728 = vrsqrt.f32 %v445_v11 }
 0x143   : > { %v1721_v18 = vpop.eup %1720  ;;  %v446_v19 = vadd.f32 1e-06, %v438_v16  ;;  %v447_v22 = vadd.f32 1e-06, %v439_v17 }
 0x144   : > { %v432_v23 = vpop.xlane.xlu1 %431  ;;  %v457_v24 = vmul.f32 %v1721_v18, %v1900_v20 }
 0x145   : > { %1730 = vrsqrt.f32 %v446_v19  ;;  %v440_v26 = vmul.f32 0.03125, %v432_v23 }
 0x146   : > { %1732 = vrsqrt.f32 %v447_v22  ;;  %v472_v33 = vmul.f32 %v470_v25, %v457_v24 }
 0x147   : > { %v1723_v27 = vpop.eup %1722  ;;  %v448_v30 = vadd.f32 1e-06, %v440_v26 }
 0x148   : > { %v1725_v31 = vpop.eup %1724  ;;  %v458_v32 = vmul.f32 %v1723_v27, %v1908_v28  ;;  %v486_v41 = vadd.f32 %v1503_v35, %v472_v33 }
 0x149   : > { %v459_v34 = vmul.f32 %v1725_v31, %v1902_v21  ;;  %1734 = vrsqrt.f32 %v448_v30 }
 0x14a   : > { %v473_v36 = vmul.f32 %v470_v25, %v458_v32 }
 0x14b   : > { %v1727_v20 = vpop.eup %1726  ;;  %v474_v43 = vmul.f32 %v470_v25, %v459_v34 }
 0x14c   : > { %v1729_v37 = vpop.eup %1728  ;;  %v460_v40 = vmul.f32 %v1727_v20, %v1910_v29  ;;  %v487_v42 = vadd.f32 %v1503_v35, %v473_v36 }
 0x14d   : > { %v461_v44 = vmul.f32 %v1729_v37, %v1918_v38  ;;  %v488_v21 = vadd.f32 %v1503_v35, %v474_v43 }
 0x14e   : > { %v494_v45 = vpack.c.bf16 %v487_v42, %v486_v41  ;;  %v475_v46 = vmul.f32 %v470_v25, %v460_v40 }
 0x14f   : > { %v1731_v47 = vpop.eup %1730  ;;  %v476_v52 = vmul.f32 %v470_v25, %v461_v44 }
 0x150   : > { %v1733_v50 = vpop.eup %1732  ;;  %v462_v28 = vmul.f32 %v1731_v47, %v1920_v39  ;;  %1595 = vmatprep.mubr.msk.bf16.mxu0 %vm359_vm0, %v494_v45  ;;  %v489_v51 = vadd.f32 %v1503_v35, %v475_v46 }
 0x151   : > { %v463_v53 = vmul.f32 %v1733_v50, %v1928_v48  ;;  %v490_v38 = vadd.f32 %v1503_v35, %v476_v52 }
 0x152   : > { %v495_v54 = vpack.c.bf16 %v489_v51, %v488_v21  ;;  %v477_v29 = vmul.f32 %v470_v25, %v462_v28 }
 0x153   : > { %v1735_v55 = vpop.eup %1734  ;;  %v478_v58 = vmul.f32 %v470_v25, %v463_v53 }
 0x154   : > { %v464_v56 = vmul.f32 %v1735_v55, %v1930_v49  ;;  %1596 = vmatmul.mubr.msk.bf16.vlgmr.msra.gmra.mrb[0].mxu0 %vm359_vm0, %v495_v54  ;;  %v491_v57 = vadd.f32 %v1503_v35, %v477_v29 }
 0x155   : > { %v492_v39 = vadd.f32 %v1503_v35, %v478_v58 }
 0x156   : > { %v496_v59 = vpack.c.bf16 %v491_v57, %v490_v38  ;;  %v479_v60 = vmul.f32 %v470_v25, %v464_v56 }
 0x158   : > { %1599 = vmatprep.mubr.msk.bf16.mxu0 %vm359_vm0, %v496_v59  ;;  %v493_v61 = vadd.f32 %v1503_v35, %v479_v60 }
 0x15a   : > { %v497_v62 = vpack.c.bf16 %v493_v61, %v492_v39 }
 0x15c   : > { %1600 = vmatmul.mubr.msk.bf16.gmra.mrb[4].mxu0 %vm359_vm0, %v497_v62 }
 0x227   : > { %v1597_v48 = vpop.f32.mrb[0].mxu0 }
 0x228   : > { %v567_v49 = vpop.f32.mrb[1].mxu0  ;;  %v576_v1 = vadd.f32 %v1597_v48, %v1504_v63 }
 0x229   : > { %v1598_v0 = vpop.f32.mrb[2].mxu0  ;;  %v568_v4 = vadd.f32 %v1504_v63, %v567_v49 }
 0x22a   : > { %v579_v2 = vadd.f32 %v1598_v0, %v1504_v63  ;;  %v570_v3 = vpop.f32.mrb[3].mxu0 }
 0x22b   : > { %v571_v5 = vadd.f32 %v1504_v63, %v570_v3 }
 0x22c   : > { %v1969_v6 = vpack.c.bf16 %v579_v2, %v576_v1 }
 0x22d   : > { %v1971_v7 = vpack.c.bf16 %v571_v5, %v568_v4 }
 0x22e   : > { %612 = vrot.lane.b32.xlu1 %v1969_v6, %s1816_s23 }
 0x22f   : > { %610 = vrot.lane.b32.xlu0 %v1971_v7, %s1816_s23  ;;  %v1601_v8 = vpop.f32.mrb[4].mxu0  ;;  %1611 = vmatprep.mubr.msk.bf16.mxu1 %vm618_vm1, %v1971_v7 }
 0x230   : > { %v583_v9 = vpop.f32.mrb[5].mxu0  ;;  %v592_v11 = vadd.f32 %v1601_v8, %v1504_v63 }
 0x231   : > { %v1602_v10 = vpop.f32.mrb[6].mxu0  ;;  %v584_v14 = vadd.f32 %v1504_v63, %v583_v9 }
 0x232   : > { %v595_v12 = vadd.f32 %v1602_v10, %v1504_v63  ;;  %v586_v13 = vpop.f32.mrb[7].mxu0 }
 0x233   : > { %v587_v15 = vadd.f32 %v1504_v63, %v586_v13 }
 0x234   : > { %v1977_v16 = vpack.c.bf16 %v595_v12, %v592_v11 }
 0x235   : > { %v1979_v17 = vpack.c.bf16 %v587_v15, %v584_v14 }
 0x237   : > { %614 = vrot.lane.b32.xlu1 %v1979_v17, %s1816_s23 }
 0x23b   : > { %616 = vrot.lane.b32.xlu1 %v1977_v16, %s1816_s23 }
 0x2a0   : > { %v613_v22 = vpop.permute.xlu1 %612 }
 0x2a1   : > { %v611_v18 = vpop.permute.xlu0 %610  ;;  %v635_v23 = vsel %vm618_vm1, %v613_v22, 0 }
 0x2a2   : > { %1695 = vmatprep.subr.msk.bf16.mxu1 %vm618_vm1, %v611_v18  ;;  %v632_v19 = vsel %vm618_vm1, %v611_v18, 0 }
 0x2a3   : > { %1604 = vmatpush3.bf16.xpose.msra.mxu1 %v632_v19 }
 0x2a4   : > { %1696 = vmatprep.subr.msk.bf16.mxu1 %vm618_vm1, %v613_v22 }
 0x2a9   : > { %v615_v24 = vpop.permute.xlu1 %614 }
 0x2aa   : > { %v638_v25 = vsel %vm618_vm1, %v615_v24, 0 }
 0x2ab   : > { %1606 = vmatpush3.bf16.xpose.msra.mxu1 %v635_v23 }
 0x2ac   : > { %1697 = vmatprep.subr.msk.bf16.mxu1 %vm618_vm1, %v615_v24 }
 0x2ad   : > { %v617_v26 = vpop.permute.xlu1 %616 }
 0x2ae   : > { %v641_v27 = vsel %vm618_vm1, %v617_v26, 0 }
 0x2b3   : > { %1608 = vmatpush3.bf16.xpose.msra.mxu1 %v638_v25 }
 0x2b4   : > { %1698 = vmatprep.subr.msk.bf16.mxu1 %vm618_vm1, %v617_v26 }
 0x2bb   : > { %1610 = vmatpush3.bf16.xpose.msra.mxu1 %v641_v27 }
 0x2c2   : > { %1612 = vmatmul.mubr.msk.bf16.vlgmr.msra.gmra.mrb[0].mxu1 %vm618_vm1, %v1969_v6 }
 0x2c3   : > { %1615 = vmatprep.mubr.msk.bf16.mxu1 %vm618_vm1, %v1979_v17 }
 0x2ca   : > { %1616 = vmatmul.mubr.msk.bf16.gmra.mrb[4].mxu1 %vm618_vm1, %v1977_v16 }
 0x395   : > { %v1613_v30 = vpop.f32.mrb[0].mxu1 }
 0x396   : > { %v710_v31 = vmul.f32 0.25, %v1613_v30  ;;  %v677_v32 = vpop.f32.mrb[1].mxu1 }
 0x397   : > { %v1614_v33 = vpop.f32.mrb[2].mxu1  ;;  %v708_v34 = vmul.f32 0.25, %v677_v32 }
 0x398   : > { %v680_v35 = vpop.f32.mrb[3].mxu1  ;;  %v723_v36 = vsel %vm716_vm2, %v710_v31, -inf  ;;  %v711_v40 = vmul.f32 0.25, %v1614_v33 }
 0x399   : > { %v709_v20 = vmul.f32 0.25, %v680_v35  ;;  %724 = vmax.xlane.f32.xlu0 %v723_v36  ;;  %v717_v41 = vsel %vm716_vm2, %v708_v34, -inf }
 0x39a   : > { %v726_v47 = vsel %vm716_vm2, %v711_v40, -inf }
 0x39b   : > { %v720_v37 = vsel %vm716_vm2, %v709_v20, -inf }
 0x39c   : > { %721 = vmax.xlane.f32.xlu1 %v720_v37 }
 0x39d   : > { %718 = vmax.xlane.f32.xlu0 %v717_v41  ;;  %v1617_v42 = vpop.f32.mrb[4].mxu1 }
 0x39e   : > { %v693_v43 = vpop.f32.mrb[5].mxu1  ;;  %v714_v45 = vmul.f32 0.25, %v1617_v42 }
 0x39f   : > { %v1618_v44 = vpop.f32.mrb[6].mxu1  ;;  %v712_v50 = vmul.f32 0.25, %v693_v43 }
 0x3a0   : > { %v696_v46 = vpop.f32.mrb[7].mxu1  ;;  %v735_v28 = vsel %vm716_vm2, %v714_v45, -inf  ;;  %v2006_v51 = vmul.f32 0.25, %v1618_v44 }
 0x3a1   : > { %727 = vmax.xlane.f32.xlu0 %v726_v47  ;;  %v729_v21 = vsel %vm716_vm2, %v712_v50, -inf  ;;  %v2008_v52 = vmul.f32 0.25, %v696_v46 }
 0x3a2   : > { %v738_v53 = vsel %vm716_vm2, %v2006_v51, -inf }
 0x3a3   : > { %v732_v54 = vsel %vm716_vm2, %v2008_v52, -inf }
 0x3a5   : > { %736 = vmax.xlane.f32.xlu0 %v735_v28 }
 0x3a9   : > { %730 = vmax.xlane.f32.xlu0 %v729_v21 }
 0x3ad   : > { %811 = vrot.lane.b32.xlu1 %v1969_v6, %s1817_s24 }
 0x3b1   : > { %813 = vrot.lane.b32.xlu1 %v1979_v17, %s1817_s24 }
 0x3bf   : > { %809 = vrot.lane.b32.xlu0 %v1971_v7, %s1817_s24 }
 0x3d5   : > { %739 = vmax.xlane.f32.xlu1 %v738_v53 }
 0x3d9   : > { %733 = vmax.xlane.f32.xlu1 %v732_v54 }
 0x3ea   : > { %815 = vrot.lane.b32.xlu1 %v1977_v16, %s1817_s24 }
 0x426   : > { %v725_v29 = vpop.xlane.xlu0 %724 }
 0x427   : > { %v743_v55 = vsub.f32 %v710_v31, %v725_v29 }
 0x429   : > { %v753_v56 = vmul.f32 1.442695, %v743_v55  ;;  %v722_v38 = vpop.xlane.xlu1 %721 }
 0x42a   : > { %v719_v57 = vpop.xlane.xlu0 %718  ;;  %v742_v59 = vsub.f32 %v709_v20, %v722_v38 }
 0x42b   : > { %1736 = vpow2.f32 %v753_v56  ;;  %v741_v58 = vsub.f32 %v708_v34, %v719_v57 }
 0x42c   : > { %v751_v62 = vmul.f32 1.442695, %v742_v59 }
 0x42d   : > { %v749_v60 = vmul.f32 1.442695, %v741_v58  ;;  %v812_v9 = vpop.permute.xlu1 %811 }
 0x42e   : > { %v728_v39 = vpop.xlane.xlu0 %727 }
 0x42f   : > { %1738 = vpow2.f32 %v749_v60  ;;  %v744_v61 = vsub.f32 %v711_v40, %v728_v39 }
 0x431   : > { %v755_v48 = vmul.f32 1.442695, %v744_v61  ;;  %v814_v15 = vpop.permute.xlu1 %813 }
 0x432   : > { %v737_v63 = vpop.xlane.xlu0 %736 }
 0x433   : > { %1740 = vpow2.f32 %v755_v48  ;;  %v747_v49 = vsub.f32 %v714_v45, %v737_v63 }
 0x434   : > { %1742 = vpow2.f32 %v751_v62 }
 0x435   : > { %v2015_v0 = vpop.eup %1736  ;;  %v761_v1 = vmul.f32 1.442695, %v747_v49 }
 0x436   : > { %v731_v2 = vpop.xlane.xlu0 %730  ;;  %v771_v3 = vsel %vm716_vm2, %v2015_v0, 0.0 }
 0x437   : > { %1744 = vpow2.f32 %v761_v1  ;;  %v745_v4 = vsub.f32 %v712_v50, %v731_v2  ;;  %772 = vadd.xlane.f32.xlu0 %v771_v3 }
 0x439   : > { %v2019_v5 = vpop.eup %1738  ;;  %v757_v8 = vmul.f32 1.442695, %v745_v4 }
 0x43a   : > { %v810_v10 = vpop.permute.xlu0 %809  ;;  %v765_v11 = vsel %vm716_vm2, %v2019_v5, 0.0 }
 0x43b   : > { %1746 = vpow2.f32 %v757_v8  ;;  %766 = vadd.xlane.f32.xlu0 %v765_v11  ;;  %1619 = vmatprep.subr.bf16.mxu0 %v810_v10 }
 0x43c   : > { %1620 = vmatpush3.bf16.msra.mxu0 %v810_v10 }
 0x43d   : > { %v1741_v12 = vpop.eup %1740  ;;  %1621 = vmatprep.subr.bf16.mxu0 %v812_v9 }
 0x43e   : > { %v774_v13 = vsel %vm716_vm2, %v1741_v12, 0.0  ;;  %v1743_v14 = vpop.eup %1742 }
 0x43f   : > { %775 = vadd.xlane.f32.xlu1 %v774_v13  ;;  %v768_v22 = vsel %vm716_vm2, %v1743_v14, 0.0 }
 0x440   : > { %1622 = vmatpush3.bf16.msra.mxu0 %v812_v9 }
 0x441   : > { %v2024_v18 = vpop.eup %1744  ;;  %1623 = vmatprep.subr.bf16.mxu0 %v814_v15 }
 0x442   : > { %v783_v19 = vsel %vm716_vm2, %v2024_v18, 0.0 }
 0x443   : > { %784 = vadd.xlane.f32.xlu0 %v783_v19  ;;  %769 = vadd.xlane.f32.xlu1 %v768_v22 }
 0x444   : > { %1624 = vmatpush3.bf16.msra.mxu0 %v814_v15 }
 0x445   : > { %v2029_v23 = vpop.eup %1746 }
 0x446   : > { %v777_v24 = vsel %vm716_vm2, %v2029_v23, 0.0 }
 0x447   : > { %778 = vadd.xlane.f32.xlu0 %v777_v24 }
 0x454   : > { %912 = vrot.lane.b32.xlu1 %v1969_v6, %s1818_s25 }
 0x458   : > { %914 = vrot.lane.b32.xlu1 %v1979_v17, %s1818_s25 }
 0x462   : > { %v740_v25 = vpop.xlane.xlu1 %739 }
 0x463   : > { %v748_v26 = vsub.f32 %v2006_v51, %v740_v25 }
 0x465   : > { %v763_v27 = vmul.f32 1.442695, %v748_v26 }
 0x466   : > { %v734_v30 = vpop.xlane.xlu1 %733 }
 0x467   : > { %1748 = vpow2.f32 %v763_v27  ;;  %v746_v31 = vsub.f32 %v2008_v52, %v734_v30 }
 0x469   : > { %v759_v32 = vmul.f32 1.442695, %v746_v31 }
 0x46a   : > { %v816_v33 = vpop.permute.xlu1 %815 }
 0x46b   : > { %1625 = vmatprep.subr.bf16.mxu0 %v816_v33  ;;  %1750 = vpow2.f32 %v759_v32 }
 0x46c   : > { %1626 = vmatpush3.bf16.msra.mxu0 %v816_v33 }
 0x471   : > { %v1749_v34 = vpop.eup %1748 }
 0x472   : > { %v786_v35 = vsel %vm716_vm2, %v1749_v34, 0.0 }
 0x473   : > { %787 = vadd.xlane.f32.xlu0 %v786_v35 }
 0x475   : > { %v1751_v36 = vpop.eup %1750 }
 0x476   : > { %v780_v20 = vsel %vm716_vm2, %v1751_v36, 0.0 }
 0x47c   : > { %781 = vadd.xlane.f32.xlu1 %v780_v20 }
 0x489   : > { %910 = vrot.lane.b32.xlu0 %v1971_v7, %s1818_s25 }
 0x48d   : > { %902 = vrot.lane.b32.xlu0 %v1971_v7, %s1819_s26  ;;  %916 = vrot.lane.b32.xlu1 %v1977_v16, %s1818_s25 }
 0x491   : > { %906 = vrot.lane.b32.xlu0 %v1979_v17, %s1819_s26  ;;  %904 = vrot.lane.b32.xlu1 %v1969_v6, %s1819_s26 }
 0x495   : > { %908 = vrot.lane.b32.xlu1 %v1977_v16, %s1819_s26 }
 0x4c4   : > { %v773_v37 = vpop.xlane.xlu0 %772 }
 0x4c8   : > { %v767_v41 = vpop.xlane.xlu0 %766 }
 0x4cc   : > { %v776_v40 = vpop.xlane.xlu1 %775 }
 0x4cd   : > { %1752 = vrcp.f32 %v776_v40 }
 0x4ce   : > { %1754 = vrcp.f32 %v767_v41 }
 0x4cf   : > { %1756 = vrcp.f32 %v773_v37 }
 0x4d0   : > { %v770_v42 = vpop.xlane.xlu1 %769  ;;  %v785_v53 = vpop.xlane.xlu0 %784 }
 0x4d1   : > { %1758 = vrcp.f32 %v770_v42 }
 0x4d4   : > { %v779_v54 = vpop.xlane.xlu0 %778  ;;  %v913_v29 = vpop.permute.xlu1 %912 }
 0x4d5   : > { %v934_v59 = vsel %vm618_vm1, %v913_v29, 0 }
 0x4d7   : > { %v1753_v43 = vpop.eup %1752 }
 0x4d8   : > { %v1755_v44 = vpop.eup %1754  ;;  %v800_v47 = vmul.f32 %v1753_v43, %v1741_v12  ;;  %v915_v38 = vpop.permute.xlu1 %914 }
 0x4d9   : > { %v1757_v45 = vpop.eup %1756  ;;  %v797_v50 = vmul.f32 %v1755_v44, %v2019_v5  ;;  %v937_v63 = vsel %vm618_vm1, %v915_v38, 0 }
 0x4da   : > { %v799_v21 = vmul.f32 %v1757_v45, %v2015_v0 }
 0x4db   : > { %v1759_v46 = vpop.eup %1758 }
 0x4dc   : > { %v798_v28 = vmul.f32 %v1759_v46, %v1743_v14  ;;  %v806_v52 = vpack.c.bf16 %v800_v47, %v799_v21 }
 0x4de   : > { %v805_v51 = vpack.c.bf16 %v798_v28, %v797_v50 }
 0x4e0   : > { %1627 = vmatprep.mubr.msk.bf16.mxu0 %vm716_vm2, %v805_v51 }
 0x4e1   : > { %1628 = vmatmul.mubr.msk.bf16.vlgmr.msra.gmra.mrb[8].mxu0 %vm716_vm2, %v806_v52 }
 0x500   : > { %v788_v55 = vpop.xlane.xlu0 %787 }
 0x501   : > { %1760 = vrcp.f32 %v788_v55 }
 0x502   : > { %1762 = vrcp.f32 %v779_v54 }
 0x503   : > { %1764 = vrcp.f32 %v785_v53 }
 0x504   : > { %v911_v56 = vpop.permute.xlu0 %910 }
 0x505   : > { %v931_v57 = vsel %vm618_vm1, %v911_v56, 0  ;;  %1699 = vmatprep.subr.msk.bf16.mxu0 %vm618_vm1, %v911_v56 }
 0x506   : > { %1636 = vmatpush3.bf16.xpose.msra.mxu0 %v931_v57 }
 0x507   : > { %1700 = vmatprep.subr.msk.bf16.mxu0 %vm618_vm1, %v913_v29 }
 0x508   : > { %v903_v5 = vpop.permute.xlu0 %902 }
 0x509   : > { %v782_v58 = vpop.xlane.xlu1 %781 }
 0x50a   : > { %1766 = vrcp.f32 %v782_v58 }
 0x50b   : > { %v1761_v60 = vpop.eup %1760 }
 0x50c   : > { %v1763_v39 = vpop.eup %1762  ;;  %v804_v48 = vmul.f32 %v1761_v60, %v1749_v34  ;;  %v907_v10 = vpop.permute.xlu0 %906 }
 0x50d   : > { %v1765_v61 = vpop.eup %1764  ;;  %v801_v49 = vmul.f32 %v1763_v39, %v2029_v23  ;;  %v917_v1 = vpop.permute.xlu1 %916 }
 0x50e   : > { %1638 = vmatpush3.bf16.xpose.msra.mxu0 %v934_v59  ;;  %v803_v2 = vmul.f32 %v1765_v61, %v2024_v18  ;;  %v940_v8 = vsel %vm618_vm1, %v917_v1, 0 }
 0x50f   : > { %1701 = vmatprep.subr.msk.bf16.mxu0 %vm618_vm1, %v915_v38 }
 0x510   : > { %v808_v4 = vpack.c.bf16 %v804_v48, %v803_v2 }
 0x511   : > { %v905_v9 = vpop.permute.xlu1 %904 }
 0x514   : > { %v1767_v62 = vpop.eup %1766 }
 0x515   : > { %v802_v0 = vmul.f32 %v1767_v62, %v1751_v36  ;;  %v909_v11 = vpop.permute.xlu1 %908 }
 0x516   : > { %1640 = vmatpush3.bf16.xpose.msra.mxu0 %v937_v63 }
 0x517   : > { %1702 = vmatprep.subr.msk.bf16.mxu0 %vm618_vm1, %v917_v1  ;;  %v807_v3 = vpack.c.bf16 %v802_v0, %v801_v49 }
 0x519   : > { %1631 = vmatprep.mubr.msk.bf16.mxu0 %vm716_vm2, %v807_v3 }
 0x51a   : > { %1632 = vmatmul.mubr.msk.bf16.gmra.mrb[12].mxu0 %vm716_vm2, %v808_v4 }
 0x51b   : > { %1643 = vmatprep.mubr.msk.bf16.mxu0 %vm618_vm1, %v903_v5 }
 0x51e   : > { %1642 = vmatpush3.bf16.xpose.msra.mxu0 %v940_v8 }
 0x525   : > { %1644 = vmatmul.mubr.msk.bf16.vlgmr.msra.gmra.mrb[16].mxu0 %vm618_vm1, %v905_v9 }
 0x526   : > { %1647 = vmatprep.mubr.msk.bf16.mxu0 %vm618_vm1, %v907_v10 }
 0x52d   : > { %1648 = vmatmul.mubr.msk.bf16.gmra.mrb[20].mxu0 %vm618_vm1, %v909_v11 }
 0x5b4   : > { %v2065_v12 = vpop.f32.mrb[8].mxu0 }
 0x5b5   : > { %v2067_v13 = vpop.f32.mrb[9].mxu0 }
 0x5b6   : > { %v2069_v14 = vpop.f32.mrb[10].mxu0 }
 0x5b7   : > { %v899_v15 = vpack.c.bf16 %v2069_v14, %v2065_v12  ;;  %v2073_v18 = vpop.f32.mrb[11].mxu0  ;;  %v1537_v12 = vld [vmem:[%s2207_s7] ss:$0 sm:$0xff] }
 0x5b8   : > { %v898_v19 = vpack.c.bf16 %v2073_v18, %v2067_v13  ;;  %v1538_v14 = vld [vmem:[%s342_s16] ss:$0 sm:$0xff] }
 0x5ed   : > { %v2077_v22 = vpop.f32.mrb[12].mxu0 }
 0x5ee   : > { %v2079_v23 = vpop.f32.mrb[13].mxu0 }
 0x5ef   : > { %v2081_v24 = vpop.f32.mrb[14].mxu0 }
 0x5f0   : > { %v901_v25 = vpack.c.bf16 %v2081_v24, %v2077_v22  ;;  %v2085_v26 = vpop.f32.mrb[15].mxu0 }
 0x5f1   : > { %v900_v27 = vpack.c.bf16 %v2085_v26, %v2079_v23 }
 0x5f8   : > { %v1645_v30 = vpop.f32.mrb[16].mxu0 }
 0x5f9   : > { %v976_v31 = vpop.f32.mrb[17].mxu0  ;;  %v1009_v35 = vmul.f32 0.25, %v1645_v30 }
 0x5fa   : > { %v1007_v32 = vmul.f32 0.25, %v976_v31  ;;  %v1646_v33 = vpop.f32.mrb[18].mxu0 }
 0x5fb   : > { %v979_v34 = vpop.f32.mrb[19].mxu0  ;;  %v1010_v40 = vmul.f32 0.25, %v1646_v33  ;;  %v1021_v42 = vsel %vm716_vm2, %v1009_v35, -inf }
 0x5fc   : > { %v1008_v36 = vmul.f32 0.25, %v979_v34  ;;  %v1015_v20 = vsel %vm716_vm2, %v1007_v32, -inf }
 0x5fd   : > { %1016 = vmax.xlane.f32.xlu0 %v1015_v20  ;;  %v1024_v50 = vsel %vm716_vm2, %v1010_v40, -inf }
 0x5fe   : > { %v1018_v37 = vsel %vm716_vm2, %v1008_v36, -inf }
 0x5ff   : > { %1019 = vmax.xlane.f32.xlu1 %v1018_v37 }
 0x600   : > { %v1649_v41 = vpop.f32.mrb[20].mxu0 }
 0x601   : > { %1022 = vmax.xlane.f32.xlu0 %v1021_v42  ;;  %v992_v43 = vpop.f32.mrb[21].mxu0  ;;  %v1013_v51 = vmul.f32 0.25, %v1649_v41 }
 0x602   : > { %v1650_v44 = vpop.f32.mrb[22].mxu0  ;;  %v1011_v46 = vmul.f32 0.25, %v992_v43 }
 0x603   : > { %v995_v45 = vpop.f32.mrb[23].mxu0  ;;  %v1014_v28 = vmul.f32 0.25, %v1650_v44  ;;  %v1033_v54 = vsel %vm716_vm2, %v1013_v51, -inf }
 0x604   : > { %v2092_v47 = vmul.f32 0.25, %v995_v45  ;;  %v1027_v52 = vsel %vm716_vm2, %v1011_v46, -inf }
 0x605   : > { %1025 = vmax.xlane.f32.xlu0 %v1024_v50  ;;  %v1036_v53 = vsel %vm716_vm2, %v1014_v28, -inf }
 0x606   : > { %v1030_v21 = vsel %vm716_vm2, %v2092_v47, -inf }
 0x607   : > { %1031 = vmax.xlane.f32.xlu1 %v1030_v21 }
 0x609   : > { %1028 = vmax.xlane.f32.xlu0 %v1027_v52 }
 0x60b   : > { %1037 = vmax.xlane.f32.xlu1 %v1036_v53 }
 0x60d   : > { %1034 = vmax.xlane.f32.xlu0 %v1033_v54 }
 0x68a   : > { %v1017_v29 = vpop.xlane.xlu0 %1016 }
 0x68b   : > { %v1039_v55 = vsub.f32 %v1007_v32, %v1017_v29 }
 0x68c   : > { %v1020_v56 = vpop.xlane.xlu1 %1019 }
 0x68d   : > { %v1047_v58 = vmul.f32 1.442695, %v1039_v55  ;;  %v1040_v59 = vsub.f32 %v1008_v36, %v1020_v56 }
 0x68e   : > { %v1023_v38 = vpop.xlane.xlu0 %1022 }
 0x68f   : > { %v1041_v57 = vsub.f32 %v1009_v35, %v1023_v38  ;;  %v1049_v62 = vmul.f32 1.442695, %v1040_v59 }
 0x691   : > { %v1051_v60 = vmul.f32 1.442695, %v1041_v57 }
 0x692   : > { %v1026_v39 = vpop.xlane.xlu0 %1025 }
 0x693   : > { %1768 = vpow2.f32 %v1051_v60  ;;  %v1042_v61 = vsub.f32 %v1010_v40, %v1026_v39 }
 0x694   : > { %1770 = vpow2.f32 %v1047_v58  ;;  %v1032_v36 = vpop.xlane.xlu1 %1031 }
 0x695   : > { %v1053_v48 = vmul.f32 1.442695, %v1042_v61  ;;  %v1044_v40 = vsub.f32 %v2092_v47, %v1032_v36 }
 0x696   : > { %v1029_v63 = vpop.xlane.xlu0 %1028 }
 0x697   : > { %1772 = vpow2.f32 %v1053_v48  ;;  %v1043_v49 = vsub.f32 %v1011_v46, %v1029_v63  ;;  %v1057_v42 = vmul.f32 1.442695, %v1044_v40 }
 0x698   : > { %1774 = vpow2.f32 %v1049_v62  ;;  %v1038_v20 = vpop.xlane.xlu1 %1037 }
 0x699   : > { %v1055_v3 = vmul.f32 1.442695, %v1043_v49  ;;  %v1046_v37 = vsub.f32 %v1014_v28, %v1038_v20 }
 0x69a   : > { %v1035_v0 = vpop.xlane.xlu0 %1034 }
 0x69b   : > { %v1045_v1 = vsub.f32 %v1013_v51, %v1035_v0  ;;  %v1061_v41 = vmul.f32 1.442695, %v1046_v37 }
 0x69d   : > { %v2100_v2 = vpop.eup %1768  ;;  %v1059_v4 = vmul.f32 1.442695, %v1045_v1 }
 0x69e   : > { %v1069_v5 = vsel %vm716_vm2, %v2100_v2, 0.0  ;;  %v1771_v8 = vpop.eup %1770 }
 0x69f   : > { %1776 = vpow2.f32 %v1059_v4  ;;  %1070 = vadd.xlane.f32.xlu0 %v1069_v5  ;;  %v1063_v10 = vsel %vm716_vm2, %v1771_v8, 0.0 }
 0x6a0   : > { %1778 = vpow2.f32 %v1055_v3 }
 0x6a1   : > { %v2104_v9 = vpop.eup %1772  ;;  %1780 = vpow2.f32 %v1061_v41  ;;  %v1800_v41 = vld [vmem:[%s1882_s10 + $0x10] sm:$0xff] }
 0x6a2   : > { %v1072_v11 = vsel %vm716_vm2, %v2104_v9, 0.0  ;;  %v1775_v30 = vpop.eup %1774  ;;  %1782 = vpow2.f32 %v1057_v42 }
 0x6a3   : > { %1064 = vadd.xlane.f32.xlu0 %v1063_v10  ;;  %1073 = vadd.xlane.f32.xlu1 %v1072_v11  ;;  %v1066_v31 = vsel %vm716_vm2, %v1775_v30, 0.0 }
 0x6a7   : > { %1067 = vadd.xlane.f32.xlu1 %v1066_v31 }
 0x6a9   : > { %v2110_v32 = vpop.eup %1776 }
 0x6aa   : > { %v1081_v33 = vsel %vm716_vm2, %v2110_v32, 0.0  ;;  %v2114_v34 = vpop.eup %1778 }
 0x6ab   : > { %1082 = vadd.xlane.f32.xlu0 %v1081_v33  ;;  %v1075_v35 = vsel %vm716_vm2, %v2114_v34, 0.0  ;;  %v1781_v43 = vpop.eup %1780 }
 0x6ac   : > { %v1084_v44 = vsel %vm716_vm2, %v1781_v43, 0.0  ;;  %v1783_v45 = vpop.eup %1782 }
 0x6af   : > { %1076 = vadd.xlane.f32.xlu0 %v1075_v35 }
 0x6b8   : > { %1109 = vrot.lane.b32.xlu1 %v1969_v6, %s1820_s30  ;;  %v1078_v6 = vsel %vm716_vm2, %v1783_v45, 0.0 }
 0x6bc   : > { %1111 = vrot.lane.b32.xlu1 %v1979_v17, %s1820_s30 }
 0x6c5   : > { %1107 = vrot.lane.b32.xlu0 %v1971_v7, %s1820_s30  ;;  %v1718_v7 = vld [vmem:[%s2206_s6 + $0x8] sm:$0xff]  }
 0x6c6   : > { %1667 = vmatprep.subr.bf16.mxu1 %v1718_v7 }
 0x6c7   : > { %1668 = vmatpush3.bf16.msra.mxu1 %v1718_v7  ;;  %v1802_v7 = vld [vmem:[%s1882_s10 + $0x18] sm:$0xff] }
 0x6e0   : > { %1085 = vadd.xlane.f32.xlu1 %v1084_v44  ;;  %v1801_v44 = vld [vmem:[%s1882_s10] sm:$0xff] }
 0x6e4   : > { %1079 = vadd.xlane.f32.xlu1 %v1078_v6 }
 0x6f5   : > { %1113 = vrot.lane.b32.xlu1 %v1977_v16, %s1820_s30 }
 0x72c   : > { %v1071_v17 = vpop.xlane.xlu0 %1070 }
 0x730   : > { %v1065_v46 = vpop.xlane.xlu0 %1064  ;;  %v1074_v47 = vpop.xlane.xlu1 %1073 }
 0x731   : > { %1784 = vrcp.f32 %v1065_v46  ;;  %v1803_v46 = vld [vmem:[%s1882_s10 + $0x8] sm:$0xff] }
 0x734   : > { %v1068_v50 = vpop.xlane.xlu1 %1067 }
 0x735   : > { %1786 = vrcp.f32 %v1068_v50 }
 0x736   : > { %1788 = vrcp.f32 %v1074_v47 }
 0x737   : > { %1790 = vrcp.f32 %v1071_v17 }
 0x738   : > { %v1083_v28 = vpop.xlane.xlu0 %1082  ;;  %v1110_v53 = vpop.permute.xlu1 %1109 }
 0x73b   : > { %v1785_v51 = vpop.eup %1784 }
 0x73c   : > { %v1077_v21 = vpop.xlane.xlu0 %1076  ;;  %v1095_v29 = vmul.f32 %v1785_v51, %v1771_v8  ;;  %v1112_v56 = vpop.permute.xlu1 %1111 }
 0x73f   : > { %v1787_v52 = vpop.eup %1786 }
 0x740   : > { %v1108_v54 = vpop.permute.xlu0 %1107  ;;  %v1096_v16 = vmul.f32 %v1787_v52, %v1775_v30  ;;  %v1789_v57 = vpop.eup %1788 }
 0x741   : > { %1651 = vmatprep.subr.bf16.mxu0 %v1108_v54  ;;  %v1791_v59 = vpop.eup %1790  ;;  %v1098_v60 = vmul.f32 %v1789_v57, %v2104_v9 }
 0x742   : > { %1652 = vmatpush3.bf16.msra.mxu0 %v1108_v54  ;;  %v1103_v55 = vpack.c.bf16 %v1096_v16, %v1095_v29  ;;  %v1097_v61 = vmul.f32 %v1791_v59, %v2100_v2  ;;  %v1719_v2 = vld [vmem:[%s2206_s6] sm:$0xff]  }
 0x743   : > { %1653 = vmatprep.subr.bf16.mxu0 %v1110_v53  ;;  %1677 = vmatprep.subr.bf16.mxu1 %v1719_v2 }
 0x744   : > { %1659 = vmatprep.mubr.msk.bf16.mxu0 %vm716_vm2, %v1103_v55  ;;  %v1104_v62 = vpack.c.bf16 %v1098_v60, %v1097_v61 }
 0x746   : > { %1654 = vmatpush3.bf16.msra.mxu0 %v1110_v53 }
 0x747   : > { %1655 = vmatprep.subr.bf16.mxu0 %v1112_v56 }
 0x74a   : > { %1656 = vmatpush3.bf16.msra.mxu0 %v1112_v56  ;;  %v1804_v56 = vld [vmem:[%s1882_s10 + $0x30] sm:$0xff] }
 0x76d   : > { %v1086_v38 = vpop.xlane.xlu1 %1085 }
 0x76e   : > { %1792 = vrcp.f32 %v1086_v38 }
 0x76f   : > { %1794 = vrcp.f32 %v1077_v21 }
 0x770   : > { %1796 = vrcp.f32 %v1083_v28 }
 0x771   : > { %v1080_v58 = vpop.xlane.xlu1 %1079 }
 0x772   : > { %1798 = vrcp.f32 %v1080_v58  ;;  %v1805_v58 = vld [vmem:[%s1882_s10 + $0x20] sm:$0xff] }
 0x775   : > { %v1114_v39 = vpop.permute.xlu1 %1113 }
 0x776   : > { %1657 = vmatprep.subr.bf16.mxu0 %v1114_v39 }
 0x777   : > { %1658 = vmatpush3.bf16.msra.mxu0 %v1114_v39  ;;  %v1806_v39 = vld [vmem:[%s1882_s10 + $0x38] sm:$0xff] }
 0x778   : > { %v1793_v48 = vpop.eup %1792 }
 0x779   : > { %v1795_v63 = vpop.eup %1794  ;;  %v1102_v1 = vmul.f32 %v1793_v48, %v1781_v43 }
 0x77a   : > { %1660 = vmatmul.mubr.msk.bf16.vlgmr.msra.gmra.mrb[24].mxu0 %vm716_vm2, %v1104_v62  ;;  %v1797_v49 = vpop.eup %1796  ;;  %v1099_v3 = vmul.f32 %v1795_v63, %v2114_v34  ;;  %v1807_v62 = vld [vmem:[%s1882_s10 + $0x28] sm:$0xff] }
 0x77b   : > { %v1101_v5 = vmul.f32 %v1797_v49, %v2110_v32 }
 0x77c   : > { %v1799_v0 = vpop.eup %1798 }
 0x77d   : > { %v1100_v4 = vmul.f32 %v1799_v0, %v1783_v45  ;;  %v1106_v9 = vpack.c.bf16 %v1102_v1, %v1101_v5 }
 0x77f   : > { %v1105_v8 = vpack.c.bf16 %v1100_v4, %v1099_v3 }
 0x781   : > { %1663 = vmatprep.mubr.msk.bf16.mxu0 %vm716_vm2, %v1105_v8 }
 0x782   : > { %1664 = vmatmul.mubr.msk.bf16.gmra.mrb[28].mxu0 %vm716_vm2, %v1106_v9 }
 0x84d   : > { %v1661_v10 = vpop.f32.mrb[24].mxu0 }
 0x84e   : > { %v1165_v11 = vpop.f32.mrb[25].mxu0 }
 0x84f   : > { %v1662_v30 = vpop.f32.mrb[26].mxu0 }
 0x850   : > { %v1197_v31 = vpack.c.bf16 %v1662_v30, %v1661_v10  ;;  %v1168_v33 = vpop.f32.mrb[27].mxu0 }
 0x851   : > { %v1196_v34 = vpack.c.bf16 %v1168_v33, %v1165_v11 }
 0x853   : > { %1669 = vmatprep.mubr.msk.bf16.mxu1 %vm618_vm1, %v1196_v34 }
 0x854   : > { %1670 = vmatmul.mubr.msk.bf16.vlgmr.msra.gmra.mrb[8].mxu1 %vm618_vm1, %v1197_v31 }
 0x855   : > { %v1665_v32 = vpop.f32.mrb[28].mxu0  ;;  %1678 = vmatpush3.bf16.msra.mxu1 %v1719_v2 }
 0x856   : > { %v1181_v35 = vpop.f32.mrb[29].mxu0 }
 0x857   : > { %v1666_v36 = vpop.f32.mrb[30].mxu0 }
 0x858   : > { %v1199_v20 = vpack.c.bf16 %v1666_v36, %v1665_v32  ;;  %v1184_v37 = vpop.f32.mrb[31].mxu0 }
 0x859   : > { %v1198_v40 = vpack.c.bf16 %v1184_v37, %v1181_v35 }
 0x85b   : > { %1673 = vmatprep.mubr.msk.bf16.mxu1 %vm618_vm1, %v1198_v40 }
 0x85c   : > { %1674 = vmatmul.mubr.msk.bf16.gmra.mrb[12].mxu1 %vm618_vm1, %v1199_v20 }
 0x85d   : > { %1679 = vmatprep.mubr.msk.bf16.mxu1 %vm618_vm1, %v898_v19 }
 0x864   : > { %1680 = vmatmul.mubr.msk.bf16.vlgmr.msra.gmra.mrb[8].mxu1 %vm618_vm1, %v899_v15 }
 0x865   : > { %1683 = vmatprep.mubr.msk.bf16.mxu1 %vm618_vm1, %v900_v27 }
 0x86c   : > { %1684 = vmatmul.mubr.msk.bf16.gmra.mrb[12].mxu1 %vm618_vm1, %v901_v25 }
 0x937   : > { %v1681_v13 = vpop.f32.mrb[8].mxu1 }
 0x938   : > { %v1375_v15 = vadd.f32 %v1681_v13, %v1537_v12  ;;  %v1335_v18 = vpop.f32.mrb[9].mxu1 }
 0x939   : > { %v1373_v19 = vadd.f32 %v1537_v12, %v1335_v18  ;;  %v1682_v23 = vpop.f32.mrb[10].mxu1 }
 0x93a   : > { %v1390_v22 = vmul.f32 %v1538_v14, %v1375_v15  ;;  %v1376_v24 = vadd.f32 %v1682_v23, %v1537_v12  ;;  %v1338_v25 = vpop.f32.mrb[11].mxu1 }
 0x93b   : > { %v1388_v26 = vmul.f32 %v1538_v14, %v1373_v19  ;;  %v1374_v27 = vadd.f32 %v1537_v12, %v1338_v25 }
 0x93c   : > { %v1398_v42 = vadd.f32 %v1800_v41, %v1390_v22  ;;  %v1391_v43 = vmul.f32 %v1538_v14, %v1376_v24 }
 0x93d   : > { %v1396_v45 = vadd.f32 %v1801_v44, %v1388_v26  ;;  %v1389_v6 = vmul.f32 %v1538_v14, %v1374_v27 }
 0x93e   : > { %1406 = vst.msk [vmem:[%s2171_s21 + $0x10] sm:$0xff] %vm359_vm0, %v1398_v42  ;;  %v1399_v17 = vadd.f32 %v1802_v7, %v1391_v43 }
 0x93f   : > { %1404 = vst.msk [vmem:[%s2171_s21] sm:$0xff] %vm359_vm0, %v1396_v45  ;;  %v1397_v47 = vadd.f32 %v1803_v46, %v1389_v6  ;;  %v1685_v50 = vpop.f32.mrb[12].mxu1 }
 0x940   : > { %1407 = vst.msk [vmem:[%s2171_s21 + $0x18] sm:$0xff] %vm359_vm0, %v1399_v17  ;;  %v1379_v28 = vadd.f32 %v1685_v50, %v1537_v12  ;;  %v1351_v21 = vpop.f32.mrb[13].mxu1 }
 0x941   : > { %1405 = vst.msk [vmem:[%s2171_s21 + $0x8] sm:$0xff] %vm359_vm0, %v1397_v47  ;;  %v1377_v51 = vadd.f32 %v1537_v12, %v1351_v21  ;;  %v1686_v52 = vpop.f32.mrb[14].mxu1 }
 0x942   : > { %v1394_v53 = vmul.f32 %v1538_v14, %v1379_v28  ;;  %v1380_v54 = vadd.f32 %v1686_v52, %v1537_v12  ;;  %v1354_v29 = vpop.f32.mrb[15].mxu1 }
 0x943   : > { %v1392_v16 = vmul.f32 %v1538_v14, %v1377_v51  ;;  %v1378_v55 = vadd.f32 %v1537_v12, %v1354_v29 }
 0x944   : > { %v1402_v38 = vadd.f32 %v1804_v56, %v1394_v53  ;;  %v1395_v57 = vmul.f32 %v1538_v14, %v1380_v54 }
 0x945   : > { %v1400_v59 = vadd.f32 %v1805_v58, %v1392_v16  ;;  %v1393_v60 = vmul.f32 %v1538_v14, %v1378_v55 }
 0x946   : > { %1410 = vst.msk [vmem:[%s2171_s21 + $0x30] sm:$0xff] %vm359_vm0, %v1402_v38  ;;  %v1403_v61 = vadd.f32 %v1806_v39, %v1395_v57 }
 0x947   : > { %1408 = vst.msk [vmem:[%s2171_s21 + $0x20] sm:$0xff] %vm359_vm0, %v1400_v59  ;;  %v1401_v48 = vadd.f32 %v1807_v62, %v1393_v60 }
 0x948   : > { %1411 = vst.msk [vmem:[%s2171_s21 + $0x38] sm:$0xff] %vm359_vm0, %v1403_v61 }
 0x949   : > { %1409 = vst.msk [vmem:[%s2171_s21 + $0x28] sm:$0xff] %vm359_vm0, %v1401_v48 }
 0x94a PF: > { %s18_s27 = sadd.s32 1, %s1814_s27  }
 0x94b   : > { %p15_p4 = scmp.ge.s32.totalorder %s18_s27, 4  }
 0x94d   :  { %17 = sbr.rel (!%p15_p4) target bundleno = 1 (0x1), region = 91 }

// kernel: tracing_transformer_wrapper_forward.11
= control target key start
LH: loop header
LB: loop body
LE: loop exit
PB: predicated region body
PF: predicated region fallthrough
CT: control target
= control target key end

     0   :  { %s1111_s27 = smov 0   ;;  %s1343_s0 = inlined_call_operand.vmem [shape: f32[2,64,32], index: 0, kind: input, shape index: {}]   ;;  %s1344_s1 = inlined_call_operand.vmem [shape: f32[2,1,32], index: 1, kind: input, shape index: {}]   ;;  %s1345_s2 = inlined_call_operand.vmem [shape: f32[2,1,32], index: 2, kind: input, shape index: {}]   ;;  %s1346_s3 = inlined_call_operand.vmem [shape: f32[2,1,32], index: 3, kind: input, shape index: {}]   ;;  %s1347_s4 = inlined_call_operand.vmem [shape: bf16[32,128], index: 4, kind: input, shape index: {}]   ;;  %s1348_s5 = inlined_call_operand.vmem [shape: f32[1,128], index: 5, kind: input, shape index: {}]   ;;  %s1349_s6 = inlined_call_operand.vmem [shape: bf16[128,32], index: 6, kind: input, shape index: {}]   ;;  %s1350_s7 = inlined_call_operand.vmem [shape: f32[1,32], index: 7, kind: input, shape index: {}]   ;;  %s1351_s8 = inlined_call_operand.vmem [shape: f32[2,64,32], index: 8, kind: output, shape index: {}]  }
   0x1 LB: > { %s923_s28 = sadd.s32 4294967295, %s1064_s27   ;;  %p927_p0 = scmp.ge.s32.totalorder %s1064_s27, 1  ;;  %s1064_s27 = sphi %s1111_s27, %s18_s27  }
   0x2   : > { %p286_p1 = scmp.lt.s32.totalorder %s1064_s27, 3 }
   0x4   : > { %p287_p2 = pnand %p927_p0, %p286_p1 }
   0x5   : > { %p329_p3 = scmp.lt.s32.totalorder (!%p287_p2), %s923_s28, 1  ;;  %vm359_vm0 = vcmask (!%p287_p2), 261120   ;;  %v1016_v56 = vld [vmem:[%s1347_s4] sm:$0xff] (!%p287_p2)   ;;  %v1017_v57 = vld [vmem:[%s1347_s4 + $0x8] sm:$0xff] (!%p287_p2)   ;;  %v467_v63 = vlaneseq (!%p287_p2) }
   0x6   : > { %290 = sbr.rel (%p287_p2) target bundleno = 815 (0x32f), region = 52  ;;  %972 = vmatprep.subr.bf16.mxu0 (!%p287_p2), %v1016_v56 }
   0x7   : > { %973 = vmatpush3.bf16.msra.mxu0 (!%p287_p2), %v1016_v56 }
   0x8   : > { %974 = vmatprep.subr.bf16.mxu0 (!%p287_p2), %v1017_v57 }
   0xb   : > { %975 = vmatpush3.bf16.msra.mxu0 (!%p287_p2), %v1017_v57 }
   0xd   : > { %s1353_s28 = smov (!%p329_p3, %s923_s28), 1 }
   0xe   : > { %s952_s29 = sshll.u32 %s1353_s28, 6  ;;  %s336_s17 = scalar_lea.vmem %s1344_s1, %s1353_s28 }
   0xf   : > { %s333_s10 = scalar_lea.vmem %s1343_s0, %s952_s29  ;;  %s339_s20 = scalar_lea.vmem %s1345_s2, %s1353_s28 }
  0x10   : > { %v1127_v0 = vld [vmem:[%s333_s10] sm:$0xff]  ;;  %v1129_v1 = vld [vmem:[%s333_s10 + $0x10] sm:$0xff]  ;;  %v1131_v2 = vld [vmem:[%s333_s10 + $0x8] sm:$0xff]  ;;  %s342_s22 = scalar_lea.vmem %s1346_s3, %s1353_s28  ;;  %s1314_s30 = scalar_lea.vmem %s1351_s8, %s952_s29 }
  0x11   : > { %v360_v3 = vsel %vm359_vm0, %v1127_v0, 0.0  ;;  %v366_v4 = vsel %vm359_vm0, %v1129_v1, 0.0  ;;  %v1137_v5 = vld [vmem:[%s333_s10 + $0x18] sm:$0xff]  ;;  %v363_v6 = vsel %vm359_vm0, %v1131_v2, 0.0  ;;  %v1141_v7 = vld [vmem:[%s333_s10 + $0x20] sm:$0xff]  ;;  %v1145_v9 = vld [vmem:[%s333_s10 + $0x28] sm:$0xff] }
  0x12   : > { %361 = vadd.xlane.f32.xlu0 %v360_v3  ;;  %367 = vadd.xlane.f32.xlu1 %v366_v4  ;;  %v369_v8 = vsel %vm359_vm0, %v1137_v5, 0.0  ;;  %v372_v10 = vsel %vm359_vm0, %v1141_v7, 0.0  ;;  %v375_v11 = vsel %vm359_vm0, %v1145_v9, 0.0  ;;  %v1151_v12 = vld [vmem:[%s333_s10 + $0x30] sm:$0xff]  ;;  %v1153_v13 = vld [vmem:[%s333_s10 + $0x38] sm:$0xff] }
  0x13   : > { %v378_v14 = vsel %vm359_vm0, %v1151_v12, 0.0  ;;  %v381_v15 = vsel %vm359_vm0, %v1153_v13, 0.0 }
  0x16   : > { %364 = vadd.xlane.f32.xlu0 %v363_v6  ;;  %370 = vadd.xlane.f32.xlu1 %v369_v8 }
  0x1a   : > { %373 = vadd.xlane.f32.xlu0 %v372_v10  ;;  %376 = vadd.xlane.f32.xlu1 %v375_v11 }
  0x1e   : > { %379 = vadd.xlane.f32.xlu0 %v378_v14  ;;  %382 = vadd.xlane.f32.xlu1 %v381_v15  ;;  %v468_v14 = vshrl.u32 %v467_v63, 7  ;;  %v357_v15 = vld [vmem:[%s336_s17] sm:$0x1] }
  0x9f   : > { %v362_v16 = vpop.xlane.xlu0 %361  ;;  %v368_v17 = vpop.xlane.xlu1 %367 }
  0xa0   : > { %v385_v18 = vmul.f32 0.03125, %v362_v16  ;;  %v387_v19 = vmul.f32 0.03125, %v368_v17 }
  0xa2   : > { %v1160_v20 = vsub.f32 %v1127_v0, %v385_v18  ;;  %v1163_v21 = vsub.f32 %v1129_v1, %v387_v19 }
  0xa3   : > { %v365_v22 = vpop.xlane.xlu0 %364  ;;  %v371_v23 = vpop.xlane.xlu1 %370 }
  0xa4   : > { %v386_v24 = vmul.f32 0.03125, %v365_v22  ;;  %v388_v25 = vmul.f32 0.03125, %v371_v23  ;;  %v401_v26 = vmul.f32 %v1160_v20, %v1160_v20  ;;  %v403_v27 = vmul.f32 %v1163_v21, %v1163_v21 }
  0xa5   : > { %v465_v22 = vadd.f32 1.0, %v357_v15  ;;  %v1020_v15 = vld [vmem:[%s1349_s6 + $0x10] sm:$0xff]  }
  0xa6   : > { %v1170_v28 = vsub.f32 %v1131_v2, %v386_v24  ;;  %v1173_v29 = vsub.f32 %v1137_v5, %v388_v25  ;;  %v409_v30 = vsel %vm359_vm0, %v401_v26, 0.0  ;;  %v415_v33 = vsel %vm359_vm0, %v403_v27, 0.0 }
  0xa7   : > { %410 = vadd.xlane.f32.xlu0 %v409_v30  ;;  %v374_v31 = vpop.xlane.xlu0 %373  ;;  %v377_v32 = vpop.xlane.xlu1 %376  ;;  %v469_v25 = vsub.s32 0, %v468_v14 }
  0xa8   : > { %v389_v34 = vmul.f32 0.03125, %v374_v31  ;;  %v390_v35 = vmul.f32 0.03125, %v377_v32  ;;  %v402_v36 = vmul.f32 %v1170_v28, %v1170_v28  ;;  %v404_v37 = vmul.f32 %v1173_v29, %v1173_v29 }
  0xaa   : > { %v1182_v38 = vsub.f32 %v1141_v7, %v389_v34  ;;  %v1185_v39 = vsub.f32 %v1145_v9, %v390_v35  ;;  %v412_v40 = vsel %vm359_vm0, %v402_v36, 0.0  ;;  %v418_v43 = vsel %vm359_vm0, %v404_v37, 0.0 }
  0xab   : > { %416 = vadd.xlane.f32.xlu0 %v415_v33  ;;  %413 = vadd.xlane.f32.xlu1 %v412_v40  ;;  %v380_v41 = vpop.xlane.xlu0 %379  ;;  %v383_v42 = vpop.xlane.xlu1 %382  ;;  %v470_v35 = vrot.slane %v465_v22, %v469_v25  ;;  %v1025_v22 = vld [vmem:[%s1349_s6 + $0x38] sm:$0xff]  }
  0xac   : > { %v391_v44 = vmul.f32 0.03125, %v380_v41  ;;  %v392_v45 = vmul.f32 0.03125, %v383_v42  ;;  %v405_v46 = vmul.f32 %v1182_v38, %v1182_v38  ;;  %v406_v47 = vmul.f32 %v1185_v39, %v1185_v39 }
  0xae   : > { %v1194_v48 = vsub.f32 %v1151_v12, %v391_v44  ;;  %v1197_v49 = vsub.f32 %v1153_v13, %v392_v45  ;;  %v421_v50 = vsel %vm359_vm0, %v405_v46, 0.0  ;;  %v424_v51 = vsel %vm359_vm0, %v406_v47, 0.0  ;;  %v932_v45 = vld [vmem:[%s339_s20] ss:$0 sm:$0xff] }
  0xaf   : > { %419 = vadd.xlane.f32.xlu1 %v418_v43  ;;  %422 = vadd.xlane.f32.xlu0 %v421_v50 }
  0xb0   : > { %v407_v52 = vmul.f32 %v1194_v48, %v1194_v48  ;;  %v408_v53 = vmul.f32 %v1197_v49, %v1197_v49 }
  0xb2   : > { %v427_v54 = vsel %vm359_vm0, %v407_v52, 0.0  ;;  %v430_v55 = vsel %vm359_vm0, %v408_v53, 0.0 }
  0xb3   : > { %425 = vadd.xlane.f32.xlu1 %v424_v51  ;;  %428 = vadd.xlane.f32.xlu0 %v427_v54 }
  0xb7   : > { %431 = vadd.xlane.f32.xlu1 %v430_v55 }
 0x134   : > { %v411_v58 = vpop.xlane.xlu0 %410 }
 0x135   : > { %v433_v59 = vmul.f32 0.03125, %v411_v58 }
 0x137   : > { %v441_v60 = vadd.f32 1e-06, %v433_v59 }
 0x138   : > { %v414_v61 = vpop.xlane.xlu1 %413  ;;  %v417_v62 = vpop.xlane.xlu0 %416 }
 0x139   : > { %1026 = vrsqrt.f32 %v441_v60  ;;  %v434_v3 = vmul.f32 0.03125, %v414_v61  ;;  %v435_v4 = vmul.f32 0.03125, %v417_v62 }
 0x13b   : > { %v442_v6 = vadd.f32 1e-06, %v434_v3  ;;  %v443_v8 = vadd.f32 1e-06, %v435_v4 }
 0x13c   : > { %v420_v10 = vpop.xlane.xlu1 %419  ;;  %v423_v11 = vpop.xlane.xlu0 %422 }
 0x13d   : > { %1028 = vrsqrt.f32 %v442_v6  ;;  %v436_v16 = vmul.f32 0.03125, %v420_v10  ;;  %v437_v17 = vmul.f32 0.03125, %v423_v11 }
 0x13e   : > { %1030 = vrsqrt.f32 %v443_v8 }
 0x13f   : > { %v444_v18 = vadd.f32 1e-06, %v436_v16  ;;  %v445_v19 = vadd.f32 1e-06, %v437_v17  ;;  %v1021_v16 = vld [vmem:[%s1349_s6 + $0x18] sm:$0xff]   ;;  %v1022_v17 = vld [vmem:[%s1349_s6 + $0x20] sm:$0xff]  }
 0x140   : > { %v426_v23 = vpop.xlane.xlu1 %425  ;;  %v429_v24 = vpop.xlane.xlu0 %428 }
 0x141   : > { %1032 = vrsqrt.f32 %v444_v18  ;;  %v438_v26 = vmul.f32 0.03125, %v426_v23  ;;  %v439_v27 = vmul.f32 0.03125, %v429_v24  ;;  %v1023_v18 = vld [vmem:[%s1349_s6 + $0x28] sm:$0xff]   ;;  %v933_v23 = vld [vmem:[%s1348_s5] ss:$0 sm:$0xff] }
 0x142   : > { %1034 = vrsqrt.f32 %v445_v19  ;;  %v1024_v19 = vld [vmem:[%s1349_s6 + $0x30] sm:$0xff]  }
 0x143   : > { %v1027_v30 = vpop.eup %1026  ;;  %v446_v31 = vadd.f32 1e-06, %v438_v26  ;;  %v447_v32 = vadd.f32 1e-06, %v439_v27 }
 0x144   : > { %v432_v33 = vpop.xlane.xlu1 %431  ;;  %v457_v34 = vmul.f32 %v1027_v30, %v1160_v20 }
 0x145   : > { %1036 = vrsqrt.f32 %v446_v31  ;;  %v440_v36 = vmul.f32 0.03125, %v432_v33 }
 0x146   : > { %1038 = vrsqrt.f32 %v447_v32  ;;  %v472_v43 = vmul.f32 %v470_v35, %v457_v34 }
 0x147   : > { %v1029_v37 = vpop.eup %1028  ;;  %v448_v40 = vadd.f32 1e-06, %v440_v36 }
 0x148   : > { %v1031_v41 = vpop.eup %1030  ;;  %v458_v42 = vmul.f32 %v1029_v37, %v1170_v28  ;;  %v486_v51 = vadd.f32 %v932_v45, %v472_v43 }
 0x149   : > { %v459_v44 = vmul.f32 %v1031_v41, %v1163_v21  ;;  %1040 = vrsqrt.f32 %v448_v40 }
 0x14a   : > { %v473_v46 = vmul.f32 %v470_v35, %v458_v42 }
 0x14b   : > { %v1033_v20 = vpop.eup %1032  ;;  %v474_v53 = vmul.f32 %v470_v35, %v459_v44 }
 0x14c   : > { %v1035_v47 = vpop.eup %1034  ;;  %v460_v50 = vmul.f32 %v1033_v20, %v1173_v29  ;;  %v487_v52 = vadd.f32 %v932_v45, %v473_v46 }
 0x14d   : > { %v461_v54 = vmul.f32 %v1035_v47, %v1182_v38  ;;  %v488_v21 = vadd.f32 %v932_v45, %v474_v53 }
 0x14e   : > { %v494_v55 = vpack.c.bf16 %v487_v52, %v486_v51  ;;  %v475_v56 = vmul.f32 %v470_v35, %v460_v50 }
 0x14f   : > { %v1037_v57 = vpop.eup %1036  ;;  %v476_v60 = vmul.f32 %v470_v35, %v461_v54 }
 0x150   : > { %v1039_v58 = vpop.eup %1038  ;;  %v462_v28 = vmul.f32 %v1037_v57, %v1185_v39  ;;  %976 = vmatprep.mubr.msk.bf16.mxu0 %vm359_vm0, %v494_v55  ;;  %v489_v59 = vadd.f32 %v932_v45, %v475_v56 }
 0x151   : > { %v463_v61 = vmul.f32 %v1039_v58, %v1194_v48  ;;  %v490_v38 = vadd.f32 %v932_v45, %v476_v60  ;;  %v1018_v48 = vld [vmem:[%s1349_s6] sm:$0xff]  }
 0x152   : > { %v495_v62 = vpack.c.bf16 %v489_v59, %v488_v21  ;;  %v477_v29 = vmul.f32 %v470_v35, %v462_v28  ;;  %984 = vmatprep.subr.bf16.mxu1 %v1018_v48 }
 0x153   : > { %v1041_v63 = vpop.eup %1040  ;;  %v478_v6 = vmul.f32 %v470_v35, %v463_v61  ;;  %985 = vmatpush3.bf16.msra.mxu1 %v1018_v48 }
 0x154   : > { %v464_v3 = vmul.f32 %v1041_v63, %v1197_v49  ;;  %977 = vmatmul.mubr.msk.bf16.vlgmr.msra.gmra.mrb[0].mxu0 %vm359_vm0, %v495_v62  ;;  %v491_v4 = vadd.f32 %v932_v45, %v477_v29  ;;  %v1019_v49 = vld [vmem:[%s1349_s6 + $0x8] sm:$0xff]  }
 0x155   : > { %v492_v39 = vadd.f32 %v932_v45, %v478_v6  ;;  %986 = vmatprep.subr.bf16.mxu1 %v1019_v49 }
 0x156   : > { %v496_v8 = vpack.c.bf16 %v491_v4, %v490_v38  ;;  %v479_v10 = vmul.f32 %v470_v35, %v464_v3 }
 0x157   : > { %987 = vmatpush3.bf16.msra.mxu1 %v1019_v49 }
 0x158   : > { %980 = vmatprep.mubr.msk.bf16.mxu0 %vm359_vm0, %v496_v8  ;;  %v493_v11 = vadd.f32 %v932_v45, %v479_v10  ;;  %988 = vmatprep.subr.bf16.mxu1 %v1020_v15 }
 0x15a   : > { %v497_v14 = vpack.c.bf16 %v493_v11, %v492_v39 }
 0x15b   : > { %989 = vmatpush3.bf16.msra.mxu1 %v1020_v15 }
 0x15c   : > { %981 = vmatmul.mubr.msk.bf16.gmra.mrb[4].mxu0 %vm359_vm0, %v497_v14  ;;  %990 = vmatprep.subr.bf16.mxu1 %v1021_v16 }
 0x15f   : > { %991 = vmatpush3.bf16.msra.mxu1 %v1021_v16 }
 0x160   : > { %992 = vmatprep.subr.bf16.mxu1 %v1022_v17 }
 0x163   : > { %993 = vmatpush3.bf16.msra.mxu1 %v1022_v17 }
 0x164   : > { %994 = vmatprep.subr.bf16.mxu1 %v1023_v18 }
 0x167   : > { %995 = vmatpush3.bf16.msra.mxu1 %v1023_v18 }
 0x168   : > { %996 = vmatprep.subr.bf16.mxu1 %v1024_v19 }
 0x16b   : > { %997 = vmatpush3.bf16.msra.mxu1 %v1024_v19 }
 0x16c   : > { %998 = vmatprep.subr.bf16.mxu1 %v1025_v22 }
 0x16f   : > { %999 = vmatpush3.bf16.msra.mxu1 %v1025_v22 }
 0x227   : > { %v978_v24 = vpop.f32.mrb[0].mxu0 }
 0x228   : > { %v1260_v25 = vadd.f32 %v978_v24, %v933_v23  ;;  %v567_v26 = vpop.f32.mrb[1].mxu0 }
 0x229   : > { %v1262_v27 = vadd.f32 %v933_v23, %v567_v26  ;;  %v979_v30 = vpop.f32.mrb[2].mxu0 }
 0x22a   : > { %v608_v31 = vmul.f32 0.044715, %v1260_v25  ;;  %v1265_v32 = vadd.f32 %v979_v30, %v933_v23  ;;  %v570_v33 = vpop.f32.mrb[3].mxu0 }
 0x22b   : > { %v606_v34 = vmul.f32 0.044715, %v1262_v27  ;;  %v1268_v35 = vadd.f32 %v933_v23, %v570_v33 }
 0x22c   : > { %v616_v36 = vmul.f32 %v608_v31, %v1260_v25  ;;  %v609_v37 = vmul.f32 0.044715, %v1265_v32 }
 0x22d   : > { %v607_v40 = vmul.f32 0.044715, %v1268_v35  ;;  %v614_v41 = vmul.f32 %v606_v34, %v1262_v27 }
 0x22e   : > { %v624_v42 = vmul.f32 %v616_v36, %v1260_v25  ;;  %v617_v43 = vmul.f32 %v609_v37, %v1265_v32  ;;  %v600_v36 = vmul.f32 0.5, %v1260_v25  ;;  %v601_v37 = vmul.f32 0.5, %v1265_v32 }
 0x22f   : > { %v982_v44 = vpop.f32.mrb[4].mxu0  ;;  %v615_v45 = vmul.f32 %v607_v40, %v1268_v35  ;;  %v622_v46 = vmul.f32 %v614_v41, %v1262_v27  ;;  %v598_v41 = vmul.f32 0.5, %v1262_v27 }
 0x230   : > { %v625_v20 = vmul.f32 %v617_v43, %v1265_v32  ;;  %v1279_v47 = vadd.f32 %v982_v44, %v933_v23  ;;  %v583_v50 = vpop.f32.mrb[5].mxu0  ;;  %v632_v51 = vadd.f32 %v624_v42, %v1260_v25  ;;  %v599_v42 = vmul.f32 0.5, %v1268_v35 }
 0x231   : > { %v1282_v52 = vadd.f32 %v933_v23, %v583_v50  ;;  %v983_v53 = vpop.f32.mrb[6].mxu0  ;;  %v623_v54 = vmul.f32 %v615_v45, %v1268_v35  ;;  %v630_v55 = vadd.f32 %v622_v46, %v1262_v27 }
 0x232   : > { %v612_v56 = vmul.f32 0.044715, %v1279_v47  ;;  %v595_v57 = vadd.f32 %v983_v53, %v933_v23  ;;  %v586_v58 = vpop.f32.mrb[7].mxu0  ;;  %v633_v28 = vadd.f32 %v625_v20, %v1265_v32  ;;  %v640_v21 = vmul.f32 0.7978846, %v632_v51 }
 0x233   : > { %v610_v59 = vmul.f32 0.044715, %v1282_v52  ;;  %v587_v60 = vadd.f32 %v933_v23, %v586_v58  ;;  %v631_v61 = vadd.f32 %v623_v54, %v1268_v35  ;;  %v638_v62 = vmul.f32 0.7978846, %v630_v55 }
 0x234   : > { %v620_v29 = vmul.f32 %v612_v56, %v1279_v47  ;;  %v613_v63 = vmul.f32 0.044715, %v595_v57  ;;  %v641_v3 = vmul.f32 0.7978846, %v633_v28  ;;  %1042 = vtanh.f32 %v640_v21 }
 0x235   : > { %v618_v38 = vmul.f32 %v610_v59, %v1282_v52  ;;  %v611_v4 = vmul.f32 0.044715, %v587_v60  ;;  %v639_v6 = vmul.f32 0.7978846, %v631_v61  ;;  %1044 = vtanh.f32 %v638_v62 }
 0x236   : > { %v628_v8 = vmul.f32 %v620_v29, %v1279_v47  ;;  %v621_v10 = vmul.f32 %v613_v63, %v595_v57  ;;  %1046 = vtanh.f32 %v641_v3  ;;  %v604_v27 = vmul.f32 0.5, %v1279_v47 }
 0x237   : > { %v626_v39 = vmul.f32 %v618_v38, %v1282_v52  ;;  %v619_v11 = vmul.f32 %v611_v4, %v587_v60  ;;  %1048 = vtanh.f32 %v639_v6  ;;  %v605_v32 = vmul.f32 0.5, %v595_v57 }
 0x238   : > { %v629_v14 = vmul.f32 %v621_v10, %v595_v57  ;;  %v636_v48 = vadd.f32 %v628_v8, %v1279_v47  ;;  %v602_v28 = vmul.f32 0.5, %v1282_v52  ;;  %v603_v21 = vmul.f32 0.5, %v587_v60  ;;  %v940_v47 = vld [vmem:[%s1350_s7] ss:$0 sm:$0xff] }
 0x239   : > { %v627_v49 = vmul.f32 %v619_v11, %v587_v60  ;;  %v634_v15 = vadd.f32 %v626_v39, %v1282_v52 }
 0x23a   : > { %v637_v16 = vadd.f32 %v629_v14, %v595_v57  ;;  %v644_v17 = vmul.f32 0.7978846, %v636_v48  ;;  %v949_v57 = vld [vmem:[%s342_s22] ss:$0 sm:$0xff] }
 0x23b   : > { %v635_v18 = vadd.f32 %v627_v49, %v587_v60  ;;  %v642_v19 = vmul.f32 0.7978846, %v634_v15 }
 0x23c   : > { %v645_v22 = vmul.f32 0.7978846, %v637_v16  ;;  %1050 = vtanh.f32 %v644_v17 }
 0x23d   : > { %v643_v23 = vmul.f32 0.7978846, %v635_v18  ;;  %1052 = vtanh.f32 %v642_v19 }
 0x23e   : > { %v1043_v24 = vpop.eup %1042  ;;  %1054 = vtanh.f32 %v645_v22 }
 0x23f   : > { %v1045_v26 = vpop.eup %1044  ;;  %v656_v30 = vadd.f32 1.0, %v1043_v24  ;;  %1056 = vtanh.f32 %v643_v23 }
 0x240   : > { %v1047_v31 = vpop.eup %1046  ;;  %v654_v33 = vadd.f32 1.0, %v1045_v26 }
 0x241   : > { %v1049_v34 = vpop.eup %1048  ;;  %v657_v40 = vadd.f32 1.0, %v1047_v31  ;;  %v664_v44 = vmul.f32 %v656_v30, %v600_v36 }
 0x242   : > { %v655_v43 = vadd.f32 1.0, %v1049_v34  ;;  %v662_v46 = vmul.f32 %v654_v33, %v598_v41 }
 0x243   : > { %v665_v45 = vmul.f32 %v657_v40, %v601_v37 }
 0x244   : > { %v663_v20 = vmul.f32 %v655_v43, %v599_v42 }
 0x245   : > { %v671_v50 = vpack.c.bf16 %v665_v45, %v664_v44 }
 0x246   : > { %v1051_v51 = vpop.eup %1050  ;;  %v670_v53 = vpack.c.bf16 %v663_v20, %v662_v46 }
 0x247   : > { %v1053_v54 = vpop.eup %1052  ;;  %v660_v55 = vadd.f32 1.0, %v1051_v51 }
 0x248   : > { %v1055_v56 = vpop.eup %1054  ;;  %1000 = vmatprep.mubr.bf16.mxu1 %v670_v53  ;;  %v658_v25 = vadd.f32 1.0, %v1053_v54 }
 0x249   : > { %v1057_v58 = vpop.eup %1056  ;;  %1001 = vmatmul.mubr.bf16.vlgmr.msra.gmra.mrb[0].mxu1 %v671_v50  ;;  %v661_v35 = vadd.f32 1.0, %v1055_v56  ;;  %v668_v61 = vmul.f32 %v660_v55, %v604_v27 }
 0x24a   : > { %v659_v59 = vadd.f32 1.0, %v1057_v58  ;;  %v666_v29 = vmul.f32 %v658_v25, %v602_v28 }
 0x24b   : > { %v669_v62 = vmul.f32 %v661_v35, %v605_v32 }
 0x24c   : > { %v667_v63 = vmul.f32 %v659_v59, %v603_v21 }
 0x24d   : > { %v673_v3 = vpack.c.bf16 %v669_v62, %v668_v61 }
 0x24e   : > { %v672_v38 = vpack.c.bf16 %v667_v63, %v666_v29 }
 0x250   : > { %1004 = vmatprep.mubr.bf16.mxu1 %v672_v38 }
 0x251   : > { %1005 = vmatmul.mubr.bf16.gmra.mrb[4].mxu1 %v673_v3 }
 0x31c   : > { %v1002_v52 = vpop.f32.mrb[0].mxu1 }
 0x31d   : > { %v788_v60 = vadd.f32 %v1002_v52, %v940_v47  ;;  %v779_v4 = vpop.f32.mrb[1].mxu1 }
 0x31e   : > { %v780_v6 = vadd.f32 %v940_v47, %v779_v4  ;;  %v1003_v8 = vpop.f32.mrb[2].mxu1 }
 0x31f   : > { %v819_v10 = vmul.f32 %v949_v57, %v788_v60  ;;  %v791_v39 = vadd.f32 %v1003_v8, %v940_v47  ;;  %v782_v11 = vpop.f32.mrb[3].mxu1 }
 0x320   : > { %v817_v14 = vmul.f32 %v949_v57, %v780_v6  ;;  %v783_v48 = vadd.f32 %v940_v47, %v782_v11 }
 0x321   : > { %v827_v49 = vadd.f32 %v819_v10, %v1129_v1  ;;  %v820_v15 = vmul.f32 %v949_v57, %v791_v39 }
 0x322   : > { %v825_v16 = vadd.f32 %v817_v14, %v1127_v0  ;;  %v818_v17 = vmul.f32 %v949_v57, %v783_v48 }
 0x323   : > { %835 = vst.msk [vmem:[%s1314_s30 + $0x10] sm:$0xff] %vm359_vm0, %v827_v49  ;;  %v828_v18 = vadd.f32 %v820_v15, %v1137_v5 }
 0x324   : > { %833 = vst.msk [vmem:[%s1314_s30] sm:$0xff] %vm359_vm0, %v825_v16  ;;  %v826_v19 = vadd.f32 %v818_v17, %v1131_v2  ;;  %v1006_v22 = vpop.f32.mrb[4].mxu1 }
 0x325   : > { %836 = vst.msk [vmem:[%s1314_s30 + $0x18] sm:$0xff] %vm359_vm0, %v828_v18  ;;  %v804_v23 = vadd.f32 %v1006_v22, %v940_v47  ;;  %v795_v24 = vpop.f32.mrb[5].mxu1 }
 0x326   : > { %834 = vst.msk [vmem:[%s1314_s30 + $0x8] sm:$0xff] %vm359_vm0, %v826_v19  ;;  %v796_v0 = vadd.f32 %v940_v47, %v795_v24  ;;  %v1007_v1 = vpop.f32.mrb[6].mxu1 }
 0x327   : > { %v823_v26 = vmul.f32 %v949_v57, %v804_v23  ;;  %v807_v30 = vadd.f32 %v1007_v1, %v940_v47  ;;  %v798_v5 = vpop.f32.mrb[7].mxu1 }
 0x328   : > { %v821_v31 = vmul.f32 %v949_v57, %v796_v0  ;;  %v799_v33 = vadd.f32 %v940_v47, %v798_v5 }
 0x329   : > { %v831_v2 = vadd.f32 %v823_v26, %v1151_v12  ;;  %v824_v34 = vmul.f32 %v949_v57, %v807_v30 }
 0x32a   : > { %v829_v36 = vadd.f32 %v821_v31, %v1141_v7  ;;  %v822_v37 = vmul.f32 %v949_v57, %v799_v33 }
 0x32b   : > { %839 = vst.msk [vmem:[%s1314_s30 + $0x30] sm:$0xff] %vm359_vm0, %v831_v2  ;;  %v832_v40 = vadd.f32 %v824_v34, %v1153_v13 }
 0x32c   : > { %837 = vst.msk [vmem:[%s1314_s30 + $0x20] sm:$0xff] %vm359_vm0, %v829_v36  ;;  %v830_v41 = vadd.f32 %v822_v37, %v1145_v9 }
 0x32d   : > { %840 = vst.msk [vmem:[%s1314_s30 + $0x38] sm:$0xff] %vm359_vm0, %v832_v40 }
 0x32e   : > { %838 = vst.msk [vmem:[%s1314_s30 + $0x28] sm:$0xff] %vm359_vm0, %v830_v41 }
 0x32f PF: > { %s18_s27 = sadd.s32 1, %s1064_s27  }
 0x330   : > { %p15_p4 = scmp.ge.s32.totalorder %s18_s27, 4  }
 0x332   :  { %17 = sbr.rel (!%p15_p4) target bundleno = 1 (0x1), region = 91 }

// kernel: tracing_transformer_wrapper_forward.10
= control target key start
LH: loop header
LB: loop body
LE: loop exit
PB: predicated region body
PF: predicated region fallthrough
CT: control target
= control target key end

     0   :  { %s1730_s30 = smov 0   ;;  %s2051_s0 = inlined_call_operand.vmem [shape: f32[2,64,32], index: 0, kind: input, shape index: {}]   ;;  %s2052_s1 = inlined_call_operand.vmem [shape: bf16[2,8,32], index: 1, kind: input, shape index: {}]   ;;  %s2053_s2 = inlined_call_operand.vmem [shape: f32[2,1,8], index: 2, kind: input, shape index: {}]   ;;  %s2054_s3 = inlined_call_operand.vmem [shape: bf16[32,32], index: 3, kind: input, shape index: {}]   ;;  %s2055_s4 = inlined_call_operand.vmem [shape: f32[1,32], index: 4, kind: input, shape index: {}]   ;;  %s2056_s5 = inlined_call_operand.vmem [shape: bf16[32,64], index: 5, kind: input, shape index: {}]   ;;  %s2057_s6 = inlined_call_operand.vmem [shape: f32[1,64], index: 6, kind: input, shape index: {}]   ;;  %s2058_s7 = inlined_call_operand.vmem [shape: bf16[32,32], index: 7, kind: input, shape index: {}]   ;;  %s2059_s8 = inlined_call_operand.vmem [shape: f32[1,32], index: 8, kind: input, shape index: {}]   ;;  %s2060_s9 = inlined_call_operand.vmem [shape: f32[2,64,32], index: 9, kind: output, shape index: {}]  }
   0x1 LB: > { %s1400_s10 = sadd.s32 4294967295, %s1673_s30   ;;  %p1404_p0 = scmp.ge.s32.totalorder %s1673_s30, 1  ;;  %s1673_s30 = sphi %s1730_s30, %s19_s30  }
   0x2   : > { %p304_p1 = scmp.lt.s32.totalorder %s1673_s30, 3 }
   0x4   : > { %p305_p2 = pnand %p1404_p0, %p304_p1 }
   0x5   : > { %v1597_v0 = vld [vmem:[%s2054_s3] sm:$0xff] (!%p305_p2)   ;;  %p347_p3 = scmp.lt.s32.totalorder (!%p305_p2), %s1400_s10, 1  ;;  %v1598_v1 = vld [vmem:[%s2054_s3 + $0x8] sm:$0xff] (!%p305_p2)   ;;  %vm401_vm0 = vcmask (!%p305_p2), 261120   ;;  %v1675_v12 = vmov (!%p305_p2), 0.0   ;;  %vm1676_vm1 = vmmov (!%p305_p2), 0  }
   0x6   : > { %308 = sbr.rel (%p305_p2) target bundleno = 1395 (0x573), region = 56  ;;  %1492 = vmatprep.subr.bf16.mxu0 (!%p305_p2), %v1597_v0  ;;  %v1599_v2 = vld [vmem:[%s2056_s5] sm:$0xff] (!%p305_p2)   ;;  %v1600_v15 = vld [vmem:[%s2056_s5 + $0x8] sm:$0xff] (!%p305_p2)   ;;  %vm555_vm2 = vcmask (!%p305_p2), 130048   ;;  %s1677_s29 = smov (!%p305_p2), 112   ;;  %vm658_vm3 = vcmask (!%p305_p2), 64512  }
   0x7   : > { %1493 = vmatpush3.bf16.msra.mxu0 (!%p305_p2), %v1597_v0  ;;  %v1410_v19 = vld [vmem:[%s2055_s4] ss:$0 sm:$0xff] (!%p305_p2)  ;;  %s1678_s17 = smov (!%p305_p2), 80   ;;  %vm766_vm4 = vcmask (!%p305_p2), 1043456  }
   0x8   : > { %1494 = vmatprep.subr.bf16.mxu0 (!%p305_p2), %v1598_v1  ;;  %v1417_v39 = vld [vmem:[%s2057_s6] ss:$0 sm:$0xff] (!%p305_p2) }
   0xb   : > { %1495 = vmatpush3.bf16.msra.mxu0 (!%p305_p2), %v1598_v1 }
   0xc   : > { %1504 = vmatprep.subr.bf16.mxu0 (!%p305_p2), %v1675_v12 }
   0xd   : > { %s2062_s10 = smov (!%p347_p3, %s1400_s10), 1 }
   0xe   : > { %s1451_s15 = sshll.u32 %s2062_s10, 6  ;;  %s1407_s23 = sshll.u32 %s2062_s10, 2 }
   0xf   : > { %s351_s18 = scalar_lea.vmem %s2051_s0, %s1451_s15  ;;  %s355_s26 = scalar_lea.vmem %s2052_s1, %s1407_s23 }
  0x10   : > { %v1755_v3 = vld [vmem:[%s351_s18] sm:$0xff]  ;;  %v1757_v4 = vld [vmem:[%s351_s18 + $0x8] sm:$0xff]  ;;  %v1759_v5 = vld [vmem:[%s351_s18 + $0x10] sm:$0xff]  ;;  %s358_s16 = scalar_lea.vmem %s2053_s2, %s2062_s10  ;;  %s363_s27 = scalar_lea.vmem %s2060_s9, %s1451_s15 }
  0x11   : > { %v374_v6 = vpack.c.bf16 %v1757_v4, %v1755_v3  ;;  %v1763_v7 = vld [vmem:[%s351_s18 + $0x18] sm:$0xff]  ;;  %v1765_v8 = vld [vmem:[%s351_s18 + $0x20] sm:$0xff]  ;;  %v1767_v9 = vld [vmem:[%s351_s18 + $0x28] sm:$0xff] }
  0x12   : > { %v375_v10 = vpack.c.bf16 %v1763_v7, %v1759_v5  ;;  %v376_v11 = vpack.c.bf16 %v1767_v9, %v1765_v8  ;;  %v1776_v13 = vld [vmem:[%s351_s18 + $0x30] sm:$0xff]  ;;  %v1778_v14 = vld [vmem:[%s351_s18 + $0x38] sm:$0xff]  ;;  %v373_v17 = vld [vmem:[%s355_s26] sm:$0xf]  ;;  %s1679_s18 = smov 96  }
  0x13   : > { %1496 = vmatprep.mubr.msk.bf16.mxu0 %vm401_vm0, %v374_v6  ;;  %v377_v16 = vpack.c.bf16 %v1778_v14, %v1776_v13  ;;  %v1818_v54 = vld [vmem:[%s358_s16] ss:$0 sm:$0xff] }
  0x14   : > { %1497 = vmatmul.mubr.msk.bf16.vlgmr.msra.gmra.mrb[0].mxu0 %vm401_vm0, %v375_v10 }
  0x15   : > { %1500 = vmatprep.mubr.msk.bf16.mxu0 %vm401_vm0, %v376_v11  ;;  %1505 = vmatpush3.bf16.msra.mxu0 %v1599_v2 }
  0x16   : > { %1506 = vmatprep.subr.bf16.mxu0 %v1675_v12 }
  0x19   : > { %1507 = vmatpush3.bf16.msra.mxu0 %v1600_v15 }
  0x1c   : > { %1501 = vmatmul.mubr.msk.bf16.gmra.mrb[4].mxu0 %vm401_vm0, %v377_v16 }
  0x1d   : > { %1508 = vmatprep.mubr.msk.bf16.mxu0 %vm1676_vm1, %v1675_v12 }
  0x24   : > { %1509 = vmatmul.mubr.msk.bf16.vlgmr.msra.gmra.mrb[8].mxu0 %vm401_vm0, %v373_v17 }
  0xe7   : > { %v1498_v18 = vpop.f32.mrb[0].mxu0 }
  0xe8   : > { %v448_v20 = vpop.f32.mrb[1].mxu0  ;;  %v457_v22 = vadd.f32 %v1498_v18, %v1410_v19 }
  0xe9   : > { %v1499_v21 = vpop.f32.mrb[2].mxu0  ;;  %v449_v25 = vadd.f32 %v1410_v19, %v448_v20 }
  0xea   : > { %v460_v23 = vadd.f32 %v1499_v21, %v1410_v19  ;;  %v451_v24 = vpop.f32.mrb[3].mxu0 }
  0xeb   : > { %v452_v26 = vadd.f32 %v1410_v19, %v451_v24 }
  0xec   : > { %v551_v27 = vpack.c.bf16 %v460_v23, %v457_v22 }
  0xed   : > { %v550_v28 = vpack.c.bf16 %v452_v26, %v449_v25 }
  0xee   : > { %845 = vrot.lane.b32.xlu1 %v551_v27, %s1677_s29 }
  0xef   : > { %v1502_v29 = vpop.f32.mrb[4].mxu0  ;;  %1514 = vmatprep.mubr.msk.bf16.mxu1 %vm555_vm2, %v550_v28 }
  0xf0   : > { %v464_v30 = vpop.f32.mrb[5].mxu0  ;;  %v473_v32 = vadd.f32 %v1502_v29, %v1410_v19 }
  0xf1   : > { %v1503_v31 = vpop.f32.mrb[6].mxu0  ;;  %v465_v35 = vadd.f32 %v1410_v19, %v464_v30 }
  0xf2   : > { %v476_v33 = vadd.f32 %v1503_v31, %v1410_v19  ;;  %v467_v34 = vpop.f32.mrb[7].mxu0 }
  0xf3   : > { %v468_v36 = vadd.f32 %v1410_v19, %v467_v34 }
  0xf4   : > { %v553_v37 = vpack.c.bf16 %v476_v33, %v473_v32 }
  0xf5   : > { %v552_v38 = vpack.c.bf16 %v468_v36, %v465_v35 }
  0xf7   : > { %v539_v40 = vpop.f32.mrb[8].mxu0  ;;  %847 = vrot.lane.b32.xlu1 %v552_v38, %s1677_s29 }
  0xf8   : > { %v540_v41 = vadd.f32 %v1417_v39, %v539_v40  ;;  %v1510_v42 = vpop.f32.mrb[9].mxu0 }
  0xf9   : > { %v542_v43 = vpop.f32.mrb[10].mxu0 }
  0xfa   : > { %v1798_v44 = vpack.c.bf16 %v540_v41, %v540_v41  ;;  %v1511_v45 = vpop.f32.mrb[11].mxu0 }
  0xfc   : > { %851 = vrot.lane.b32.xlu0 %v1798_v44, %s1677_s29  ;;  %1580 = vmatprep.subr.msk.bf16.mxu1 %vm555_vm2, %v1798_v44  ;;  %v569_v46 = vsel %vm555_vm2, %v1798_v44, 0 }
  0xfd   : > { %1513 = vmatpush3.bf16.xpose.msra.mxu1 %v569_v46 }
 0x100   : > { %843 = vrot.lane.b32.xlu0 %v550_v28, %s1677_s29 }
 0x104   : > { %849 = vrot.lane.b32.xlu0 %v553_v37, %s1677_s29  ;;  %1515 = vmatmul.mubr.msk.bf16.vlgmr.msra.gmra.mrb[0].mxu1 %vm555_vm2, %v551_v27 }
 0x105   : > { %1518 = vmatprep.mubr.msk.bf16.mxu1 %vm555_vm2, %v552_v38 }
 0x10c   : > { %1519 = vmatmul.mubr.msk.bf16.gmra.mrb[4].mxu1 %vm555_vm2, %v553_v37 }
 0x160   : > { %v846_v50 = vpop.permute.xlu1 %845 }
 0x169   : > { %v848_v51 = vpop.permute.xlu1 %847 }
 0x16e   : > { %v852_v47 = vpop.permute.xlu0 %851 }
 0x16f   : > { %v866_v48 = vsel %vm555_vm2, %v852_v47, 0  ;;  %1582 = vmatprep.subr.msk.bf16.mxu1 %vm555_vm2, %v852_v47 }
 0x170   : > { %1533 = vmatpush3.bf16.xpose.msra.mxu1 %v866_v48 }
 0x172   : > { %v844_v49 = vpop.permute.xlu0 %843 }
 0x173   : > { %1534 = vmatprep.mubr.msk.bf16.mxu1 %vm555_vm2, %v844_v49 }
 0x176   : > { %v850_v52 = vpop.permute.xlu0 %849 }
 0x177   : > { %1535 = vmatmul.mubr.msk.bf16.vlgmr.msra.gmra.mrb[8].mxu1 %vm555_vm2, %v846_v50 }
 0x178   : > { %1538 = vmatprep.mubr.msk.bf16.mxu1 %vm555_vm2, %v848_v51 }
 0x17f   : > { %1539 = vmatmul.mubr.msk.bf16.gmra.mrb[12].mxu1 %vm555_vm2, %v850_v52 }
 0x1d7   : > { %v1516_v53 = vpop.f32.mrb[0].mxu1 }
 0x1d8   : > { %v605_v55 = vpop.f32.mrb[1].mxu1  ;;  %v638_v58 = vmul.f32 0.25, %v1516_v53 }
 0x1d9   : > { %v636_v56 = vmul.f32 0.25, %v605_v55  ;;  %v1517_v57 = vpop.f32.mrb[2].mxu1 }
 0x1da   : > { %v639_v59 = vmul.f32 0.25, %v1517_v57  ;;  %v608_v60 = vpop.f32.mrb[3].mxu1  ;;  %v1832_v2 = vadd.f32 %v1818_v54, %v638_v58 }
 0x1db   : > { %v637_v61 = vmul.f32 0.25, %v608_v60  ;;  %v1821_v62 = vadd.f32 %v1818_v54, %v636_v56 }
 0x1dc   : > { %v1829_v1 = vadd.f32 %v1818_v54, %v639_v59  ;;  %v665_v18 = vsel %vm658_vm3, %v1832_v2, -inf }
 0x1dd   : > { %v659_v63 = vsel %vm658_vm3, %v1821_v62, -inf  ;;  %v1826_v0 = vadd.f32 %v1818_v54, %v637_v61 }
 0x1de   : > { %660 = vmax.xlane.f32.xlu1 %v659_v63  ;;  %v668_v16 = vsel %vm658_vm3, %v1829_v1, -inf }
 0x1df   : > { %v1520_v6 = vpop.f32.mrb[4].mxu1  ;;  %v662_v10 = vsel %vm658_vm3, %v1826_v0, -inf }
 0x1e0   : > { %663 = vmax.xlane.f32.xlu0 %v662_v10  ;;  %v621_v11 = vpop.f32.mrb[5].mxu1  ;;  %v642_v19 = vmul.f32 0.25, %v1520_v6 }
 0x1e1   : > { %v640_v12 = vmul.f32 0.25, %v621_v11  ;;  %v1521_v15 = vpop.f32.mrb[6].mxu1 }
 0x1e2   : > { %669 = vmax.xlane.f32.xlu1 %v668_v16  ;;  %v624_v17 = vpop.f32.mrb[7].mxu1  ;;  %v643_v20 = vmul.f32 0.25, %v1521_v15  ;;  %v1851_v26 = vadd.f32 %v1818_v54, %v642_v19 }
 0x1e3   : > { %v641_v21 = vmul.f32 0.25, %v624_v17  ;;  %v1841_v22 = vadd.f32 %v1818_v54, %v640_v12 }
 0x1e4   : > { %666 = vmax.xlane.f32.xlu0 %v665_v18  ;;  %v1854_v27 = vadd.f32 %v1818_v54, %v643_v20  ;;  %v677_v28 = vsel %vm658_vm3, %v1851_v26, -inf }
 0x1e5   : > { %v1844_v23 = vadd.f32 %v1818_v54, %v641_v21  ;;  %v671_v24 = vsel %vm658_vm3, %v1841_v22, -inf }
 0x1e6   : > { %v680_v29 = vsel %vm658_vm3, %v1854_v27, -inf }
 0x1e7   : > { %v674_v25 = vsel %vm658_vm3, %v1844_v23, -inf }
 0x1e8   : > { %672 = vmax.xlane.f32.xlu0 %v671_v24  ;;  %675 = vmax.xlane.f32.xlu1 %v674_v25 }
 0x1ec   : > { %678 = vmax.xlane.f32.xlu0 %v677_v28  ;;  %681 = vmax.xlane.f32.xlu1 %v680_v29 }
 0x24a   : > { %v1536_v30 = vpop.f32.mrb[8].mxu1 }
 0x24b   : > { %v902_v31 = vpop.f32.mrb[9].mxu1  ;;  %v935_v32 = vmul.f32 0.25, %v1536_v30 }
 0x24c   : > { %v933_v33 = vmul.f32 0.25, %v902_v31  ;;  %v1537_v34 = vpop.f32.mrb[10].mxu1 }
 0x24d   : > { %v905_v35 = vpop.f32.mrb[11].mxu1  ;;  %v936_v36 = vmul.f32 0.25, %v1537_v34  ;;  %v1869_v41 = vadd.f32 %v1818_v54, %v935_v32 }
 0x24e   : > { %v934_v37 = vmul.f32 0.25, %v905_v35  ;;  %v1861_v38 = vadd.f32 %v1818_v54, %v933_v33 }
 0x24f   : > { %v1874_v45 = vadd.f32 %v1818_v54, %v936_v36  ;;  %v955_v50 = vsel %vm658_vm3, %v1869_v41, -inf }
 0x250   : > { %v949_v39 = vsel %vm658_vm3, %v1861_v38, -inf  ;;  %v1866_v40 = vadd.f32 %v1818_v54, %v934_v37 }
 0x251   : > { %950 = vmax.xlane.f32.xlu0 %v949_v39  ;;  %v958_v55 = vsel %vm658_vm3, %v1874_v45, -inf }
 0x252   : > { %v1540_v42 = vpop.f32.mrb[12].mxu1  ;;  %v952_v43 = vsel %vm658_vm3, %v1866_v40, -inf }
 0x253   : > { %v918_v46 = vpop.f32.mrb[13].mxu1  ;;  %953 = vmax.xlane.f32.xlu1 %v952_v43  ;;  %v939_v47 = vmul.f32 0.25, %v1540_v42 }
 0x254   : > { %v937_v48 = vmul.f32 0.25, %v918_v46  ;;  %v1541_v49 = vpop.f32.mrb[14].mxu1 }
 0x255   : > { %956 = vmax.xlane.f32.xlu0 %v955_v50  ;;  %v921_v51 = vpop.f32.mrb[15].mxu1  ;;  %v940_v52 = vmul.f32 0.25, %v1541_v49  ;;  %v1889_v59 = vadd.f32 %v1818_v54, %v939_v47 }
 0x256   : > { %v938_v53 = vmul.f32 0.25, %v921_v51  ;;  %v1881_v56 = vadd.f32 %v1818_v54, %v937_v48 }
 0x257   : > { %959 = vmax.xlane.f32.xlu1 %v958_v55  ;;  %v1894_v61 = vadd.f32 %v1818_v54, %v940_v52  ;;  %v967_v63 = vsel %vm658_vm3, %v1889_v59, -inf }
 0x258   : > { %v961_v57 = vsel %vm658_vm3, %v1881_v56, -inf  ;;  %v1886_v58 = vadd.f32 %v1818_v54, %v938_v53 }
 0x259   : > { %962 = vmax.xlane.f32.xlu0 %v961_v57  ;;  %v970_v6 = vsel %vm658_vm3, %v1894_v61, -inf }
 0x25a   : > { %v964_v60 = vsel %vm658_vm3, %v1886_v58, -inf }
 0x25b   : > { %965 = vmax.xlane.f32.xlu1 %v964_v60 }
 0x25d   : > { %968 = vmax.xlane.f32.xlu0 %v967_v63 }
 0x25f   : > { %971 = vmax.xlane.f32.xlu1 %v970_v6 }
 0x26b   : > { %v661_v10 = vpop.xlane.xlu1 %660 }
 0x26c   : > { %v683_v16 = vsub.f32 %v1821_v62, %v661_v10 }
 0x26d   : > { %v664_v11 = vpop.xlane.xlu0 %663 }
 0x26e   : > { %v684_v12 = vsub.f32 %v1826_v0, %v664_v11  ;;  %v691_v21 = vmul.f32 1.442695, %v683_v16 }
 0x26f   : > { %v670_v15 = vpop.xlane.xlu1 %669 }
 0x270   : > { %v686_v17 = vsub.f32 %v1829_v1, %v670_v15  ;;  %v693_v54 = vmul.f32 1.442695, %v684_v12 }
 0x271   : > { %v667_v18 = vpop.xlane.xlu0 %666 }
 0x272   : > { %v697_v19 = vmul.f32 1.442695, %v686_v17  ;;  %v685_v20 = vsub.f32 %v1832_v2, %v667_v18 }
 0x274   : > { %1603 = vpow2.f32 %v697_v19  ;;  %v695_v24 = vmul.f32 1.442695, %v685_v20 }
 0x275   : > { %1605 = vpow2.f32 %v693_v54  ;;  %v673_v25 = vpop.xlane.xlu0 %672  ;;  %v676_v28 = vpop.xlane.xlu1 %675 }
 0x276   : > { %1607 = vpow2.f32 %v695_v24  ;;  %v687_v0 = vsub.f32 %v1841_v22, %v673_v25  ;;  %v688_v29 = vsub.f32 %v1844_v23, %v676_v28 }
 0x277   : > { %1609 = vpow2.f32 %v691_v21 }
 0x278   : > { %v699_v32 = vmul.f32 1.442695, %v687_v0  ;;  %v701_v34 = vmul.f32 1.442695, %v688_v29 }
 0x279   : > { %v679_v62 = vpop.xlane.xlu0 %678  ;;  %v682_v30 = vpop.xlane.xlu1 %681 }
 0x27a   : > { %v689_v1 = vsub.f32 %v1851_v26, %v679_v62  ;;  %v690_v31 = vsub.f32 %v1854_v27, %v682_v30 }
 0x27c   : > { %v703_v2 = vmul.f32 1.442695, %v689_v1  ;;  %v705_v33 = vmul.f32 1.442695, %v690_v31 }
 0x27e   : > { %v1908_v35 = vpop.eup %1603  ;;  %1611 = vpow2.f32 %v703_v2 }
 0x27f   : > { %v1910_v36 = vpop.eup %1605  ;;  %1613 = vpow2.f32 %v705_v33  ;;  %v716_v22 = vsel %vm658_vm3, %v1908_v35, 0.0 }
 0x280   : > { %v1914_v23 = vpop.eup %1607  ;;  %1615 = vpow2.f32 %v699_v32  ;;  %717 = vadd.xlane.f32.xlu1 %v716_v22  ;;  %v710_v37 = vsel %vm658_vm3, %v1910_v36, 0.0 }
 0x281   : > { %1617 = vpow2.f32 %v701_v34  ;;  %v713_v26 = vsel %vm658_vm3, %v1914_v23, 0.0  ;;  %v1918_v27 = vpop.eup %1609 }
 0x282   : > { %714 = vadd.xlane.f32.xlu0 %v713_v26  ;;  %v707_v39 = vsel %vm658_vm3, %v1918_v27, 0.0 }
 0x284   : > { %711 = vadd.xlane.f32.xlu1 %v710_v37 }
 0x286   : > { %708 = vadd.xlane.f32.xlu0 %v707_v39 }
 0x288   : > { %v1924_v42 = vpop.eup %1611 }
 0x289   : > { %v1926_v43 = vpop.eup %1613  ;;  %v725_v46 = vsel %vm658_vm3, %v1924_v42, 0.0 }
 0x28a   : > { %v1930_v47 = vpop.eup %1615  ;;  %726 = vadd.xlane.f32.xlu0 %v725_v46  ;;  %v728_v48 = vsel %vm658_vm3, %v1926_v43, 0.0 }
 0x28b   : > { %v1934_v49 = vpop.eup %1617  ;;  %729 = vadd.xlane.f32.xlu1 %v728_v48  ;;  %v719_v50 = vsel %vm658_vm3, %v1930_v47, 0.0 }
 0x28c   : > { %v722_v51 = vsel %vm658_vm3, %v1934_v49, 0.0 }
 0x28e   : > { %720 = vadd.xlane.f32.xlu0 %v719_v50 }
 0x28f   : > { %723 = vadd.xlane.f32.xlu1 %v722_v51 }
 0x2de   : > { %v951_v52 = vpop.xlane.xlu0 %950 }
 0x2df   : > { %v973_v53 = vsub.f32 %v1861_v38, %v951_v52 }
 0x2e0   : > { %v954_v55 = vpop.xlane.xlu1 %953 }
 0x2e1   : > { %v974_v60 = vsub.f32 %v1866_v40, %v954_v55  ;;  %v981_v6 = vmul.f32 1.442695, %v973_v53 }
 0x2e2   : > { %v957_v57 = vpop.xlane.xlu0 %956 }
 0x2e3   : > { %v975_v63 = vsub.f32 %v1869_v41, %v957_v57  ;;  %v983_v16 = vmul.f32 1.442695, %v974_v60 }
 0x2e4   : > { %v960_v10 = vpop.xlane.xlu1 %959 }
 0x2e5   : > { %v985_v11 = vmul.f32 1.442695, %v975_v63  ;;  %v976_v12 = vsub.f32 %v1874_v45, %v960_v10 }
 0x2e6   : > { %v963_v15 = vpop.xlane.xlu0 %962 }
 0x2e7   : > { %1619 = vpow2.f32 %v985_v11  ;;  %v987_v17 = vmul.f32 1.442695, %v976_v12  ;;  %v977_v54 = vsub.f32 %v1881_v56, %v963_v15 }
 0x2e8   : > { %1621 = vpow2.f32 %v981_v6  ;;  %v966_v18 = vpop.xlane.xlu1 %965 }
 0x2e9   : > { %1623 = vpow2.f32 %v987_v17  ;;  %v978_v40 = vsub.f32 %v1886_v58, %v966_v18  ;;  %v989_v19 = vmul.f32 1.442695, %v977_v54 }
 0x2ea   : > { %v969_v38 = vpop.xlane.xlu0 %968  ;;  %1625 = vpow2.f32 %v983_v16 }
 0x2eb   : > { %v979_v41 = vsub.f32 %v1889_v59, %v969_v38  ;;  %v991_v24 = vmul.f32 1.442695, %v978_v40 }
 0x2ec   : > { %v972_v20 = vpop.xlane.xlu1 %971 }
 0x2ed   : > { %v993_v21 = vmul.f32 1.442695, %v979_v41  ;;  %v980_v45 = vsub.f32 %v1894_v61, %v972_v20 }
 0x2ef   : > { %1627 = vpow2.f32 %v993_v21  ;;  %v995_v25 = vmul.f32 1.442695, %v980_v45 }
 0x2f0   : > { %1629 = vpow2.f32 %v989_v19 }
 0x2f1   : > { %v1948_v28 = vpop.eup %1619  ;;  %1631 = vpow2.f32 %v995_v25 }
 0x2f2   : > { %v1950_v56 = vpop.eup %1621  ;;  %v1003_v0 = vsel %vm658_vm3, %v1948_v28, 0.0  ;;  %1633 = vpow2.f32 %v991_v24 }
 0x2f3   : > { %v1954_v58 = vpop.eup %1623  ;;  %1004 = vadd.xlane.f32.xlu0 %v1003_v0  ;;  %v997_v29 = vsel %vm658_vm3, %v1950_v56, 0.0 }
 0x2f4   : > { %v1006_v59 = vsel %vm658_vm3, %v1954_v58, 0.0  ;;  %v1958_v61 = vpop.eup %1625 }
 0x2f5   : > { %1007 = vadd.xlane.f32.xlu1 %v1006_v59  ;;  %v1000_v62 = vsel %vm658_vm3, %v1958_v61, 0.0 }
 0x2f7   : > { %998 = vadd.xlane.f32.xlu0 %v997_v29 }
 0x2f9   : > { %v1964_v30 = vpop.eup %1627  ;;  %1001 = vadd.xlane.f32.xlu1 %v1000_v62 }
 0x2fa   : > { %v1966_v1 = vpop.eup %1629  ;;  %v1015_v31 = vsel %vm658_vm3, %v1964_v30, 0.0 }
 0x2fb   : > { %v1970_v32 = vpop.eup %1631  ;;  %1016 = vadd.xlane.f32.xlu0 %v1015_v31  ;;  %v1009_v34 = vsel %vm658_vm3, %v1966_v1, 0.0 }
 0x2fc   : > { %v1018_v2 = vsel %vm658_vm3, %v1970_v32, 0.0  ;;  %v1974_v33 = vpop.eup %1633 }
 0x2fd   : > { %1019 = vadd.xlane.f32.xlu1 %v1018_v2  ;;  %v1012_v22 = vsel %vm658_vm3, %v1974_v33, 0.0 }
 0x2ff   : > { %1010 = vadd.xlane.f32.xlu0 %v1009_v34 }
 0x301   : > { %1013 = vadd.xlane.f32.xlu1 %v1012_v22 }
 0x30d   : > { %v718_v26 = vpop.xlane.xlu1 %717 }
 0x30e   : > { %1635 = vrcp.f32 %v718_v26 }
 0x30f   : > { %v715_v37 = vpop.xlane.xlu0 %714 }
 0x310   : > { %1637 = vrcp.f32 %v715_v37 }
 0x311   : > { %v712_v39 = vpop.xlane.xlu1 %711 }
 0x312   : > { %1639 = vrcp.f32 %v712_v39  ;;  %1041 = vrot.lane.b32.xlu1 %v1798_v44, %s1678_s17 }
 0x313   : > { %v709_v46 = vpop.xlane.xlu0 %708 }
 0x314   : > { %1641 = vrcp.f32 %v709_v46 }
 0x315   : > { %752 = vrot.lane.b32.xlu0 %v1798_v44, %s1679_s18 }
 0x317   : > { %v727_v10 = vpop.xlane.xlu0 %726 }
 0x318   : > { %v1636_v48 = vpop.eup %1635  ;;  %v730_v11 = vpop.xlane.xlu1 %729 }
 0x319   : > { %v742_v51 = vmul.f32 %v1636_v48, %v1908_v35 }
 0x31a   : > { %v1638_v50 = vpop.eup %1637 }
 0x31b   : > { %v741_v52 = vmul.f32 %v1638_v50, %v1914_v23  ;;  %v721_v12 = vpop.xlane.xlu0 %720 }
 0x31c   : > { %v1640_v53 = vpop.eup %1639  ;;  %v724_v44 = vpop.xlane.xlu1 %723  ;;  %1643 = vrcp.f32 %v721_v12 }
 0x31d   : > { %v748_v55 = vpack.c.bf16 %v742_v51, %v741_v52  ;;  %v740_v63 = vmul.f32 %v1640_v53, %v1910_v36  ;;  %1645 = vrcp.f32 %v724_v44 }
 0x31e   : > { %v1642_v57 = vpop.eup %1641  ;;  %1647 = vrcp.f32 %v727_v10 }
 0x31f   : > { %v739_v60 = vmul.f32 %v1642_v57, %v1918_v27  ;;  %1649 = vrcp.f32 %v730_v11 }
 0x321   : > { %v747_v6 = vpack.c.bf16 %v740_v63, %v739_v60 }
 0x323   : > { %1524 = vmatprep.mubr.msk.bf16.mxu0 %vm658_vm3, %v747_v6 }
 0x326   : > { %v1644_v27 = vpop.eup %1643 }
 0x327   : > { %v1646_v18 = vpop.eup %1645  ;;  %v743_v41 = vmul.f32 %v1644_v27, %v1930_v47 }
 0x328   : > { %v744_v19 = vmul.f32 %v1646_v18, %v1934_v49  ;;  %v1648_v45 = vpop.eup %1647 }
 0x329   : > { %v1650_v24 = vpop.eup %1649  ;;  %v745_v59 = vmul.f32 %v1648_v45, %v1924_v42 }
 0x32a   : > { %v749_v25 = vpack.c.bf16 %v744_v19, %v743_v41  ;;  %v746_v29 = vmul.f32 %v1650_v24, %v1926_v43  ;;  %v1448_v19 = vld [vmem:[%s2059_s8] ss:$0 sm:$0xff] }
 0x32c   : > { %v750_v2 = vpack.c.bf16 %v746_v29, %v745_v59 }
 0x380   : > { %v1005_v15 = vpop.xlane.xlu0 %1004 }
 0x382   : > { %v1008_v16 = vpop.xlane.xlu1 %1007 }
 0x384   : > { %v999_v35 = vpop.xlane.xlu0 %998 }
 0x386   : > { %v1002_v23 = vpop.xlane.xlu1 %1001 }
 0x387   : > { %1651 = vrcp.f32 %v1002_v23 }
 0x388   : > { %v1017_v17 = vpop.xlane.xlu0 %1016  ;;  %1653 = vrcp.f32 %v999_v35 }
 0x389   : > { %1655 = vrcp.f32 %v1008_v16 }
 0x38a   : > { %v1020_v54 = vpop.xlane.xlu1 %1019 }
 0x38c   : > { %v1011_v36 = vpop.xlane.xlu0 %1010 }
 0x38e   : > { %v1014_v38 = vpop.xlane.xlu1 %1013 }
 0x38f   : > { %1657 = vrcp.f32 %v1014_v38 }
 0x390   : > { %v753_v40 = vpop.permute.xlu0 %752  ;;  %1659 = vrcp.f32 %v1005_v15 }
 0x391   : > { %v768_v20 = vsel %vm766_vm4, %v753_v40, 0  ;;  %1581 = vmatprep.subr.msk.bf16.mxu0 %vm766_vm4, %v753_v40  ;;  %v1652_v0 = vpop.eup %1651  ;;  %1661 = vrcp.f32 %v1011_v36 }
 0x392   : > { %1523 = vmatpush3.bf16.msra.mxu0 %v768_v20  ;;  %v1042_v21 = vpop.permute.xlu1 %1041  ;;  %v1654_v49 = vpop.eup %1653  ;;  %v1030_v62 = vmul.f32 %v1652_v0, %v1958_v61  ;;  %1663 = vrcp.f32 %v1020_v54 }
 0x393   : > { %1583 = vmatprep.subr.msk.bf16.mxu0 %vm766_vm4, %v1042_v21  ;;  %v1056_v47 = vsel %vm766_vm4, %v1042_v21, 0  ;;  %v1029_v31 = vmul.f32 %v1654_v49, %v1950_v56  ;;  %v1656_v34 = vpop.eup %1655  ;;  %1665 = vrcp.f32 %v1017_v17 }
 0x394   : > { %v1032_v42 = vmul.f32 %v1656_v34, %v1954_v58  ;;  %v1602_v58 = vld [vmem:[%s2058_s7] sm:$0xff]  }
 0x395   : > { %1525 = vmatmul.mubr.msk.bf16.vlgmr.msra.gmra.mrb[12].mxu0 %vm658_vm3, %v748_v55  ;;  %v1037_v22 = vpack.c.bf16 %v1030_v62, %v1029_v31 }
 0x396   : > { %1528 = vmatprep.mubr.msk.bf16.mxu0 %vm658_vm3, %v749_v25  ;;  %1543 = vmatpush3.bf16.msra.mxu0 %v1056_v47 }
 0x399   : > { %v1658_v26 = vpop.eup %1657 }
 0x39a   : > { %v1660_v37 = vpop.eup %1659  ;;  %v1034_v43 = vmul.f32 %v1658_v26, %v1974_v33 }
 0x39b   : > { %v1662_v39 = vpop.eup %1661  ;;  %v1031_v61 = vmul.f32 %v1660_v37, %v1948_v28  ;;  %v1601_v28 = vld [vmem:[%s2058_s7 + $0x8] sm:$0xff]  }
 0x39c   : > { %v1033_v46 = vmul.f32 %v1662_v39, %v1966_v1  ;;  %v1664_v48 = vpop.eup %1663  ;;  %1552 = vmatprep.subr.bf16.mxu1 %v1601_v28 }
 0x39d   : > { %1529 = vmatmul.mubr.msk.bf16.gmra.mrb[16].mxu0 %vm658_vm3, %v750_v2  ;;  %v1038_v56 = vpack.c.bf16 %v1032_v42, %v1031_v61  ;;  %v1666_v51 = vpop.eup %1665  ;;  %v1036_v52 = vmul.f32 %v1664_v48, %v1970_v32  ;;  %1553 = vmatpush3.bf16.msra.mxu1 %v1601_v28 }
 0x39e   : > { %1544 = vmatprep.mubr.msk.bf16.mxu0 %vm658_vm3, %v1037_v22  ;;  %v1039_v50 = vpack.c.bf16 %v1034_v43, %v1033_v46  ;;  %v1035_v53 = vmul.f32 %v1666_v51, %v1964_v30  ;;  %1562 = vmatprep.subr.bf16.mxu1 %v1602_v58 }
 0x3a0   : > { %v1040_v55 = vpack.c.bf16 %v1036_v52, %v1035_v53 }
 0x3a5   : > { %1545 = vmatmul.mubr.msk.bf16.vlgmr.msra.gmra.mrb[20].mxu0 %vm658_vm3, %v1038_v56 }
 0x3a6   : > { %1548 = vmatprep.mubr.msk.bf16.mxu0 %vm658_vm3, %v1039_v50 }
 0x3ad   : > { %1549 = vmatmul.mubr.msk.bf16.gmra.mrb[24].mxu0 %vm658_vm3, %v1040_v55 }
 0x468   : > { %v1526_v1 = vpop.f32.mrb[12].mxu0 }
 0x469   : > { %v804_v33 = vpop.f32.mrb[13].mxu0 }
 0x46a   : > { %v1527_v57 = vpop.f32.mrb[14].mxu0 }
 0x46b   : > { %v836_v32 = vpack.c.bf16 %v1527_v57, %v1526_v1  ;;  %v807_v60 = vpop.f32.mrb[15].mxu0 }
 0x46c   : > { %v835_v30 = vpack.c.bf16 %v807_v60, %v804_v33 }
 0x470   : > { %v1530_v63 = vpop.f32.mrb[16].mxu0 }
 0x471   : > { %v820_v6 = vpop.f32.mrb[17].mxu0 }
 0x472   : > { %v1531_v10 = vpop.f32.mrb[18].mxu0 }
 0x473   : > { %v838_v11 = vpack.c.bf16 %v1531_v10, %v1530_v63  ;;  %v823_v12 = vpop.f32.mrb[19].mxu0 }
 0x474   : > { %v837_v44 = vpack.c.bf16 %v823_v12, %v820_v6 }
 0x478   : > { %v1546_v15 = vpop.f32.mrb[20].mxu0 }
 0x479   : > { %v1092_v16 = vpop.f32.mrb[21].mxu0 }
 0x47a   : > { %v1547_v35 = vpop.f32.mrb[22].mxu0 }
 0x47b   : > { %v1124_v23 = vpack.c.bf16 %v1547_v35, %v1546_v15  ;;  %v1095_v17 = vpop.f32.mrb[23].mxu0 }
 0x47c   : > { %v1123_v54 = vpack.c.bf16 %v1095_v17, %v1092_v16 }
 0x47e   : > { %1554 = vmatprep.mubr.msk.bf16.mxu1 %vm555_vm2, %v1123_v54 }
 0x47f   : > { %1555 = vmatmul.mubr.msk.bf16.vlgmr.msra.gmra.mrb[16].mxu1 %vm555_vm2, %v1124_v23 }
 0x480   : > { %v1550_v27 = vpop.f32.mrb[24].mxu0  ;;  %1563 = vmatpush3.bf16.msra.mxu1 %v1602_v58 }
 0x481   : > { %v1108_v36 = vpop.f32.mrb[25].mxu0 }
 0x482   : > { %v1551_v18 = vpop.f32.mrb[26].mxu0 }
 0x483   : > { %v1126_v38 = vpack.c.bf16 %v1551_v18, %v1550_v27  ;;  %v1111_v40 = vpop.f32.mrb[27].mxu0 }
 0x484   : > { %v1125_v41 = vpack.c.bf16 %v1111_v40, %v1108_v36 }
 0x486   : > { %1558 = vmatprep.mubr.msk.bf16.mxu1 %vm555_vm2, %v1125_v41 }
 0x487   : > { %1559 = vmatmul.mubr.msk.bf16.gmra.mrb[20].mxu1 %vm555_vm2, %v1126_v38 }
 0x488   : > { %1564 = vmatprep.mubr.msk.bf16.mxu1 %vm555_vm2, %v835_v30 }
 0x48f   : > { %1565 = vmatmul.mubr.msk.bf16.vlgmr.msra.gmra.mrb[16].mxu1 %vm555_vm2, %v836_v32 }
 0x490   : > { %1568 = vmatprep.mubr.msk.bf16.mxu1 %vm555_vm2, %v837_v44 }
 0x497   : > { %1569 = vmatmul.mubr.msk.bf16.gmra.mrb[20].mxu1 %vm555_vm2, %v838_v11 }
 0x562   : > { %v1566_v20 = vpop.f32.mrb[16].mxu1 }
 0x563   : > { %v1302_v21 = vadd.f32 %v1566_v20, %v1448_v19  ;;  %v1262_v45 = vpop.f32.mrb[17].mxu1 }
 0x564   : > { %v1300_v24 = vadd.f32 %v1448_v19, %v1262_v45  ;;  %v1567_v25 = vpop.f32.mrb[18].mxu1 }
 0x565   : > { %v1310_v0 = vadd.f32 %v1302_v21, %v1759_v5  ;;  %v1303_v47 = vadd.f32 %v1567_v25, %v1448_v19  ;;  %v1265_v49 = vpop.f32.mrb[19].mxu1 }
 0x566   : > { %v1308_v59 = vadd.f32 %v1300_v24, %v1755_v3  ;;  %v1301_v29 = vadd.f32 %v1448_v19, %v1265_v49 }
 0x567   : > { %1318 = vst.msk [vmem:[%s363_s27 + $0x10] sm:$0xff] %vm401_vm0, %v1310_v0  ;;  %v1311_v62 = vadd.f32 %v1303_v47, %v1763_v7 }
 0x568   : > { %1316 = vst.msk [vmem:[%s363_s27] sm:$0xff] %vm401_vm0, %v1308_v59  ;;  %v1309_v31 = vadd.f32 %v1301_v29, %v1757_v4 }
 0x569   : > { %1319 = vst.msk [vmem:[%s363_s27 + $0x18] sm:$0xff] %vm401_vm0, %v1311_v62 }
 0x56a   : > { %1317 = vst.msk [vmem:[%s363_s27 + $0x8] sm:$0xff] %vm401_vm0, %v1309_v31  ;;  %v1570_v2 = vpop.f32.mrb[20].mxu1 }
 0x56b   : > { %v1306_v34 = vadd.f32 %v1570_v2, %v1448_v19  ;;  %v1278_v5 = vpop.f32.mrb[21].mxu1 }
 0x56c   : > { %v1304_v22 = vadd.f32 %v1448_v19, %v1278_v5  ;;  %v1571_v26 = vpop.f32.mrb[22].mxu1 }
 0x56d   : > { %v1314_v3 = vadd.f32 %v1306_v34, %v1776_v13  ;;  %v1307_v37 = vadd.f32 %v1571_v26, %v1448_v19  ;;  %v1281_v39 = vpop.f32.mrb[23].mxu1 }
 0x56e   : > { %v1312_v42 = vadd.f32 %v1304_v22, %v1765_v8  ;;  %v1305_v7 = vadd.f32 %v1448_v19, %v1281_v39 }
 0x56f   : > { %1322 = vst.msk [vmem:[%s363_s27 + $0x30] sm:$0xff] %vm401_vm0, %v1314_v3  ;;  %v1315_v4 = vadd.f32 %v1307_v37, %v1778_v14 }
 0x570   : > { %1320 = vst.msk [vmem:[%s363_s27 + $0x20] sm:$0xff] %vm401_vm0, %v1312_v42  ;;  %v1313_v43 = vadd.f32 %v1305_v7, %v1767_v9 }
 0x571   : > { %1323 = vst.msk [vmem:[%s363_s27 + $0x38] sm:$0xff] %vm401_vm0, %v1315_v4 }
 0x572   : > { %1321 = vst.msk [vmem:[%s363_s27 + $0x28] sm:$0xff] %vm401_vm0, %v1313_v43 }
 0x573 PF: > { %s19_s30 = sadd.s32 1, %s1673_s30  }
 0x574   : > { %p16_p4 = scmp.ge.s32.totalorder %s19_s30, 4  }
 0x576   :  { %18 = sbr.rel (!%p16_p4) target bundleno = 1 (0x1), region = 92 }

// kernel: tracing_transformer_wrapper_forward.15
= control target key start
LH: loop header
LB: loop body
LE: loop exit
PB: predicated region body
PF: predicated region fallthrough
CT: control target
= control target key end

     0   :  { %s691_s18 = smov 0   ;;  %s800_s0 = inlined_call_operand.vmem [shape: f32[2,64,32], index: 0, kind: input, shape index: {}]   ;;  %s801_s1 = inlined_call_operand.vmem [shape: f32[2,1,32], index: 1, kind: input, shape index: {}]   ;;  %s802_s2 = inlined_call_operand.vmem [shape: f32[2,1,32], index: 2, kind: input, shape index: {}]   ;;  %s803_s3 = inlined_call_operand.vmem [shape: bf16[32,32], index: 3, kind: input, shape index: {}]   ;;  %s804_s4 = inlined_call_operand.vmem [shape: f32[1,32], index: 4, kind: input, shape index: {}]   ;;  %s805_s5 = inlined_call_operand.vmem [shape: f32[2,64,32], index: 5, kind: output, shape index: {}]  }
   0x1 LB: > { %s584_s19 = sadd.s32 4294967295, %s659_s18   ;;  %p588_p0 = scmp.ge.s32.totalorder %s659_s18, 1  ;;  %s659_s18 = sphi %s691_s18, %s15_s18  }
   0x2   : > { %p203_p1 = scmp.lt.s32.totalorder %s659_s18, 3 }
   0x4   : > { %p204_p2 = pnand %p588_p0, %p203_p1 }
   0x5   : > { %p237_p3 = scmp.lt.s32.totalorder (!%p204_p2), %s584_s19, 1  ;;  %vm264_vm0 = vcmask (!%p204_p2), 261120   ;;  %v635_v56 = vld [vmem:[%s803_s3] sm:$0xff] (!%p204_p2)   ;;  %v636_v57 = vld [vmem:[%s803_s3 + $0x8] sm:$0xff] (!%p204_p2)   ;;  %v372_v61 = vlaneseq (!%p204_p2) }
   0x6   : > { %207 = sbr.rel (%p204_p2) target bundleno = 566 (0x236), region = 40  ;;  %611 = vmatprep.subr.bf16.mxu0 (!%p204_p2), %v635_v56  ;;  %623 = vmatprep.subr.bf16.mxu1 (!%p204_p2), %v635_v56 }
   0x7   : > { %612 = vmatpush3.bf16.msra.mxu0 (!%p204_p2), %v635_v56  ;;  %625 = vmatpush3.bf16.msra.mxu1 (!%p204_p2), %v635_v56 }
   0x8   : > { %613 = vmatprep.subr.bf16.mxu0 (!%p204_p2), %v636_v57  ;;  %624 = vmatprep.subr.bf16.mxu1 (!%p204_p2), %v636_v57 }
   0xb   : > { %614 = vmatpush3.bf16.msra.mxu0 (!%p204_p2), %v636_v57  ;;  %626 = vmatpush3.bf16.msra.mxu1 (!%p204_p2), %v636_v57 }
   0xd   : > { %s807_s19 = smov (!%p237_p3, %s584_s19), 1 }
   0xe   : > { %s603_s20 = sshll.u32 %s807_s19, 6  ;;  %s244_s30 = scalar_lea.vmem %s801_s1, %s807_s19 }
   0xf   : > { %s241_s23 = scalar_lea.vmem %s800_s0, %s603_s20  ;;  %s247_s8 = scalar_lea.vmem %s802_s2, %s807_s19 }
  0x10   : > { %v254_v0 = vld [vmem:[%s241_s23] sm:$0xff]  ;;  %v255_v2 = vld [vmem:[%s241_s23 + $0x8] sm:$0xff]  ;;  %v256_v8 = vld [vmem:[%s241_s23 + $0x10] sm:$0xff]  ;;  %s252_s13 = scalar_lea.vmem %s805_s5, %s603_s20 }
  0x11   : > { %v258_v1 = vld [vmem:[%s241_s23 + $0x20] sm:$0xff]  ;;  %v265_v3 = vsel %vm264_vm0, %v254_v0, 0.0  ;;  %v259_v5 = vld [vmem:[%s241_s23 + $0x28] sm:$0xff]  ;;  %v268_v6 = vsel %vm264_vm0, %v255_v2, 0.0  ;;  %v257_v9 = vld [vmem:[%s241_s23 + $0x18] sm:$0xff]  ;;  %v271_v10 = vsel %vm264_vm0, %v256_v8, 0.0 }
  0x12   : > { %v277_v4 = vsel %vm264_vm0, %v258_v1, 0.0  ;;  %266 = vadd.xlane.f32.xlu0 %v265_v3  ;;  %v280_v7 = vsel %vm264_vm0, %v259_v5, 0.0  ;;  %v274_v11 = vsel %vm264_vm0, %v257_v9, 0.0  ;;  %v260_v12 = vld [vmem:[%s241_s23 + $0x30] sm:$0xff]  ;;  %v261_v13 = vld [vmem:[%s241_s23 + $0x38] sm:$0xff] }
  0x13   : > { %278 = vadd.xlane.f32.xlu1 %v277_v4  ;;  %v283_v14 = vsel %vm264_vm0, %v260_v12, 0.0  ;;  %v286_v15 = vsel %vm264_vm0, %v261_v13, 0.0  ;;  %v373_v4 = vshrl.u32 %v372_v61, 7 }
  0x16   : > { %269 = vadd.xlane.f32.xlu0 %v268_v6 }
  0x17   : > { %281 = vadd.xlane.f32.xlu1 %v280_v7  ;;  %v262_v7 = vld [vmem:[%s244_s30] sm:$0x1] }
  0x1a   : > { %272 = vadd.xlane.f32.xlu0 %v271_v10 }
  0x1b   : > { %275 = vadd.xlane.f32.xlu1 %v274_v11 }
  0x1e   : > { %284 = vadd.xlane.f32.xlu0 %v283_v14 }
  0x1f   : > { %287 = vadd.xlane.f32.xlu1 %v286_v15 }
  0x9f   : > { %v267_v16 = vpop.xlane.xlu0 %266 }
  0xa0   : > { %v279_v17 = vpop.xlane.xlu1 %278  ;;  %v290_v18 = vmul.f32 0.03125, %v267_v16 }
  0xa1   : > { %v294_v19 = vmul.f32 0.03125, %v279_v17 }
  0xa2   : > { %v715_v20 = vsub.f32 %v254_v0, %v290_v18 }
  0xa3   : > { %v717_v21 = vsub.f32 %v258_v1, %v294_v19  ;;  %v270_v22 = vpop.xlane.xlu0 %269 }
  0xa4   : > { %v282_v23 = vpop.xlane.xlu1 %281  ;;  %v291_v24 = vmul.f32 0.03125, %v270_v22  ;;  %v306_v26 = vmul.f32 %v715_v20, %v715_v20 }
  0xa5   : > { %v295_v25 = vmul.f32 0.03125, %v282_v23  ;;  %v310_v27 = vmul.f32 %v717_v21, %v717_v21 }
  0xa6   : > { %v723_v28 = vsub.f32 %v255_v2, %v291_v24  ;;  %v314_v30 = vsel %vm264_vm0, %v306_v26, 0.0 }
  0xa7   : > { %v725_v29 = vsub.f32 %v259_v5, %v295_v25  ;;  %315 = vadd.xlane.f32.xlu0 %v314_v30  ;;  %v273_v31 = vpop.xlane.xlu0 %272  ;;  %v326_v33 = vsel %vm264_vm0, %v310_v27, 0.0 }
  0xa8   : > { %v276_v32 = vpop.xlane.xlu1 %275  ;;  %v292_v34 = vmul.f32 0.03125, %v273_v31  ;;  %v307_v36 = vmul.f32 %v723_v28, %v723_v28 }
  0xa9   : > { %v293_v35 = vmul.f32 0.03125, %v276_v32  ;;  %v311_v37 = vmul.f32 %v725_v29, %v725_v29 }
  0xaa   : > { %v733_v38 = vsub.f32 %v256_v8, %v292_v34  ;;  %v317_v40 = vsel %vm264_vm0, %v307_v36, 0.0  ;;  %v593_v34 = vld [vmem:[%s247_s8] ss:$0 sm:$0xff] }
  0xab   : > { %v735_v39 = vsub.f32 %v257_v9, %v293_v35  ;;  %327 = vadd.xlane.f32.xlu0 %v326_v33  ;;  %318 = vadd.xlane.f32.xlu1 %v317_v40  ;;  %v285_v41 = vpop.xlane.xlu0 %284  ;;  %v329_v43 = vsel %vm264_vm0, %v311_v37, 0.0 }
  0xac   : > { %v288_v42 = vpop.xlane.xlu1 %287  ;;  %v296_v44 = vmul.f32 0.03125, %v285_v41  ;;  %v308_v46 = vmul.f32 %v733_v38, %v733_v38 }
  0xad   : > { %v297_v45 = vmul.f32 0.03125, %v288_v42  ;;  %v309_v47 = vmul.f32 %v735_v39, %v735_v39 }
  0xae   : > { %v743_v48 = vsub.f32 %v260_v12, %v296_v44  ;;  %v320_v50 = vsel %vm264_vm0, %v308_v46, 0.0  ;;  %v370_v12 = vadd.f32 1.0, %v262_v7 }
  0xaf   : > { %v745_v49 = vsub.f32 %v261_v13, %v297_v45  ;;  %330 = vadd.xlane.f32.xlu1 %v329_v43  ;;  %321 = vadd.xlane.f32.xlu0 %v320_v50  ;;  %v323_v51 = vsel %vm264_vm0, %v309_v47, 0.0  ;;  %v374_v13 = vsub.s32 0, %v373_v4 }
  0xb0   : > { %v312_v52 = vmul.f32 %v743_v48, %v743_v48 }
  0xb1   : > { %v313_v53 = vmul.f32 %v745_v49, %v745_v49  ;;  %v375_v23 = vrot.slane %v370_v12, %v374_v13 }
  0xb2   : > { %v332_v54 = vsel %vm264_vm0, %v312_v52, 0.0 }
  0xb3   : > { %324 = vadd.xlane.f32.xlu1 %v323_v51  ;;  %333 = vadd.xlane.f32.xlu0 %v332_v54  ;;  %v335_v55 = vsel %vm264_vm0, %v313_v53, 0.0 }
  0xb7   : > { %336 = vadd.xlane.f32.xlu1 %v335_v55 }
 0x134   : > { %v316_v58 = vpop.xlane.xlu0 %315 }
 0x135   : > { %v338_v59 = vmul.f32 0.03125, %v316_v58 }
 0x137   : > { %v346_v60 = vadd.f32 1e-06, %v338_v59 }
 0x138   : > { %v319_v62 = vpop.xlane.xlu1 %318  ;;  %v328_v63 = vpop.xlane.xlu0 %327 }
 0x139   : > { %637 = vrsqrt.f32 %v346_v60  ;;  %v339_v0 = vmul.f32 0.03125, %v319_v62  ;;  %v342_v1 = vmul.f32 0.03125, %v328_v63 }
 0x13b   : > { %v347_v2 = vadd.f32 1e-06, %v339_v0  ;;  %v350_v3 = vadd.f32 1e-06, %v342_v1 }
 0x13c   : > { %v331_v5 = vpop.xlane.xlu1 %330  ;;  %v322_v6 = vpop.xlane.xlu0 %321 }
 0x13d   : > { %639 = vrsqrt.f32 %v347_v2  ;;  %v343_v8 = vmul.f32 0.03125, %v331_v5  ;;  %v340_v9 = vmul.f32 0.03125, %v322_v6 }
 0x13e   : > { %641 = vrsqrt.f32 %v350_v3 }
 0x13f   : > { %v351_v10 = vadd.f32 1e-06, %v343_v8  ;;  %v348_v11 = vadd.f32 1e-06, %v340_v9 }
 0x140   : > { %v325_v14 = vpop.xlane.xlu1 %324  ;;  %v334_v15 = vpop.xlane.xlu0 %333 }
 0x141   : > { %643 = vrsqrt.f32 %v351_v10  ;;  %v341_v16 = vmul.f32 0.03125, %v325_v14  ;;  %v344_v17 = vmul.f32 0.03125, %v334_v15 }
 0x142   : > { %645 = vrsqrt.f32 %v348_v11 }
 0x143   : > { %v638_v18 = vpop.eup %637  ;;  %v349_v19 = vadd.f32 1e-06, %v341_v16  ;;  %v352_v22 = vadd.f32 1e-06, %v344_v17 }
 0x144   : > { %v337_v24 = vpop.xlane.xlu1 %336  ;;  %v362_v25 = vmul.f32 %v638_v18, %v715_v20 }
 0x145   : > { %647 = vrsqrt.f32 %v349_v19  ;;  %v345_v26 = vmul.f32 0.03125, %v337_v24 }
 0x146   : > { %649 = vrsqrt.f32 %v352_v22  ;;  %v377_v33 = vmul.f32 %v375_v23, %v362_v25 }
 0x147   : > { %v640_v27 = vpop.eup %639  ;;  %v353_v30 = vadd.f32 1e-06, %v345_v26 }
 0x148   : > { %v642_v31 = vpop.eup %641  ;;  %v363_v32 = vmul.f32 %v640_v27, %v723_v28  ;;  %v391_v40 = vadd.f32 %v593_v34, %v377_v33 }
 0x149   : > { %651 = vrsqrt.f32 %v353_v30  ;;  %v366_v35 = vmul.f32 %v642_v31, %v717_v21 }
 0x14a   : > { %v378_v36 = vmul.f32 %v375_v23, %v363_v32 }
 0x14b   : > { %v644_v37 = vpop.eup %643  ;;  %v381_v43 = vmul.f32 %v375_v23, %v366_v35 }
 0x14c   : > { %v646_v20 = vpop.eup %645  ;;  %v392_v41 = vadd.f32 %v593_v34, %v378_v36  ;;  %v367_v42 = vmul.f32 %v644_v37, %v725_v29 }
 0x14d   : > { %v364_v44 = vmul.f32 %v646_v20, %v733_v38  ;;  %v395_v51 = vadd.f32 %v593_v34, %v381_v43 }
 0x14e   : > { %v399_v45 = vpack.c.bf16 %v392_v41, %v391_v40  ;;  %v382_v46 = vmul.f32 %v375_v23, %v367_v42 }
 0x14f   : > { %v648_v47 = vpop.eup %647  ;;  %v379_v52 = vmul.f32 %v375_v23, %v364_v44 }
 0x150   : > { %v650_v50 = vpop.eup %649  ;;  %v365_v28 = vmul.f32 %v648_v47, %v735_v39  ;;  %615 = vmatprep.mubr.msk.bf16.mxu0 %vm264_vm0, %v399_v45  ;;  %v396_v21 = vadd.f32 %v593_v34, %v382_v46 }
 0x151   : > { %v368_v53 = vmul.f32 %v650_v50, %v743_v48  ;;  %v393_v38 = vadd.f32 %v593_v34, %v379_v52  ;;  %v594_v48 = vld [vmem:[%s804_s4] ss:$0 sm:$0xff] }
 0x152   : > { %v401_v54 = vpack.c.bf16 %v396_v21, %v395_v51  ;;  %v380_v55 = vmul.f32 %v375_v23, %v365_v28 }
 0x153   : > { %v652_v29 = vpop.eup %651  ;;  %v383_v58 = vmul.f32 %v375_v23, %v368_v53 }
 0x154   : > { %v369_v56 = vmul.f32 %v652_v29, %v745_v49  ;;  %619 = vmatprep.mubr.msk.bf16.mxu1 %vm264_vm0, %v401_v54  ;;  %v394_v57 = vadd.f32 %v593_v34, %v380_v55 }
 0x155   : > { %v397_v60 = vadd.f32 %v593_v34, %v383_v58 }
 0x156   : > { %v400_v59 = vpack.c.bf16 %v394_v57, %v393_v38  ;;  %v384_v39 = vmul.f32 %v375_v23, %v369_v56 }
 0x158   : > { %616 = vmatmul.mubr.msk.bf16.vlgmr.msra.gmra.mrb[0].mxu0 %vm264_vm0, %v400_v59  ;;  %v398_v61 = vadd.f32 %v593_v34, %v384_v39 }
 0x15a   : > { %v402_v62 = vpack.c.bf16 %v398_v61, %v397_v60 }
 0x15c   : > { %620 = vmatmul.mubr.msk.bf16.vlgmr.msra.gmra.mrb[0].mxu1 %vm264_vm0, %v402_v62 }
 0x22b   : > { %v617_v49 = vpop.f32.mrb[0].mxu0 }
 0x22c   : > { %v481_v63 = vadd.f32 %v617_v49, %v594_v48  ;;  %v472_v0 = vpop.f32.mrb[1].mxu0 }
 0x22d   : > { %v473_v1 = vadd.f32 %v594_v48, %v472_v0  ;;  %v618_v2 = vpop.f32.mrb[2].mxu0 }
 0x22e   : > { %505 = vst.msk [vmem:[%s252_s13 + $0x10] sm:$0xff] %vm264_vm0, %v481_v63  ;;  %v484_v3 = vadd.f32 %v618_v2, %v594_v48  ;;  %v475_v4 = vpop.f32.mrb[3].mxu0 }
 0x22f   : > { %503 = vst.msk [vmem:[%s252_s13] sm:$0xff] %vm264_vm0, %v473_v1  ;;  %v476_v5 = vadd.f32 %v594_v48, %v475_v4  ;;  %v621_v6 = vpop.f32.mrb[0].mxu1 }
 0x230   : > { %506 = vst.msk [vmem:[%s252_s13 + $0x18] sm:$0xff] %vm264_vm0, %v484_v3  ;;  %v497_v7 = vadd.f32 %v621_v6, %v594_v48  ;;  %v488_v8 = vpop.f32.mrb[1].mxu1 }
 0x231   : > { %504 = vst.msk [vmem:[%s252_s13 + $0x8] sm:$0xff] %vm264_vm0, %v476_v5  ;;  %v489_v9 = vadd.f32 %v594_v48, %v488_v8  ;;  %v622_v10 = vpop.f32.mrb[2].mxu1 }
 0x232   : > { %509 = vst.msk [vmem:[%s252_s13 + $0x30] sm:$0xff] %vm264_vm0, %v497_v7  ;;  %v500_v11 = vadd.f32 %v622_v10, %v594_v48  ;;  %v491_v12 = vpop.f32.mrb[3].mxu1 }
 0x233   : > { %507 = vst.msk [vmem:[%s252_s13 + $0x20] sm:$0xff] %vm264_vm0, %v489_v9  ;;  %v492_v13 = vadd.f32 %v594_v48, %v491_v12 }
 0x234   : > { %510 = vst.msk [vmem:[%s252_s13 + $0x38] sm:$0xff] %vm264_vm0, %v500_v11 }
 0x235   : > { %508 = vst.msk [vmem:[%s252_s13 + $0x28] sm:$0xff] %vm264_vm0, %v492_v13 }
 0x236 PF: > { %s15_s18 = sadd.s32 1, %s659_s18  }
 0x237   : > { %p12_p4 = scmp.ge.s32.totalorder %s15_s18, 4  }
 0x239   :  { %14 = sbr.rel (!%p12_p4) target bundleno = 1 (0x1), region = 76 }

</bundles_post_ra>
